<compile_context>
chip_gen: v7x
topology: tpu7x:2x2x1
jax: 0.10.0
libtpu: 0.0.40
codegen_flags: <defaults>
</compile_context>

<pallas_src>
import jax
import jax.numpy as jnp
import numpy as np
from jax import lax
from jax.experimental import pallas as pl
from jax.experimental.pallas import tpu as pltpu


def _round_up(x, m):
    return ((x + m - 1) // m) * m


def _vmem_limit(footprint_bytes):
    """Double-buffered footprint + headroom, clipped to sane bounds."""
    return int(min(100 * 2 ** 20, max(16 * 2 ** 20, footprint_bytes + (8 << 20))))


def _m_tiling(m, tm_max=512):
    """Row tiling: (8,128)/bf16-friendly tiles, >=2 grid steps when possible."""
    if m >= 2 * tm_max:
        tm = tm_max
    else:
        tm = max(16, _round_up((m + 1) // 2, 16))
    return tm, _round_up(m, tm)


def _row_tiling(ho, tr_max=4):
    """Output rows per grid step for the fused conv (minimize padded rows)."""
    best_tr, best_pad = 1, ho
    for tr in range(2, min(tr_max, ho) + 1):
        pad = _round_up(ho, tr)
        if pad <= best_pad:
            best_tr, best_pad = tr, pad
    return best_tr, best_pad


def _fold_bn(params, eps=1e-5):
    """Fold eval-mode BN (+ conv bias) into a weight scale and an output bias."""
    scale = params["gamma"] * lax.rsqrt(params["var"] + eps)
    bias = params["beta"] + (params["b"] - params["mean"]) * scale
    w = params["w"] * scale                      # scale folded into weight columns
    return w, bias


# ----------------------------- Pallas kernels ------------------------------ #

def _matmul_bias_relu_kernel(x_ref, w_ref, b_ref, o_ref):
    """1x1 conv tile: (TM, Cin) @ (Cin, Cout_pad) + bias, ReLU (weights resident)."""
    acc = jnp.dot(x_ref[...], w_ref[...], preferred_element_type=jnp.float32)
    o_ref[...] = jnp.maximum(acc + b_ref[...], 0.0).astype(o_ref.dtype)


def _make_fused3x3_kernel(stride, tr_rows, hp):
    """3x3 conv + BN + ReLU with the 9-tap gather fused in-kernel.

    Refs (inputs, then output):
      x_refs[q]: (Hp, Wq, Cin)        resident padded image, width parity q
      w_ref:     (9, Cin, Cout_pad)   resident, BN-scale folded, tap-major
      b_ref:     (1, Cout_pad)        f32 folded BN bias
      o_ref:     (TR, Wo, Cout_pad)   output rows for this grid step
    """
    def kernel(*refs):
        x_refs = refs[:stride]
        w_ref, b_ref, o_ref = refs[stride], refs[stride + 1], refs[stride + 2]
        wo, cout = o_ref.shape[1], o_ref.shape[2]
        bias = b_ref[...]
        t = pl.program_id(1)
        for tr in range(tr_rows):
            r = t * tr_rows + tr                          # output row (maybe a pad row)
            acc = jnp.zeros((wo, cout), jnp.float32)
            for kh in range(3):
                # Clamp keeps padded output rows in-bounds (results are stripped).
                r_in = jnp.minimum(stride * r + kh, hp - 1)
                bands = [x_refs[q][r_in] for q in range(stride)]      # (Wq, Cin)
                for kw in range(3):
                    c0 = kw // stride
                    tap = bands[kw % stride][c0:c0 + wo, :]           # (Wo, Cin)
                    acc = acc + jnp.dot(tap, w_ref[kh * 3 + kw],
                                        preferred_element_type=jnp.float32)
            o_ref[tr] = jnp.maximum(acc + bias, 0.0).astype(o_ref.dtype)
    return kernel


def _maxpool_kernel(p_ref, o_ref):
    """3x3/s2 max pool over 9 lane-dense flattened taps: (9, TR, 128) -> (TR, 128)."""
    m = p_ref[0]
    for k in range(1, 9):
        m = jnp.maximum(m, p_ref[k])
    o_ref[...] = m


# ------------------------------- JAX wrappers ------------------------------- #

def conv1x1_bn_relu(x_nhwc, params, out_dtype, compute_dtype=jnp.bfloat16,
                    keep_cout_pad=False):
    w, bias = _fold_bn(params)
    cin, cout = w.shape[2], w.shape[3]
    n, h, wd, cin_in = x_nhwc.shape
    cout_pad = _round_up(cout, 128)

    w2 = w.reshape(cin, cout)
    if cin_in > cin:                              # input may carry zero-padded channels
        w2 = jnp.pad(w2, ((0, cin_in - cin), (0, 0)))
    w2 = jnp.pad(w2, ((0, 0), (0, cout_pad - cout))).astype(compute_dtype)
    bias_p = jnp.pad(bias, (0, cout_pad - cout)).reshape(1, cout_pad)

    m = n * h * wd
    tm, m_pad = _m_tiling(m)
    x2 = x_nhwc.astype(compute_dtype).reshape(m, cin_in)
    x2 = jnp.pad(x2, ((0, m_pad - m), (0, 0)))

    isz = jnp.dtype(compute_dtype).itemsize
    osz = jnp.dtype(out_dtype).itemsize
    footprint = 2 * (tm * cin_in * isz + cin_in * cout_pad * isz
                     + cout_pad * 4 + tm * cout_pad * osz)

    out = pl.pallas_call(
        _matmul_bias_relu_kernel,
        out_shape=jax.ShapeDtypeStruct((m_pad, cout_pad), out_dtype),
        grid=(m_pad // tm,),
        in_specs=[
            pl.BlockSpec((tm, cin_in), lambda i: (i, 0)),
            pl.BlockSpec((cin_in, cout_pad), lambda i: (0, 0)),   # resident weights
            pl.BlockSpec((1, cout_pad), lambda i: (0, 0)),        # resident bias
        ],
        out_specs=pl.BlockSpec((tm, cout_pad), lambda i: (i, 0)),
        compiler_params=pltpu.CompilerParams(
            dimension_semantics=("parallel",),
            vmem_limit_bytes=_vmem_limit(footprint)),
        cost_estimate=pl.CostEstimate(
            flops=2 * m_pad * cin_in * cout_pad, transcendentals=0,
            bytes_accessed=(m_pad * cin_in * isz + cin_in * cout_pad * isz
                            + m_pad * cout_pad * osz)),
    )(x2, w2, bias_p)

    out = out[:m].reshape(n, h, wd, cout_pad)
    return out if keep_cout_pad else out[..., :cout]


def conv3x3_bn_relu(x_nhwc, params, stride, pad, out_dtype,
                    compute_dtype=jnp.bfloat16, keep_cout_pad=False):
    w, bias = _fold_bn(params)
    cin, cout = w.shape[2], w.shape[3]
    n, _, _, cin_in = x_nhwc.shape
    cout_pad = _round_up(cout, 128)

    wt = w
    if cin_in > cin:                              # zero rows for padded input channels
        wt = jnp.pad(wt, ((0, 0), (0, 0), (0, cin_in - cin), (0, 0)))
    wt = jnp.pad(wt, ((0, 0), (0, 0), (0, 0), (0, cout_pad - cout)))
    wt = wt.reshape(9, cin_in, cout_pad).astype(compute_dtype)   # tap-major
    bias_p = jnp.pad(bias, (0, cout_pad - cout)).reshape(1, cout_pad)

    xb = x_nhwc.astype(compute_dtype)
    if pad:
        xb = jnp.pad(xb, ((0, 0), (pad, pad), (pad, pad), (0, 0)))
    hp, wp = xb.shape[1], xb.shape[2]
    ho = (hp - 3) // stride + 1
    wo = (wp - 3) // stride + 1

    # Split the width dim by parity so every in-kernel tap slice is contiguous
    # (no strided reads).  Total bytes == original input: zero read expansion.
    x_par = [xb[:, :, q::stride, :] for q in range(stride)]

    tr, ho_pad = _row_tiling(ho)
    grid = (n, ho_pad // tr)

    isz = jnp.dtype(compute_dtype).itemsize
    osz = jnp.dtype(out_dtype).itemsize
    footprint = 2 * (sum(hp * xq.shape[2] * cin_in * isz for xq in x_par)
                     + 9 * cin_in * cout_pad * isz + cout_pad * 4
                     + tr * wo * cout_pad * osz)

    in_specs = [pl.BlockSpec((None, hp, xq.shape[2], cin_in),
                             lambda i, t: (i, 0, 0, 0)) for xq in x_par]
    in_specs += [
        pl.BlockSpec((9, cin_in, cout_pad), lambda i, t: (0, 0, 0)),   # resident weights
        pl.BlockSpec((1, cout_pad), lambda i, t: (0, 0)),              # resident bias
    ]

    out = pl.pallas_call(
        _make_fused3x3_kernel(stride, tr, hp),
        out_shape=jax.ShapeDtypeStruct((n, ho_pad, wo, cout_pad), out_dtype),
        grid=grid,
        in_specs=in_specs,
        out_specs=pl.BlockSpec((None, tr, wo, cout_pad),
                               lambda i, t: (i, t, 0, 0)),
        compiler_params=pltpu.CompilerParams(
            dimension_semantics=("parallel", "parallel"),
            vmem_limit_bytes=_vmem_limit(footprint)),
        cost_estimate=pl.CostEstimate(
            flops=2 * n * ho_pad * wo * 9 * cin_in * cout_pad,
            transcendentals=0,
            bytes_accessed=(n * hp * wp * cin_in * isz
                            + 9 * cin_in * cout_pad * isz
                            + n * ho_pad * wo * cout_pad * osz)),
    )(*x_par, wt, bias_p)

    out = out[:, :ho]
    return out if keep_cout_pad else out[..., :cout]


def maxpool3x3_s2(x_nhwc):
    n, h, wd, c = x_nhwc.shape
    ho = (h - 3) // 2 + 1
    wo = (wd - 3) // 2 + 1
    taps = []
    for kh in range(3):
        for kw in range(3):
            tap = lax.slice(
                x_nhwc, (0, kh, kw, 0),
                (n, kh + 2 * (ho - 1) + 1, kw + 2 * (wo - 1) + 1, c),
                (1, 2, 2, 1))
            taps.append(tap.reshape(-1))
    p = jnp.stack(taps, axis=0)                               # (9, L), lane-dense below
    L = p.shape[1]
    rows = (L + 127) // 128
    tr, rows_pad = _m_tiling(rows)
    p = jnp.pad(p, ((0, 0), (0, rows_pad * 128 - L))).reshape(9, rows_pad, 128)

    out = pl.pallas_call(
        _maxpool_kernel,
        out_shape=jax.ShapeDtypeStruct((rows_pad, 128), x_nhwc.dtype),
        grid=(rows_pad // tr,),
        in_specs=[pl.BlockSpec((9, tr, 128), lambda i: (0, i, 0))],
        out_specs=pl.BlockSpec((tr, 128), lambda i: (i, 0)),
        compiler_params=pltpu.CompilerParams(
            dimension_semantics=("parallel",)),
    )(p)
    return out.reshape(-1)[:L].reshape(n, ho, wo, c)


def reduction_a(x_nchw, params, compute_dtype=jnp.bfloat16):
    x = jnp.transpose(x_nchw, (0, 2, 3, 1))                          # NCHW -> NHWC
    out1 = maxpool3x3_s2(x)                                          # branch1
    out2 = conv3x3_bn_relu(x, params["branch2"], 2, 0, jnp.float32,
                           compute_dtype)                            # branch2
    # branch3 chain: intermediates stay in compute_dtype with lane-padded channels.
    h1 = conv1x1_bn_relu(x, params["branch3_1"], compute_dtype,
                         compute_dtype, keep_cout_pad=True)
    h2 = conv3x3_bn_relu(h1, params["branch3_2"], 1, 1, compute_dtype,
                         compute_dtype, keep_cout_pad=True)
    out3 = conv3x3_bn_relu(h2, params["branch3_3"], 2, 0, jnp.float32,
                           compute_dtype)
    # TODO(synk): write branches directly into channel slices of a preallocated
    # concat buffer (input_output_aliases) to remove these two layout passes.
    out = jnp.concatenate([out1, out2, out3], axis=-1)
    return jnp.transpose(out, (0, 3, 1, 2))                          # NHWC -> NCHW


# ------------------------ deterministic parameter init ---------------------- #

def init_conv1_params(key, cin, cout, ksize):
    k1, k2, k3, k4, k5, k6 = jax.random.split(key, 6)
    return dict(
        w=0.1 * jax.random.normal(k1, (ksize, ksize, cin, cout), jnp.float32),
        b=0.1 * jax.random.normal(k2, (cout,), jnp.float32),
        gamma=1.0 + 0.1 * jax.random.normal(k3, (cout,), jnp.float32),
        beta=0.1 * jax.random.normal(k4, (cout,), jnp.float32),
        mean=0.1 * jax.random.normal(k5, (cout,), jnp.float32),
        var=jax.random.uniform(k6, (cout,), jnp.float32, 0.5, 1.5),
    )


# ------------------------- quantization-matched reference ------------------- #

def _ref_conv_bn_relu(x, p, stride, pad, out_dtype, compute_dtype, eps=1e-5):
    scale = p["gamma"] * lax.rsqrt(p["var"] + eps)
    bias = p["beta"] + (p["b"] - p["mean"]) * scale
    wf = (p["w"] * scale).astype(compute_dtype)
    y = lax.conv_general_dilated(
        x.astype(compute_dtype), wf, (stride, stride),
        [(pad, pad), (pad, pad)],
        dimension_numbers=("NHWC", "HWIO", "NHWC"),
        preferred_element_type=jnp.float32)
    return jnp.maximum(y + bias, 0.0).astype(out_dtype)


def _ref_reduction_a(x_nchw, params, compute_dtype):
    x = jnp.transpose(x_nchw, (0, 2, 3, 1))
    out1 = lax.reduce_window(x, -jnp.inf, lax.max,
                             (1, 3, 3, 1), (1, 2, 2, 1), "VALID")
    out2 = _ref_conv_bn_relu(x, params["branch2"], 2, 0, jnp.float32, compute_dtype)
    h1 = _ref_conv_bn_relu(x, params["branch3_1"], 1, 0, compute_dtype, compute_dtype)
    h2 = _ref_conv_bn_relu(h1, params["branch3_2"], 1, 1, compute_dtype, compute_dtype)
    out3 = _ref_conv_bn_relu(h2, params["branch3_3"], 2, 0, jnp.float32, compute_dtype)
    out = jnp.concatenate([out1, out2, out3], axis=-1)
    return jnp.transpose(out, (0, 3, 1, 2))


# --------------------------------- main -------------------------------------- #

if __name__ == "__main__":
    in_channel, inch = 4, 8
    N, H, W = 2, 16, 16

    key = jax.random.PRNGKey(0)
    kx, kp = jax.random.split(key)
    params = {
        "branch2":   init_conv1_params(jax.random.fold_in(kp, 0), in_channel, inch * 12, 3),
        "branch3_1": init_conv1_params(jax.random.fold_in(kp, 1), in_channel, inch * 8, 1),
        "branch3_2": init_conv1_params(jax.random.fold_in(kp, 2), inch * 8, inch * 8, 3),
        "branch3_3": init_conv1_params(jax.random.fold_in(kp, 3), inch * 8, inch * 12, 3),
    }

    x = jax.random.normal(kx, (N, in_channel, H, W), jnp.float32)

    ho = (H - 3) // 2 + 1
    expected_shape = (N, in_channel + 2 * inch * 12, ho, ho)

    # 1) Layout / indexing validation with f32 operands (tighter tolerance).
    out_f32 = jax.block_until_ready(
        jax.jit(lambda xx: reduction_a(xx, params, jnp.float32))(x))
    assert out_f32.shape == expected_shape, out_f32.shape
    ref_f32 = jax.block_until_ready(_ref_reduction_a(x, params, jnp.float32))
    np.testing.assert_allclose(np.asarray(out_f32), np.asarray(ref_f32),
                               rtol=1e-2, atol=1e-2)

    # 2) Production path: bf16 operands / intermediates, bf16-matched reference.
    out = jax.block_until_ready(
        jax.jit(lambda xx: reduction_a(xx, params, jnp.bfloat16))(x))
    assert out.shape == expected_shape, out.shape
    ref = jax.block_until_ready(_ref_reduction_a(x, params, jnp.bfloat16))
    np.testing.assert_allclose(np.asarray(out), np.asarray(ref),
                               rtol=2e-2, atol=2e-2)

    print("KERNEL_OK")
</pallas_src>

<mosaic_0001>
module attributes {stable_mosaic.version = 11 : i64} {
  func.func @_maxpool_kernel(%arg0: i32, %arg1: memref<9x16x128xf32, #tpu.memory_space<vmem>>, %arg2: memref<16x128xf32, #tpu.memory_space<vmem>>) attributes {dimension_semantics = [#tpu.dimension_semantics<parallel>], iteration_bounds = array<i64: 1>, scalar_prefetch = 0 : i64, scratch_operands = 0 : i64, tpu.core_type = #tpu.core_type<tc>, window_params = [{transform_indices = @transform_0, window_bounds = array<i64: 9, 16, 128>}, {transform_indices = @transform_1, window_bounds = array<i64: 16, 128>}]} {
    %c0 = arith.constant 0 : index
    %c0_0 = arith.constant 0 : index
    %c0_1 = arith.constant 0 : index
    %0 = vector.load %arg1[%c0, %c0_0, %c0_1] : memref<9x16x128xf32, #tpu.memory_space<vmem>>, vector<1x16x128xf32>
    %1 = vector.shape_cast %0 : vector<1x16x128xf32> to vector<16x128xf32>
    %c1 = arith.constant 1 : index
    %c0_2 = arith.constant 0 : index
    %c0_3 = arith.constant 0 : index
    %2 = vector.load %arg1[%c1, %c0_2, %c0_3] : memref<9x16x128xf32, #tpu.memory_space<vmem>>, vector<1x16x128xf32>
    %3 = vector.shape_cast %2 : vector<1x16x128xf32> to vector<16x128xf32>
    %4 = arith.maximumf %1, %3 : vector<16x128xf32>
    %c2 = arith.constant 2 : index
    %c0_4 = arith.constant 0 : index
    %c0_5 = arith.constant 0 : index
    %5 = vector.load %arg1[%c2, %c0_4, %c0_5] : memref<9x16x128xf32, #tpu.memory_space<vmem>>, vector<1x16x128xf32>
    %6 = vector.shape_cast %5 : vector<1x16x128xf32> to vector<16x128xf32>
    %7 = arith.maximumf %4, %6 : vector<16x128xf32>
    %c3 = arith.constant 3 : index
    %c0_6 = arith.constant 0 : index
    %c0_7 = arith.constant 0 : index
    %8 = vector.load %arg1[%c3, %c0_6, %c0_7] : memref<9x16x128xf32, #tpu.memory_space<vmem>>, vector<1x16x128xf32>
    %9 = vector.shape_cast %8 : vector<1x16x128xf32> to vector<16x128xf32>
    %10 = arith.maximumf %7, %9 : vector<16x128xf32>
    %c4 = arith.constant 4 : index
    %c0_8 = arith.constant 0 : index
    %c0_9 = arith.constant 0 : index
    %11 = vector.load %arg1[%c4, %c0_8, %c0_9] : memref<9x16x128xf32, #tpu.memory_space<vmem>>, vector<1x16x128xf32>
    %12 = vector.shape_cast %11 : vector<1x16x128xf32> to vector<16x128xf32>
    %13 = arith.maximumf %10, %12 : vector<16x128xf32>
    %c5 = arith.constant 5 : index
    %c0_10 = arith.constant 0 : index
    %c0_11 = arith.constant 0 : index
    %14 = vector.load %arg1[%c5, %c0_10, %c0_11] : memref<9x16x128xf32, #tpu.memory_space<vmem>>, vector<1x16x128xf32>
    %15 = vector.shape_cast %14 : vector<1x16x128xf32> to vector<16x128xf32>
    %16 = arith.maximumf %13, %15 : vector<16x128xf32>
    %c6 = arith.constant 6 : index
    %c0_12 = arith.constant 0 : index
    %c0_13 = arith.constant 0 : index
    %17 = vector.load %arg1[%c6, %c0_12, %c0_13] : memref<9x16x128xf32, #tpu.memory_space<vmem>>, vector<1x16x128xf32>
    %18 = vector.shape_cast %17 : vector<1x16x128xf32> to vector<16x128xf32>
    %19 = arith.maximumf %16, %18 : vector<16x128xf32>
    %c7 = arith.constant 7 : index
    %c0_14 = arith.constant 0 : index
    %c0_15 = arith.constant 0 : index
    %20 = vector.load %arg1[%c7, %c0_14, %c0_15] : memref<9x16x128xf32, #tpu.memory_space<vmem>>, vector<1x16x128xf32>
    %21 = vector.shape_cast %20 : vector<1x16x128xf32> to vector<16x128xf32>
    %22 = arith.maximumf %19, %21 : vector<16x128xf32>
    %c8 = arith.constant 8 : index
    %c0_16 = arith.constant 0 : index
    %c0_17 = arith.constant 0 : index
    %23 = vector.load %arg1[%c8, %c0_16, %c0_17] : memref<9x16x128xf32, #tpu.memory_space<vmem>>, vector<1x16x128xf32>
    %24 = vector.shape_cast %23 : vector<1x16x128xf32> to vector<16x128xf32>
    %25 = arith.maximumf %22, %24 : vector<16x128xf32>
    %c0_18 = arith.constant 0 : index
    %c0_19 = arith.constant 0 : index
    %26 = vector.load %arg2[%c0_18, %c0_19] : memref<16x128xf32, #tpu.memory_space<vmem>>, vector<16x128xf32>
    tpu.vector_store %arg2[%c0_18, %c0_19], %25 {strides = array<i32>} : memref<16x128xf32, #tpu.memory_space<vmem>>, vector<16x128xf32>,
    return
  }
  func.func @transform_0(%arg0: i32) -> (i32, i32, i32) {
    %c0_i32 = arith.constant 0 : i32
    %c0_i32_0 = arith.constant 0 : i32
    %c0_i32_1 = arith.constant 0 : i32
    return %c0_i32, %arg0, %c0_i32_0 : i32, i32, i32
  }
  func.func @transform_1(%arg0: i32) -> (i32, i32) {
    %c0_i32 = arith.constant 0 : i32
    %c0_i32_0 = arith.constant 0 : i32
    return %arg0, %c0_i32 : i32, i32
  }
}

module attributes {stable_mosaic.version = 11 : i64} {
  func.func @kernel(%arg0: i32, %arg1: i32, %arg2: memref<1x16x8x4xf32, #tpu.memory_space<vmem>>, %arg3: memref<1x16x8x4xf32, #tpu.memory_space<vmem>>, %arg4: memref<9x4x128xf32, #tpu.memory_space<vmem>>, %arg5: memref<1x128xf32, #tpu.memory_space<vmem>>, %arg6: memref<1x1x7x128xf32, #tpu.memory_space<vmem>>) attributes {dimension_semantics = [#tpu.dimension_semantics<parallel>, #tpu.dimension_semantics<parallel>], iteration_bounds = array<i64: 2, 7>, scalar_prefetch = 0 : i64, scratch_operands = 0 : i64, tpu.core_type = #tpu.core_type<tc>, window_params = [{transform_indices = @transform_0, window_bounds = array<i64: 1, 16, 8, 4>}, {transform_indices = @transform_1, window_bounds = array<i64: 1, 16, 8, 4>}, {pipeline_mode = #tpu.pipeline_mode<synchronous>, transform_indices = @transform_2, window_bounds = array<i64: 9, 4, 128>}, {pipeline_mode = #tpu.pipeline_mode<synchronous>, transform_indices = @transform_3, window_bounds = array<i64: 1, 128>}, {transform_indices = @transform_4, window_bounds = array<i64: 1, 1, 7, 128>}]} {
    %c0 = arith.constant 0 : index
    %c0_0 = arith.constant 0 : index
    %0 = vector.load %arg5[%c0, %c0_0] : memref<1x128xf32, #tpu.memory_space<vmem>>, vector<1x128xf32>
    %c1_i32 = arith.constant 1 : i32
    %1 = arith.muli %arg1, %c1_i32 : i32
    %c0_i32 = arith.constant 0 : i32
    %2 = arith.addi %1, %c0_i32 : i32
    %cst = arith.constant 0.000000e+00 : f32
    %3 = vector.broadcast %cst : f32 to vector<7x128xf32>
    %c2_i32 = arith.constant 2 : i32
    %4 = arith.muli %c2_i32, %2 : i32
    %c0_i32_1 = arith.constant 0 : i32
    %5 = arith.addi %4, %c0_i32_1 : i32
    %c15_i32 = arith.constant 15 : i32
    %6 = arith.minsi %5, %c15_i32 : i32
    %c0_2 = arith.constant 0 : index
    %7 = arith.index_cast %6 : i32 to index
    %c0_3 = arith.constant 0 : index
    %c0_4 = arith.constant 0 : index
    %8 = vector.load %arg2[%c0_2, %7, %c0_3, %c0_4] : memref<1x16x8x4xf32, #tpu.memory_space<vmem>>, vector<1x1x8x4xf32>
    %9 = vector.shape_cast %8 : vector<1x1x8x4xf32> to vector<8x4xf32>
    %c0_5 = arith.constant 0 : index
    %10 = arith.index_cast %6 : i32 to index
    %c0_6 = arith.constant 0 : index
    %c0_7 = arith.constant 0 : index
    %11 = vector.load %arg3[%c0_5, %10, %c0_6, %c0_7] : memref<1x16x8x4xf32, #tpu.memory_space<vmem>>, vector<1x1x8x4xf32>
    %12 = vector.shape_cast %11 : vector<1x1x8x4xf32> to vector<8x4xf32>
    %13 = vector.extract_strided_slice %9 {offsets = [0, 0], sizes = [7, 4], strides = [1, 1]} : vector<8x4xf32> to vector<7x4xf32>
    %c0_8 = arith.constant 0 : index
    %c0_9 = arith.constant 0 : index
    %c0_10 = arith.constant 0 : index
    %14 = vector.load %arg4[%c0_8, %c0_9, %c0_10] : memref<9x4x128xf32, #tpu.memory_space<vmem>>, vector<1x4x128xf32>
    %15 = vector.shape_cast %14 : vector<1x4x128xf32> to vector<4x128xf32>
    %cst_11 = arith.constant dense<0.000000e+00> : vector<7x128xf32>
    %16 = tpu.matmul %13, %15, %cst_11 {dimension_numbers = #tpu.dot_dimension_numbers<[1], [0], [0], [1], [0, 0, 1, 1], [], []>} : vector<7x4xf32>, vector<4x128xf32>, vector<7x128xf32> -> vector<7x128xf32>
    %17 = arith.addf %3, %16 : vector<7x128xf32>
    %18 = vector.extract_strided_slice %12 {offsets = [0, 0], sizes = [7, 4], strides = [1, 1]} : vector<8x4xf32> to vector<7x4xf32>
    %c1 = arith.constant 1 : index
    %c0_12 = arith.constant 0 : index
    %c0_13 = arith.constant 0 : index
    %19 = vector.load %arg4[%c1, %c0_12, %c0_13] : memref<9x4x128xf32, #tpu.memory_space<vmem>>, vector<1x4x128xf32>
    %20 = vector.shape_cast %19 : vector<1x4x128xf32> to vector<4x128xf32>
    %cst_14 = arith.constant dense<0.000000e+00> : vector<7x128xf32>
    %21 = tpu.matmul %18, %20, %cst_14 {dimension_numbers = #tpu.dot_dimension_numbers<[1], [0], [0], [1], [0, 0, 1, 1], [], []>} : vector<7x4xf32>, vector<4x128xf32>, vector<7x128xf32> -> vector<7x128xf32>
    %22 = arith.addf %17, %21 : vector<7x128xf32>
    %23 = vector.extract_strided_slice %9 {offsets = [1, 0], sizes = [7, 4], strides = [1, 1]} : vector<8x4xf32> to vector<7x4xf32>
    %c2 = arith.constant 2 : index
    %c0_15 = arith.constant 0 : index
    %c0_16 = arith.constant 0 : index
    %24 = vector.load %arg4[%c2, %c0_15, %c0_16] : memref<9x4x128xf32, #tpu.memory_space<vmem>>, vector<1x4x128xf32>
    %25 = vector.shape_cast %24 : vector<1x4x128xf32> to vector<4x128xf32>
    %cst_17 = arith.constant dense<0.000000e+00> : vector<7x128xf32>
    %26 = tpu.matmul %23, %25, %cst_17 {dimension_numbers = #tpu.dot_dimension_numbers<[1], [0], [0], [1], [0, 0, 1, 1], [], []>} : vector<7x4xf32>, vector<4x128xf32>, vector<7x128xf32> -> vector<7x128xf32>
    %27 = arith.addf %22, %26 : vector<7x128xf32>
    %c2_i32_18 = arith.constant 2 : i32
    %28 = arith.muli %c2_i32_18, %2 : i32
    %c1_i32_19 = arith.constant 1 : i32
    %29 = arith.addi %28, %c1_i32_19 : i32
    %c15_i32_20 = arith.constant 15 : i32
    %30 = arith.minsi %29, %c15_i32_20 : i32
    %c0_21 = arith.constant 0 : index
    %31 = arith.index_cast %30 : i32 to index
    %c0_22 = arith.constant 0 : index
    %c0_23 = arith.constant 0 : index
    %32 = vector.load %arg2[%c0_21, %31, %c0_22, %c0_23] : memref<1x16x8x4xf32, #tpu.memory_space<vmem>>, vector<1x1x8x4xf32>
    %33 = vector.shape_cast %32 : vector<1x1x8x4xf32> to vector<8x4xf32>
    %c0_24 = arith.constant 0 : index
    %34 = arith.index_cast %30 : i32 to index
    %c0_25 = arith.constant 0 : index
    %c0_26 = arith.constant 0 : index
    %35 = vector.load %arg3[%c0_24, %34, %c0_25, %c0_26] : memref<1x16x8x4xf32, #tpu.memory_space<vmem>>, vector<1x1x8x4xf32>
    %36 = vector.shape_cast %35 : vector<1x1x8x4xf32> to vector<8x4xf32>
    %37 = vector.extract_strided_slice %33 {offsets = [0, 0], sizes = [7, 4], strides = [1, 1]} : vector<8x4xf32> to vector<7x4xf32>
    %c3 = arith.constant 3 : index
    %c0_27 = arith.constant 0 : index
    %c0_28 = arith.constant 0 : index
    %38 = vector.load %arg4[%c3, %c0_27, %c0_28] : memref<9x4x128xf32, #tpu.memory_space<vmem>>, vector<1x4x128xf32>
    %39 = vector.shape_cast %38 : vector<1x4x128xf32> to vector<4x128xf32>
    %cst_29 = arith.constant dense<0.000000e+00> : vector<7x128xf32>
    %40 = tpu.matmul %37, %39, %cst_29 {dimension_numbers = #tpu.dot_dimension_numbers<[1], [0], [0], [1], [0, 0, 1, 1], [], []>} : vector<7x4xf32>, vector<4x128xf32>, vector<7x128xf32> -> vector<7x128xf32>
    %41 = arith.addf %27, %40 : vector<7x128xf32>
    %42 = vector.extract_strided_slice %36 {offsets = [0, 0], sizes = [7, 4], strides = [1, 1]} : vector<8x4xf32> to vector<7x4xf32>
    %c4 = arith.constant 4 : index
    %c0_30 = arith.constant 0 : index
    %c0_31 = arith.constant 0 : index
    %43 = vector.load %arg4[%c4, %c0_30, %c0_31] : memref<9x4x128xf32, #tpu.memory_space<vmem>>, vector<1x4x128xf32>
    %44 = vector.shape_cast %43 : vector<1x4x128xf32> to vector<4x128xf32>
    %cst_32 = arith.constant dense<0.000000e+00> : vector<7x128xf32>
    %45 = tpu.matmul %42, %44, %cst_32 {dimension_numbers = #tpu.dot_dimension_numbers<[1], [0], [0], [1], [0, 0, 1, 1], [], []>} : vector<7x4xf32>, vector<4x128xf32>, vector<7x128xf32> -> vector<7x128xf32>
    %46 = arith.addf %41, %45 : vector<7x128xf32>
    %47 = vector.extract_strided_slice %33 {offsets = [1, 0], sizes = [7, 4], strides = [1, 1]} : vector<8x4xf32> to vector<7x4xf32>
    %c5 = arith.constant 5 : index
    %c0_33 = arith.constant 0 : index
    %c0_34 = arith.constant 0 : index
    %48 = vector.load %arg4[%c5, %c0_33, %c0_34] : memref<9x4x128xf32, #tpu.memory_space<vmem>>, vector<1x4x128xf32>
    %49 = vector.shape_cast %48 : vector<1x4x128xf32> to vector<4x128xf32>
    %cst_35 = arith.constant dense<0.000000e+00> : vector<7x128xf32>
    %50 = tpu.matmul %47, %49, %cst_35 {dimension_numbers = #tpu.dot_dimension_numbers<[1], [0], [0], [1], [0, 0, 1, 1], [], []>} : vector<7x4xf32>, vector<4x128xf32>, vector<7x128xf32> -> vector<7x128xf32>
    %51 = arith.addf %46, %50 : vector<7x128xf32>
    %c2_i32_36 = arith.constant 2 : i32
    %52 = arith.muli %c2_i32_36, %2 : i32
    %c2_i32_37 = arith.constant 2 : i32
    %53 = arith.addi %52, %c2_i32_37 : i32
    %c15_i32_38 = arith.constant 15 : i32
    %54 = arith.minsi %53, %c15_i32_38 : i32
    %c0_39 = arith.constant 0 : index
    %55 = arith.index_cast %54 : i32 to index
    %c0_40 = arith.constant 0 : index
    %c0_41 = arith.constant 0 : index
    %56 = vector.load %arg2[%c0_39, %55, %c0_40, %c0_41] : memref<1x16x8x4xf32, #tpu.memory_space<vmem>>, vector<1x1x8x4xf32>
    %57 = vector.shape_cast %56 : vector<1x1x8x4xf32> to vector<8x4xf32>
    %c0_42 = arith.constant 0 : index
    %58 = arith.index_cast %54 : i32 to index
    %c0_43 = arith.constant 0 : index
    %c0_44 = arith.constant 0 : index
    %59 = vector.load %arg3[%c0_42, %58, %c0_43, %c0_44] : memref<1x16x8x4xf32, #tpu.memory_space<vmem>>, vector<1x1x8x4xf32>
    %60 = vector.shape_cast %59 : vector<1x1x8x4xf32> to vector<8x4xf32>
    %61 = vector.extract_strided_slice %57 {offsets = [0, 0], sizes = [7, 4], strides = [1, 1]} : vector<8x4xf32> to vector<7x4xf32>
    %c6 = arith.constant 6 : index
    %c0_45 = arith.constant 0 : index
    %c0_46 = arith.constant 0 : index
    %62 = vector.load %arg4[%c6, %c0_45, %c0_46] : memref<9x4x128xf32, #tpu.memory_space<vmem>>, vector<1x4x128xf32>
    %63 = vector.shape_cast %62 : vector<1x4x128xf32> to vector<4x128xf32>
    %cst_47 = arith.constant dense<0.000000e+00> : vector<7x128xf32>
    %64 = tpu.matmul %61, %63, %cst_47 {dimension_numbers = #tpu.dot_dimension_numbers<[1], [0], [0], [1], [0, 0, 1, 1], [], []>} : vector<7x4xf32>, vector<4x128xf32>, vector<7x128xf32> -> vector<7x128xf32>
    %65 = arith.addf %51, %64 : vector<7x128xf32>
    %66 = vector.extract_strided_slice %60 {offsets = [0, 0], sizes = [7, 4], strides = [1, 1]} : vector<8x4xf32> to vector<7x4xf32>
    %c7 = arith.constant 7 : index
    %c0_48 = arith.constant 0 : index
    %c0_49 = arith.constant 0 : index
    %67 = vector.load %arg4[%c7, %c0_48, %c0_49] : memref<9x4x128xf32, #tpu.memory_space<vmem>>, vector<1x4x128xf32>
    %68 = vector.shape_cast %67 : vector<1x4x128xf32> to vector<4x128xf32>
    %cst_50 = arith.constant dense<0.000000e+00> : vector<7x128xf32>
    %69 = tpu.matmul %66, %68, %cst_50 {dimension_numbers = #tpu.dot_dimension_numbers<[1], [0], [0], [1], [0, 0, 1, 1], [], []>} : vector<7x4xf32>, vector<4x128xf32>, vector<7x128xf32> -> vector<7x128xf32>
    %70 = arith.addf %65, %69 : vector<7x128xf32>
    %71 = vector.extract_strided_slice %57 {offsets = [1, 0], sizes = [7, 4], strides = [1, 1]} : vector<8x4xf32> to vector<7x4xf32>
    %c8 = arith.constant 8 : index
    %c0_51 = arith.constant 0 : index
    %c0_52 = arith.constant 0 : index
    %72 = vector.load %arg4[%c8, %c0_51, %c0_52] : memref<9x4x128xf32, #tpu.memory_space<vmem>>, vector<1x4x128xf32>
    %73 = vector.shape_cast %72 : vector<1x4x128xf32> to vector<4x128xf32>
    %cst_53 = arith.constant dense<0.000000e+00> : vector<7x128xf32>
    %74 = tpu.matmul %71, %73, %cst_53 {dimension_numbers = #tpu.dot_dimension_numbers<[1], [0], [0], [1], [0, 0, 1, 1], [], []>} : vector<7x4xf32>, vector<4x128xf32>, vector<7x128xf32> -> vector<7x128xf32>
    %75 = arith.addf %70, %74 : vector<7x128xf32>
    %76 = vector.broadcast %0 : vector<1x128xf32> to vector<7x128xf32>
    %77 = arith.addf %75, %76 : vector<7x128xf32>
    %cst_54 = arith.constant 0.000000e+00 : f32
    %78 = vector.broadcast %cst_54 : f32 to vector<7x128xf32>
    %79 = arith.maximumf %77, %78 : vector<7x128xf32>
    %c0_55 = arith.constant 0 : index
    %c0_56 = arith.constant 0 : index
    %c0_57 = arith.constant 0 : index
    %c0_58 = arith.constant 0 : index
    %80 = vector.load %arg6[%c0_55, %c0_56, %c0_57, %c0_58] : memref<1x1x7x128xf32, #tpu.memory_space<vmem>>, vector<1x1x7x128xf32>
    %81 = vector.shape_cast %80 : vector<1x1x7x128xf32> to vector<7x128xf32>
    %82 = vector.shape_cast %79 : vector<7x128xf32> to vector<1x1x7x128xf32>
    tpu.vector_store %arg6[%c0_55, %c0_56, %c0_57, %c0_58], %82 {strides = array<i32>} : memref<1x1x7x128xf32, #tpu.memory_space<vmem>>, vector<1x1x7x128xf32>,
    return
  }
  func.func @transform_0(%arg0: i32, %arg1: i32) -> (i32, i32, i32, i32) {
    %c0_i32 = arith.constant 0 : i32
    %c0_i32_0 = arith.constant 0 : i32
    %c0_i32_1 = arith.constant 0 : i32
    %c0_i32_2 = arith.constant 0 : i32
    return %arg0, %c0_i32, %c0_i32_0, %c0_i32_1 : i32, i32, i32, i32
  }
  func.func @transform_1(%arg0: i32, %arg1: i32) -> (i32, i32, i32, i32) {
    %c0_i32 = arith.constant 0 : i32
    %c0_i32_0 = arith.constant 0 : i32
    %c0_i32_1 = arith.constant 0 : i32
    %c0_i32_2 = arith.constant 0 : i32
    return %arg0, %c0_i32, %c0_i32_0, %c0_i32_1 : i32, i32, i32, i32
  }
  func.func @transform_2(%arg0: i32, %arg1: i32) -> (i32, i32, i32) {
    %c0_i32 = arith.constant 0 : i32
    %c0_i32_0 = arith.constant 0 : i32
    %c0_i32_1 = arith.constant 0 : i32
    %c0_i32_2 = arith.constant 0 : i32
    return %c0_i32, %c0_i32_0, %c0_i32_1 : i32, i32, i32
  }
  func.func @transform_3(%arg0: i32, %arg1: i32) -> (i32, i32) {
    %c0_i32 = arith.constant 0 : i32
    %c0_i32_0 = arith.constant 0 : i32
    %c0_i32_1 = arith.constant 0 : i32
    return %c0_i32, %c0_i32_0 : i32, i32
  }
  func.func @transform_4(%arg0: i32, %arg1: i32) -> (i32, i32, i32, i32) {
    %c0_i32 = arith.constant 0 : i32
    %c0_i32_0 = arith.constant 0 : i32
    %c0_i32_1 = arith.constant 0 : i32
    return %arg0, %arg1, %c0_i32, %c0_i32_0 : i32, i32, i32, i32
  }
}

module attributes {stable_mosaic.version = 11 : i64} {
  func.func @_matmul_bias_relu_kernel(%arg0: i32, %arg1: memref<256x4xf32, #tpu.memory_space<vmem>>, %arg2: memref<4x128xf32, #tpu.memory_space<vmem>>, %arg3: memref<1x128xf32, #tpu.memory_space<vmem>>, %arg4: memref<256x128xf32, #tpu.memory_space<vmem>>) attributes {dimension_semantics = [#tpu.dimension_semantics<parallel>], iteration_bounds = array<i64: 2>, scalar_prefetch = 0 : i64, scratch_operands = 0 : i64, tpu.core_type = #tpu.core_type<tc>, window_params = [{transform_indices = @transform_0, window_bounds = array<i64: 256, 4>}, {pipeline_mode = #tpu.pipeline_mode<synchronous>, transform_indices = @transform_1, window_bounds = array<i64: 4, 128>}, {pipeline_mode = #tpu.pipeline_mode<synchronous>, transform_indices = @transform_2, window_bounds = array<i64: 1, 128>}, {transform_indices = @transform_3, window_bounds = array<i64: 256, 128>}]} {
    %c0 = arith.constant 0 : index
    %c0_0 = arith.constant 0 : index
    %0 = vector.load %arg1[%c0, %c0_0] : memref<256x4xf32, #tpu.memory_space<vmem>>, vector<256x4xf32>
    %c0_1 = arith.constant 0 : index
    %c0_2 = arith.constant 0 : index
    %1 = vector.load %arg2[%c0_1, %c0_2] : memref<4x128xf32, #tpu.memory_space<vmem>>, vector<4x128xf32>
    %cst = arith.constant dense<0.000000e+00> : vector<256x128xf32>
    %2 = tpu.matmul %0, %1, %cst {dimension_numbers = #tpu.dot_dimension_numbers<[1], [0], [0], [1], [0, 0, 1, 1], [], []>} : vector<256x4xf32>, vector<4x128xf32>, vector<256x128xf32> -> vector<256x128xf32>
    %c0_3 = arith.constant 0 : index
    %c0_4 = arith.constant 0 : index
    %3 = vector.load %arg3[%c0_3, %c0_4] : memref<1x128xf32, #tpu.memory_space<vmem>>, vector<1x128xf32>
    %4 = vector.broadcast %3 : vector<1x128xf32> to vector<256x128xf32>
    %5 = arith.addf %2, %4 : vector<256x128xf32>
    %cst_5 = arith.constant 0.000000e+00 : f32
    %6 = vector.broadcast %cst_5 : f32 to vector<256x128xf32>
    %7 = arith.maximumf %5, %6 : vector<256x128xf32>
    %c0_6 = arith.constant 0 : index
    %c0_7 = arith.constant 0 : index
    %8 = vector.load %arg4[%c0_6, %c0_7] : memref<256x128xf32, #tpu.memory_space<vmem>>, vector<256x128xf32>
    tpu.vector_store %arg4[%c0_6, %c0_7], %7 {strides = array<i32>} : memref<256x128xf32, #tpu.memory_space<vmem>>, vector<256x128xf32>,
    return
  }
  func.func @transform_0(%arg0: i32) -> (i32, i32) {
    %c0_i32 = arith.constant 0 : i32
    %c0_i32_0 = arith.constant 0 : i32
    return %arg0, %c0_i32 : i32, i32
  }
  func.func @transform_1(%arg0: i32) -> (i32, i32) {
    %c0_i32 = arith.constant 0 : i32
    %c0_i32_0 = arith.constant 0 : i32
    %c0_i32_1 = arith.constant 0 : i32
    return %c0_i32, %c0_i32_0 : i32, i32
  }
  func.func @transform_2(%arg0: i32) -> (i32, i32) {
    %c0_i32 = arith.constant 0 : i32
    %c0_i32_0 = arith.constant 0 : i32
    %c0_i32_1 = arith.constant 0 : i32
    return %c0_i32, %c0_i32_0 : i32, i32
  }
  func.func @transform_3(%arg0: i32) -> (i32, i32) {
    %c0_i32 = arith.constant 0 : i32
    %c0_i32_0 = arith.constant 0 : i32
    return %arg0, %c0_i32 : i32, i32
  }
}

module attributes {stable_mosaic.version = 11 : i64} {
  func.func @kernel(%arg0: i32, %arg1: i32, %arg2: memref<1x18x18x128xf32, #tpu.memory_space<vmem>>, %arg3: memref<9x128x128xf32, #tpu.memory_space<vmem>>, %arg4: memref<1x128xf32, #tpu.memory_space<vmem>>, %arg5: memref<1x4x16x128xf32, #tpu.memory_space<vmem>>) attributes {dimension_semantics = [#tpu.dimension_semantics<parallel>, #tpu.dimension_semantics<parallel>], iteration_bounds = array<i64: 2, 4>, scalar_prefetch = 0 : i64, scratch_operands = 0 : i64, tpu.core_type = #tpu.core_type<tc>, window_params = [{transform_indices = @transform_0, window_bounds = array<i64: 1, 18, 18, 128>}, {pipeline_mode = #tpu.pipeline_mode<synchronous>, transform_indices = @transform_1, window_bounds = array<i64: 9, 128, 128>}, {pipeline_mode = #tpu.pipeline_mode<synchronous>, transform_indices = @transform_2, window_bounds = array<i64: 1, 128>}, {transform_indices = @transform_3, window_bounds = array<i64: 1, 4, 16, 128>}]} {
    %c0 = arith.constant 0 : index
    %c0_0 = arith.constant 0 : index
    %0 = vector.load %arg4[%c0, %c0_0] : memref<1x128xf32, #tpu.memory_space<vmem>>, vector<1x128xf32>
    %c4_i32 = arith.constant 4 : i32
    %1 = arith.muli %arg1, %c4_i32 : i32
    %c0_i32 = arith.constant 0 : i32
    %2 = arith.addi %1, %c0_i32 : i32
    %cst = arith.constant 0.000000e+00 : f32
    %3 = vector.broadcast %cst : f32 to vector<16x128xf32>
    %c1_i32 = arith.constant 1 : i32
    %4 = arith.muli %c1_i32, %2 : i32
    %c0_i32_1 = arith.constant 0 : i32
    %5 = arith.addi %4, %c0_i32_1 : i32
    %c17_i32 = arith.constant 17 : i32
    %6 = arith.minsi %5, %c17_i32 : i32
    %c0_2 = arith.constant 0 : index
    %7 = arith.index_cast %6 : i32 to index
    %c0_3 = arith.constant 0 : index
    %c0_4 = arith.constant 0 : index
    %8 = vector.load %arg2[%c0_2, %7, %c0_3, %c0_4] : memref<1x18x18x128xf32, #tpu.memory_space<vmem>>, vector<1x1x18x128xf32>
    %9 = vector.shape_cast %8 : vector<1x1x18x128xf32> to vector<18x128xf32>
    %10 = vector.extract_strided_slice %9 {offsets = [0, 0], sizes = [16, 128], strides = [1, 1]} : vector<18x128xf32> to vector<16x128xf32>
    %c0_5 = arith.constant 0 : index
    %c0_6 = arith.constant 0 : index
    %c0_7 = arith.constant 0 : index
    %11 = vector.load %arg3[%c0_5, %c0_6, %c0_7] : memref<9x128x128xf32, #tpu.memory_space<vmem>>, vector<1x128x128xf32>
    %12 = vector.shape_cast %11 : vector<1x128x128xf32> to vector<128x128xf32>
    %cst_8 = arith.constant dense<0.000000e+00> : vector<16x128xf32>
    %13 = tpu.matmul %10, %12, %cst_8 {dimension_numbers = #tpu.dot_dimension_numbers<[1], [0], [0], [1], [0, 0, 1, 1], [], []>} : vector<16x128xf32>, vector<128x128xf32>, vector<16x128xf32> -> vector<16x128xf32>
    %14 = arith.addf %3, %13 : vector<16x128xf32>
    %15 = vector.extract_strided_slice %9 {offsets = [1, 0], sizes = [16, 128], strides = [1, 1]} : vector<18x128xf32> to vector<16x128xf32>
    %c1 = arith.constant 1 : index
    %c0_9 = arith.constant 0 : index
    %c0_10 = arith.constant 0 : index
    %16 = vector.load %arg3[%c1, %c0_9, %c0_10] : memref<9x128x128xf32, #tpu.memory_space<vmem>>, vector<1x128x128xf32>
    %17 = vector.shape_cast %16 : vector<1x128x128xf32> to vector<128x128xf32>
    %cst_11 = arith.constant dense<0.000000e+00> : vector<16x128xf32>
    %18 = tpu.matmul %15, %17, %cst_11 {dimension_numbers = #tpu.dot_dimension_numbers<[1], [0], [0], [1], [0, 0, 1, 1], [], []>} : vector<16x128xf32>, vector<128x128xf32>, vector<16x128xf32> -> vector<16x128xf32>
    %19 = arith.addf %14, %18 : vector<16x128xf32>
    %20 = vector.extract_strided_slice %9 {offsets = [2, 0], sizes = [16, 128], strides = [1, 1]} : vector<18x128xf32> to vector<16x128xf32>
    %c2 = arith.constant 2 : index
    %c0_12 = arith.constant 0 : index
    %c0_13 = arith.constant 0 : index
    %21 = vector.load %arg3[%c2, %c0_12, %c0_13] : memref<9x128x128xf32, #tpu.memory_space<vmem>>, vector<1x128x128xf32>
    %22 = vector.shape_cast %21 : vector<1x128x128xf32> to vector<128x128xf32>
    %cst_14 = arith.constant dense<0.000000e+00> : vector<16x128xf32>
    %23 = tpu.matmul %20, %22, %cst_14 {dimension_numbers = #tpu.dot_dimension_numbers<[1], [0], [0], [1], [0, 0, 1, 1], [], []>} : vector<16x128xf32>, vector<128x128xf32>, vector<16x128xf32> -> vector<16x128xf32>
    %24 = arith.addf %19, %23 : vector<16x128xf32>
    %c1_i32_15 = arith.constant 1 : i32
    %25 = arith.muli %c1_i32_15, %2 : i32
    %c1_i32_16 = arith.constant 1 : i32
    %26 = arith.addi %25, %c1_i32_16 : i32
    %c17_i32_17 = arith.constant 17 : i32
    %27 = arith.minsi %26, %c17_i32_17 : i32
    %c0_18 = arith.constant 0 : index
    %28 = arith.index_cast %27 : i32 to index
    %c0_19 = arith.constant 0 : index
    %c0_20 = arith.constant 0 : index
    %29 = vector.load %arg2[%c0_18, %28, %c0_19, %c0_20] : memref<1x18x18x128xf32, #tpu.memory_space<vmem>>, vector<1x1x18x128xf32>
    %30 = vector.shape_cast %29 : vector<1x1x18x128xf32> to vector<18x128xf32>
    %31 = vector.extract_strided_slice %30 {offsets = [0, 0], sizes = [16, 128], strides = [1, 1]} : vector<18x128xf32> to vector<16x128xf32>
    %c3 = arith.constant 3 : index
    %c0_21 = arith.constant 0 : index
    %c0_22 = arith.constant 0 : index
    %32 = vector.load %arg3[%c3, %c0_21, %c0_22] : memref<9x128x128xf32, #tpu.memory_space<vmem>>, vector<1x128x128xf32>
    %33 = vector.shape_cast %32 : vector<1x128x128xf32> to vector<128x128xf32>
    %cst_23 = arith.constant dense<0.000000e+00> : vector<16x128xf32>
    %34 = tpu.matmul %31, %33, %cst_23 {dimension_numbers = #tpu.dot_dimension_numbers<[1], [0], [0], [1], [0, 0, 1, 1], [], []>} : vector<16x128xf32>, vector<128x128xf32>, vector<16x128xf32> -> vector<16x128xf32>
    %35 = arith.addf %24, %34 : vector<16x128xf32>
    %36 = vector.extract_strided_slice %30 {offsets = [1, 0], sizes = [16, 128], strides = [1, 1]} : vector<18x128xf32> to vector<16x128xf32>
    %c4 = arith.constant 4 : index
    %c0_24 = arith.constant 0 : index
    %c0_25 = arith.constant 0 : index
    %37 = vector.load %arg3[%c4, %c0_24, %c0_25] : memref<9x128x128xf32, #tpu.memory_space<vmem>>, vector<1x128x128xf32>
    %38 = vector.shape_cast %37 : vector<1x128x128xf32> to vector<128x128xf32>
    %cst_26 = arith.constant dense<0.000000e+00> : vector<16x128xf32>
    %39 = tpu.matmul %36, %38, %cst_26 {dimension_numbers = #tpu.dot_dimension_numbers<[1], [0], [0], [1], [0, 0, 1, 1], [], []>} : vector<16x128xf32>, vector<128x128xf32>, vector<16x128xf32> -> vector<16x128xf32>
    %40 = arith.addf %35, %39 : vector<16x128xf32>
    %41 = vector.extract_strided_slice %30 {offsets = [2, 0], sizes = [16, 128], strides = [1, 1]} : vector<18x128xf32> to vector<16x128xf32>
    %c5 = arith.constant 5 : index
    %c0_27 = arith.constant 0 : index
    %c0_28 = arith.constant 0 : index
    %42 = vector.load %arg3[%c5, %c0_27, %c0_28] : memref<9x128x128xf32, #tpu.memory_space<vmem>>, vector<1x128x128xf32>
    %43 = vector.shape_cast %42 : vector<1x128x128xf32> to vector<128x128xf32>
    %cst_29 = arith.constant dense<0.000000e+00> : vector<16x128xf32>
    %44 = tpu.matmul %41, %43, %cst_29 {dimension_numbers = #tpu.dot_dimension_numbers<[1], [0], [0], [1], [0, 0, 1, 1], [], []>} : vector<16x128xf32>, vector<128x128xf32>, vector<16x128xf32> -> vector<16x128xf32>
    %45 = arith.addf %40, %44 : vector<16x128xf32>
    %c1_i32_30 = arith.constant 1 : i32
    %46 = arith.muli %c1_i32_30, %2 : i32
    %c2_i32 = arith.constant 2 : i32
    %47 = arith.addi %46, %c2_i32 : i32
    %c17_i32_31 = arith.constant 17 : i32
    %48 = arith.minsi %47, %c17_i32_31 : i32
    %c0_32 = arith.constant 0 : index
    %49 = arith.index_cast %48 : i32 to index
    %c0_33 = arith.constant 0 : index
    %c0_34 = arith.constant 0 : index
    %50 = vector.load %arg2[%c0_32, %49, %c0_33, %c0_34] : memref<1x18x18x128xf32, #tpu.memory_space<vmem>>, vector<1x1x18x128xf32>
    %51 = vector.shape_cast %50 : vector<1x1x18x128xf32> to vector<18x128xf32>
    %52 = vector.extract_strided_slice %51 {offsets = [0, 0], sizes = [16, 128], strides = [1, 1]} : vector<18x128xf32> to vector<16x128xf32>
    %c6 = arith.constant 6 : index
    %c0_35 = arith.constant 0 : index
    %c0_36 = arith.constant 0 : index
    %53 = vector.load %arg3[%c6, %c0_35, %c0_36] : memref<9x128x128xf32, #tpu.memory_space<vmem>>, vector<1x128x128xf32>
    %54 = vector.shape_cast %53 : vector<1x128x128xf32> to vector<128x128xf32>
    %cst_37 = arith.constant dense<0.000000e+00> : vector<16x128xf32>
    %55 = tpu.matmul %52, %54, %cst_37 {dimension_numbers = #tpu.dot_dimension_numbers<[1], [0], [0], [1], [0, 0, 1, 1], [], []>} : vector<16x128xf32>, vector<128x128xf32>, vector<16x128xf32> -> vector<16x128xf32>
    %56 = arith.addf %45, %55 : vector<16x128xf32>
    %57 = vector.extract_strided_slice %51 {offsets = [1, 0], sizes = [16, 128], strides = [1, 1]} : vector<18x128xf32> to vector<16x128xf32>
    %c7 = arith.constant 7 : index
    %c0_38 = arith.constant 0 : index
    %c0_39 = arith.constant 0 : index
    %58 = vector.load %arg3[%c7, %c0_38, %c0_39] : memref<9x128x128xf32, #tpu.memory_space<vmem>>, vector<1x128x128xf32>
    %59 = vector.shape_cast %58 : vector<1x128x128xf32> to vector<128x128xf32>
    %cst_40 = arith.constant dense<0.000000e+00> : vector<16x128xf32>
    %60 = tpu.matmul %57, %59, %cst_40 {dimension_numbers = #tpu.dot_dimension_numbers<[1], [0], [0], [1], [0, 0, 1, 1], [], []>} : vector<16x128xf32>, vector<128x128xf32>, vector<16x128xf32> -> vector<16x128xf32>
    %61 = arith.addf %56, %60 : vector<16x128xf32>
    %62 = vector.extract_strided_slice %51 {offsets = [2, 0], sizes = [16, 128], strides = [1, 1]} : vector<18x128xf32> to vector<16x128xf32>
    %c8 = arith.constant 8 : index
    %c0_41 = arith.constant 0 : index
    %c0_42 = arith.constant 0 : index
    %63 = vector.load %arg3[%c8, %c0_41, %c0_42] : memref<9x128x128xf32, #tpu.memory_space<vmem>>, vector<1x128x128xf32>
    %64 = vector.shape_cast %63 : vector<1x128x128xf32> to vector<128x128xf32>
    %cst_43 = arith.constant dense<0.000000e+00> : vector<16x128xf32>
    %65 = tpu.matmul %62, %64, %cst_43 {dimension_numbers = #tpu.dot_dimension_numbers<[1], [0], [0], [1], [0, 0, 1, 1], [], []>} : vector<16x128xf32>, vector<128x128xf32>, vector<16x128xf32> -> vector<16x128xf32>
    %66 = arith.addf %61, %65 : vector<16x128xf32>
    %67 = vector.broadcast %0 : vector<1x128xf32> to vector<16x128xf32>
    %68 = arith.addf %66, %67 : vector<16x128xf32>
    %cst_44 = arith.constant 0.000000e+00 : f32
    %69 = vector.broadcast %cst_44 : f32 to vector<16x128xf32>
    %70 = arith.maximumf %68, %69 : vector<16x128xf32>
    %c0_45 = arith.constant 0 : index
    %c0_46 = arith.constant 0 : index
    %c0_47 = arith.constant 0 : index
    %c0_48 = arith.constant 0 : index
    %71 = vector.load %arg5[%c0_45, %c0_46, %c0_47, %c0_48] : memref<1x4x16x128xf32, #tpu.memory_space<vmem>>, vector<1x1x16x128xf32>
    %72 = vector.shape_cast %71 : vector<1x1x16x128xf32> to vector<16x128xf32>
    %73 = vector.shape_cast %70 : vector<16x128xf32> to vector<1x1x16x128xf32>
    tpu.vector_store %arg5[%c0_45, %c0_46, %c0_47, %c0_48], %73 {strides = array<i32>} : memref<1x4x16x128xf32, #tpu.memory_space<vmem>>, vector<1x1x16x128xf32>,
    %c4_i32_49 = arith.constant 4 : i32
    %74 = arith.muli %arg1, %c4_i32_49 : i32
    %c1_i32_50 = arith.constant 1 : i32
    %75 = arith.addi %74, %c1_i32_50 : i32
    %cst_51 = arith.constant 0.000000e+00 : f32
    %76 = vector.broadcast %cst_51 : f32 to vector<16x128xf32>
    %c1_i32_52 = arith.constant 1 : i32
    %77 = arith.muli %c1_i32_52, %75 : i32
    %c0_i32_53 = arith.constant 0 : i32
    %78 = arith.addi %77, %c0_i32_53 : i32
    %c17_i32_54 = arith.constant 17 : i32
    %79 = arith.minsi %78, %c17_i32_54 : i32
    %c0_55 = arith.constant 0 : index
    %80 = arith.index_cast %79 : i32 to index
    %c0_56 = arith.constant 0 : index
    %c0_57 = arith.constant 0 : index
    %81 = vector.load %arg2[%c0_55, %80, %c0_56, %c0_57] : memref<1x18x18x128xf32, #tpu.memory_space<vmem>>, vector<1x1x18x128xf32>
    %82 = vector.shape_cast %81 : vector<1x1x18x128xf32> to vector<18x128xf32>
    %83 = vector.extract_strided_slice %82 {offsets = [0, 0], sizes = [16, 128], strides = [1, 1]} : vector<18x128xf32> to vector<16x128xf32>
    %c0_58 = arith.constant 0 : index
    %c0_59 = arith.constant 0 : index
    %c0_60 = arith.constant 0 : index
    %84 = vector.load %arg3[%c0_58, %c0_59, %c0_60] : memref<9x128x128xf32, #tpu.memory_space<vmem>>, vector<1x128x128xf32>
    %85 = vector.shape_cast %84 : vector<1x128x128xf32> to vector<128x128xf32>
    %cst_61 = arith.constant dense<0.000000e+00> : vector<16x128xf32>
    %86 = tpu.matmul %83, %85, %cst_61 {dimension_numbers = #tpu.dot_dimension_numbers<[1], [0], [0], [1], [0, 0, 1, 1], [], []>} : vector<16x128xf32>, vector<128x128xf32>, vector<16x128xf32> -> vector<16x128xf32>
    %87 = arith.addf %76, %86 : vector<16x128xf32>
    %88 = vector.extract_strided_slice %82 {offsets = [1, 0], sizes = [16, 128], strides = [1, 1]} : vector<18x128xf32> to vector<16x128xf32>
    %c1_62 = arith.constant 1 : index
    %c0_63 = arith.constant 0 : index
    %c0_64 = arith.constant 0 : index
    %89 = vector.load %arg3[%c1_62, %c0_63, %c0_64] : memref<9x128x128xf32, #tpu.memory_space<vmem>>, vector<1x128x128xf32>
    %90 = vector.shape_cast %89 : vector<1x128x128xf32> to vector<128x128xf32>
    %cst_65 = arith.constant dense<0.000000e+00> : vector<16x128xf32>
    %91 = tpu.matmul %88, %90, %cst_65 {dimension_numbers = #tpu.dot_dimension_numbers<[1], [0], [0], [1], [0, 0, 1, 1], [], []>} : vector<16x128xf32>, vector<128x128xf32>, vector<16x128xf32> -> vector<16x128xf32>
    %92 = arith.addf %87, %91 : vector<16x128xf32>
    %93 = vector.extract_strided_slice %82 {offsets = [2, 0], sizes = [16, 128], strides = [1, 1]} : vector<18x128xf32> to vector<16x128xf32>
    %c2_66 = arith.constant 2 : index
    %c0_67 = arith.constant 0 : index
    %c0_68 = arith.constant 0 : index
    %94 = vector.load %arg3[%c2_66, %c0_67, %c0_68] : memref<9x128x128xf32, #tpu.memory_space<vmem>>, vector<1x128x128xf32>
    %95 = vector.shape_cast %94 : vector<1x128x128xf32> to vector<128x128xf32>
    %cst_69 = arith.constant dense<0.000000e+00> : vector<16x128xf32>
    %96 = tpu.matmul %93, %95, %cst_69 {dimension_numbers = #tpu.dot_dimension_numbers<[1], [0], [0], [1], [0, 0, 1, 1], [], []>} : vector<16x128xf32>, vector<128x128xf32>, vector<16x128xf32> -> vector<16x128xf32>
    %97 = arith.addf %92, %96 : vector<16x128xf32>
    %c1_i32_70 = arith.constant 1 : i32
    %98 = arith.muli %c1_i32_70, %75 : i32
    %c1_i32_71 = arith.constant 1 : i32
    %99 = arith.addi %98, %c1_i32_71 : i32
    %c17_i32_72 = arith.constant 17 : i32
    %100 = arith.minsi %99, %c17_i32_72 : i32
    %c0_73 = arith.constant 0 : index
    %101 = arith.index_cast %100 : i32 to index
    %c0_74 = arith.constant 0 : index
    %c0_75 = arith.constant 0 : index
    %102 = vector.load %arg2[%c0_73, %101, %c0_74, %c0_75] : memref<1x18x18x128xf32, #tpu.memory_space<vmem>>, vector<1x1x18x128xf32>
    %103 = vector.shape_cast %102 : vector<1x1x18x128xf32> to vector<18x128xf32>
    %104 = vector.extract_strided_slice %103 {offsets = [0, 0], sizes = [16, 128], strides = [1, 1]} : vector<18x128xf32> to vector<16x128xf32>
    %c3_76 = arith.constant 3 : index
    %c0_77 = arith.constant 0 : index
    %c0_78 = arith.constant 0 : index
    %105 = vector.load %arg3[%c3_76, %c0_77, %c0_78] : memref<9x128x128xf32, #tpu.memory_space<vmem>>, vector<1x128x128xf32>
    %106 = vector.shape_cast %105 : vector<1x128x128xf32> to vector<128x128xf32>
    %cst_79 = arith.constant dense<0.000000e+00> : vector<16x128xf32>
    %107 = tpu.matmul %104, %106, %cst_79 {dimension_numbers = #tpu.dot_dimension_numbers<[1], [0], [0], [1], [0, 0, 1, 1], [], []>} : vector<16x128xf32>, vector<128x128xf32>, vector<16x128xf32> -> vector<16x128xf32>
    %108 = arith.addf %97, %107 : vector<16x128xf32>
    %109 = vector.extract_strided_slice %103 {offsets = [1, 0], sizes = [16, 128], strides = [1, 1]} : vector<18x128xf32> to vector<16x128xf32>
    %c4_80 = arith.constant 4 : index
    %c0_81 = arith.constant 0 : index
    %c0_82 = arith.constant 0 : index
    %110 = vector.load %arg3[%c4_80, %c0_81, %c0_82] : memref<9x128x128xf32, #tpu.memory_space<vmem>>, vector<1x128x128xf32>
    %111 = vector.shape_cast %110 : vector<1x128x128xf32> to vector<128x128xf32>
    %cst_83 = arith.constant dense<0.000000e+00> : vector<16x128xf32>
    %112 = tpu.matmul %109, %111, %cst_83 {dimension_numbers = #tpu.dot_dimension_numbers<[1], [0], [0], [1], [0, 0, 1, 1], [], []>} : vector<16x128xf32>, vector<128x128xf32>, vector<16x128xf32> -> vector<16x128xf32>
    %113 = arith.addf %108, %112 : vector<16x128xf32>
    %114 = vector.extract_strided_slice %103 {offsets = [2, 0], sizes = [16, 128], strides = [1, 1]} : vector<18x128xf32> to vector<16x128xf32>
    %c5_84 = arith.constant 5 : index
    %c0_85 = arith.constant 0 : index
    %c0_86 = arith.constant 0 : index
    %115 = vector.load %arg3[%c5_84, %c0_85, %c0_86] : memref<9x128x128xf32, #tpu.memory_space<vmem>>, vector<1x128x128xf32>
    %116 = vector.shape_cast %115 : vector<1x128x128xf32> to vector<128x128xf32>
    %cst_87 = arith.constant dense<0.000000e+00> : vector<16x128xf32>
    %117 = tpu.matmul %114, %116, %cst_87 {dimension_numbers = #tpu.dot_dimension_numbers<[1], [0], [0], [1], [0, 0, 1, 1], [], []>} : vector<16x128xf32>, vector<128x128xf32>, vector<16x128xf32> -> vector<16x128xf32>
    %118 = arith.addf %113, %117 : vector<16x128xf32>
    %c1_i32_88 = arith.constant 1 : i32
    %119 = arith.muli %c1_i32_88, %75 : i32
    %c2_i32_89 = arith.constant 2 : i32
    %120 = arith.addi %119, %c2_i32_89 : i32
    %c17_i32_90 = arith.constant 17 : i32
    %121 = arith.minsi %120, %c17_i32_90 : i32
    %c0_91 = arith.constant 0 : index
    %122 = arith.index_cast %121 : i32 to index
    %c0_92 = arith.constant 0 : index
    %c0_93 = arith.constant 0 : index
    %123 = vector.load %arg2[%c0_91, %122, %c0_92, %c0_93] : memref<1x18x18x128xf32, #tpu.memory_space<vmem>>, vector<1x1x18x128xf32>
    %124 = vector.shape_cast %123 : vector<1x1x18x128xf32> to vector<18x128xf32>
    %125 = vector.extract_strided_slice %124 {offsets = [0, 0], sizes = [16, 128], strides = [1, 1]} : vector<18x128xf32> to vector<16x128xf32>
    %c6_94 = arith.constant 6 : index
    %c0_95 = arith.constant 0 : index
    %c0_96 = arith.constant 0 : index
    %126 = vector.load %arg3[%c6_94, %c0_95, %c0_96] : memref<9x128x128xf32, #tpu.memory_space<vmem>>, vector<1x128x128xf32>
    %127 = vector.shape_cast %126 : vector<1x128x128xf32> to vector<128x128xf32>
    %cst_97 = arith.constant dense<0.000000e+00> : vector<16x128xf32>
    %128 = tpu.matmul %125, %127, %cst_97 {dimension_numbers = #tpu.dot_dimension_numbers<[1], [0], [0], [1], [0, 0, 1, 1], [], []>} : vector<16x128xf32>, vector<128x128xf32>, vector<16x128xf32> -> vector<16x128xf32>
    %129 = arith.addf %118, %128 : vector<16x128xf32>
    %130 = vector.extract_strided_slice %124 {offsets = [1, 0], sizes = [16, 128], strides = [1, 1]} : vector<18x128xf32> to vector<16x128xf32>
    %c7_98 = arith.constant 7 : index
    %c0_99 = arith.constant 0 : index
    %c0_100 = arith.constant 0 : index
    %131 = vector.load %arg3[%c7_98, %c0_99, %c0_100] : memref<9x128x128xf32, #tpu.memory_space<vmem>>, vector<1x128x128xf32>
    %132 = vector.shape_cast %131 : vector<1x128x128xf32> to vector<128x128xf32>
    %cst_101 = arith.constant dense<0.000000e+00> : vector<16x128xf32>
    %133 = tpu.matmul %130, %132, %cst_101 {dimension_numbers = #tpu.dot_dimension_numbers<[1], [0], [0], [1], [0, 0, 1, 1], [], []>} : vector<16x128xf32>, vector<128x128xf32>, vector<16x128xf32> -> vector<16x128xf32>
    %134 = arith.addf %129, %133 : vector<16x128xf32>
    %135 = vector.extract_strided_slice %124 {offsets = [2, 0], sizes = [16, 128], strides = [1, 1]} : vector<18x128xf32> to vector<16x128xf32>
    %c8_102 = arith.constant 8 : index
    %c0_103 = arith.constant 0 : index
    %c0_104 = arith.constant 0 : index
    %136 = vector.load %arg3[%c8_102, %c0_103, %c0_104] : memref<9x128x128xf32, #tpu.memory_space<vmem>>, vector<1x128x128xf32>
    %137 = vector.shape_cast %136 : vector<1x128x128xf32> to vector<128x128xf32>
    %cst_105 = arith.constant dense<0.000000e+00> : vector<16x128xf32>
    %138 = tpu.matmul %135, %137, %cst_105 {dimension_numbers = #tpu.dot_dimension_numbers<[1], [0], [0], [1], [0, 0, 1, 1], [], []>} : vector<16x128xf32>, vector<128x128xf32>, vector<16x128xf32> -> vector<16x128xf32>
    %139 = arith.addf %134, %138 : vector<16x128xf32>
    %140 = vector.broadcast %0 : vector<1x128xf32> to vector<16x128xf32>
    %141 = arith.addf %139, %140 : vector<16x128xf32>
    %cst_106 = arith.constant 0.000000e+00 : f32
    %142 = vector.broadcast %cst_106 : f32 to vector<16x128xf32>
    %143 = arith.maximumf %141, %142 : vector<16x128xf32>
    %c0_107 = arith.constant 0 : index
    %c1_108 = arith.constant 1 : index
    %c0_109 = arith.constant 0 : index
    %c0_110 = arith.constant 0 : index
    %144 = vector.load %arg5[%c0_107, %c1_108, %c0_109, %c0_110] : memref<1x4x16x128xf32, #tpu.memory_space<vmem>>, vector<1x1x16x128xf32>
    %145 = vector.shape_cast %144 : vector<1x1x16x128xf32> to vector<16x128xf32>
    %146 = vector.shape_cast %143 : vector<16x128xf32> to vector<1x1x16x128xf32>
    tpu.vector_store %arg5[%c0_107, %c1_108, %c0_109, %c0_110], %146 {strides = array<i32>} : memref<1x4x16x128xf32, #tpu.memory_space<vmem>>, vector<1x1x16x128xf32>,
    %c4_i32_111 = arith.constant 4 : i32
    %147 = arith.muli %arg1, %c4_i32_111 : i32
    %c2_i32_112 = arith.constant 2 : i32
    %148 = arith.addi %147, %c2_i32_112 : i32
    %cst_113 = arith.constant 0.000000e+00 : f32
    %149 = vector.broadcast %cst_113 : f32 to vector<16x128xf32>
    %c1_i32_114 = arith.constant 1 : i32
    %150 = arith.muli %c1_i32_114, %148 : i32
    %c0_i32_115 = arith.constant 0 : i32
    %151 = arith.addi %150, %c0_i32_115 : i32
    %c17_i32_116 = arith.constant 17 : i32
    %152 = arith.minsi %151, %c17_i32_116 : i32
    %c0_117 = arith.constant 0 : index
    %153 = arith.index_cast %152 : i32 to index
    %c0_118 = arith.constant 0 : index
    %c0_119 = arith.constant 0 : index
    %154 = vector.load %arg2[%c0_117, %153, %c0_118, %c0_119] : memref<1x18x18x128xf32, #tpu.memory_space<vmem>>, vector<1x1x18x128xf32>
    %155 = vector.shape_cast %154 : vector<1x1x18x128xf32> to vector<18x128xf32>
    %156 = vector.extract_strided_slice %155 {offsets = [0, 0], sizes = [16, 128], strides = [1, 1]} : vector<18x128xf32> to vector<16x128xf32>
    %c0_120 = arith.constant 0 : index
    %c0_121 = arith.constant 0 : index
    %c0_122 = arith.constant 0 : index
    %157 = vector.load %arg3[%c0_120, %c0_121, %c0_122] : memref<9x128x128xf32, #tpu.memory_space<vmem>>, vector<1x128x128xf32>
    %158 = vector.shape_cast %157 : vector<1x128x128xf32> to vector<128x128xf32>
    %cst_123 = arith.constant dense<0.000000e+00> : vector<16x128xf32>
    %159 = tpu.matmul %156, %158, %cst_123 {dimension_numbers = #tpu.dot_dimension_numbers<[1], [0], [0], [1], [0, 0, 1, 1], [], []>} : vector<16x128xf32>, vector<128x128xf32>, vector<16x128xf32> -> vector<16x128xf32>
    %160 = arith.addf %149, %159 : vector<16x128xf32>
    %161 = vector.extract_strided_slice %155 {offsets = [1, 0], sizes = [16, 128], strides = [1, 1]} : vector<18x128xf32> to vector<16x128xf32>
    %c1_124 = arith.constant 1 : index
    %c0_125 = arith.constant 0 : index
    %c0_126 = arith.constant 0 : index
    %162 = vector.load %arg3[%c1_124, %c0_125, %c0_126] : memref<9x128x128xf32, #tpu.memory_space<vmem>>, vector<1x128x128xf32>
    %163 = vector.shape_cast %162 : vector<1x128x128xf32> to vector<128x128xf32>
    %cst_127 = arith.constant dense<0.000000e+00> : vector<16x128xf32>
    %164 = tpu.matmul %161, %163, %cst_127 {dimension_numbers = #tpu.dot_dimension_numbers<[1], [0], [0], [1], [0, 0, 1, 1], [], []>} : vector<16x128xf32>, vector<128x128xf32>, vector<16x128xf32> -> vector<16x128xf32>
    %165 = arith.addf %160, %164 : vector<16x128xf32>
    %166 = vector.extract_strided_slice %155 {offsets = [2, 0], sizes = [16, 128], strides = [1, 1]} : vector<18x128xf32> to vector<16x128xf32>
    %c2_128 = arith.constant 2 : index
    %c0_129 = arith.constant 0 : index
    %c0_130 = arith.constant 0 : index
    %167 = vector.load %arg3[%c2_128, %c0_129, %c0_130] : memref<9x128x128xf32, #tpu.memory_space<vmem>>, vector<1x128x128xf32>
    %168 = vector.shape_cast %167 : vector<1x128x128xf32> to vector<128x128xf32>
    %cst_131 = arith.constant dense<0.000000e+00> : vector<16x128xf32>
    %169 = tpu.matmul %166, %168, %cst_131 {dimension_numbers = #tpu.dot_dimension_numbers<[1], [0], [0], [1], [0, 0, 1, 1], [], []>} : vector<16x128xf32>, vector<128x128xf32>, vector<16x128xf32> -> vector<16x128xf32>
    %170 = arith.addf %165, %169 : vector<16x128xf32>
    %c1_i32_132 = arith.constant 1 : i32
    %171 = arith.muli %c1_i32_132, %148 : i32
    %c1_i32_133 = arith.constant 1 : i32
    %172 = arith.addi %171, %c1_i32_133 : i32
    %c17_i32_134 = arith.constant 17 : i32
    %173 = arith.minsi %172, %c17_i32_134 : i32
    %c0_135 = arith.constant 0 : index
    %174 = arith.index_cast %173 : i32 to index
    %c0_136 = arith.constant 0 : index
    %c0_137 = arith.constant 0 : index
    %175 = vector.load %arg2[%c0_135, %174, %c0_136, %c0_137] : memref<1x18x18x128xf32, #tpu.memory_space<vmem>>, vector<1x1x18x128xf32>
    %176 = vector.shape_cast %175 : vector<1x1x18x128xf32> to vector<18x128xf32>
    %177 = vector.extract_strided_slice %176 {offsets = [0, 0], sizes = [16, 128], strides = [1, 1]} : vector<18x128xf32> to vector<16x128xf32>
    %c3_138 = arith.constant 3 : index
    %c0_139 = arith.constant 0 : index
    %c0_140 = arith.constant 0 : index
    %178 = vector.load %arg3[%c3_138, %c0_139, %c0_140] : memref<9x128x128xf32, #tpu.memory_space<vmem>>, vector<1x128x128xf32>
    %179 = vector.shape_cast %178 : vector<1x128x128xf32> to vector<128x128xf32>
    %cst_141 = arith.constant dense<0.000000e+00> : vector<16x128xf32>
    %180 = tpu.matmul %177, %179, %cst_141 {dimension_numbers = #tpu.dot_dimension_numbers<[1], [0], [0], [1], [0, 0, 1, 1], [], []>} : vector<16x128xf32>, vector<128x128xf32>, vector<16x128xf32> -> vector<16x128xf32>
    %181 = arith.addf %170, %180 : vector<16x128xf32>
    %182 = vector.extract_strided_slice %176 {offsets = [1, 0], sizes = [16, 128], strides = [1, 1]} : vector<18x128xf32> to vector<16x128xf32>
    %c4_142 = arith.constant 4 : index
    %c0_143 = arith.constant 0 : index
    %c0_144 = arith.constant 0 : index
    %183 = vector.load %arg3[%c4_142, %c0_143, %c0_144] : memref<9x128x128xf32, #tpu.memory_space<vmem>>, vector<1x128x128xf32>
    %184 = vector.shape_cast %183 : vector<1x128x128xf32> to vector<128x128xf32>
    %cst_145 = arith.constant dense<0.000000e+00> : vector<16x128xf32>
    %185 = tpu.matmul %182, %184, %cst_145 {dimension_numbers = #tpu.dot_dimension_numbers<[1], [0], [0], [1], [0, 0, 1, 1], [], []>} : vector<16x128xf32>, vector<128x128xf32>, vector<16x128xf32> -> vector<16x128xf32>
    %186 = arith.addf %181, %185 : vector<16x128xf32>
    %187 = vector.extract_strided_slice %176 {offsets = [2, 0], sizes = [16, 128], strides = [1, 1]} : vector<18x128xf32> to vector<16x128xf32>
    %c5_146 = arith.constant 5 : index
    %c0_147 = arith.constant 0 : index
    %c0_148 = arith.constant 0 : index
    %188 = vector.load %arg3[%c5_146, %c0_147, %c0_148] : memref<9x128x128xf32, #tpu.memory_space<vmem>>, vector<1x128x128xf32>
    %189 = vector.shape_cast %188 : vector<1x128x128xf32> to vector<128x128xf32>
    %cst_149 = arith.constant dense<0.000000e+00> : vector<16x128xf32>
    %190 = tpu.matmul %187, %189, %cst_149 {dimension_numbers = #tpu.dot_dimension_numbers<[1], [0], [0], [1], [0, 0, 1, 1], [], []>} : vector<16x128xf32>, vector<128x128xf32>, vector<16x128xf32> -> vector<16x128xf32>
    %191 = arith.addf %186, %190 : vector<16x128xf32>
    %c1_i32_150 = arith.constant 1 : i32
    %192 = arith.muli %c1_i32_150, %148 : i32
    %c2_i32_151 = arith.constant 2 : i32
    %193 = arith.addi %192, %c2_i32_151 : i32
    %c17_i32_152 = arith.constant 17 : i32
    %194 = arith.minsi %193, %c17_i32_152 : i32
    %c0_153 = arith.constant 0 : index
    %195 = arith.index_cast %194 : i32 to index
    %c0_154 = arith.constant 0 : index
    %c0_155 = arith.constant 0 : index
    %196 = vector.load %arg2[%c0_153, %195, %c0_154, %c0_155] : memref<1x18x18x128xf32, #tpu.memory_space<vmem>>, vector<1x1x18x128xf32>
    %197 = vector.shape_cast %196 : vector<1x1x18x128xf32> to vector<18x128xf32>
    %198 = vector.extract_strided_slice %197 {offsets = [0, 0], sizes = [16, 128], strides = [1, 1]} : vector<18x128xf32> to vector<16x128xf32>
    %c6_156 = arith.constant 6 : index
    %c0_157 = arith.constant 0 : index
    %c0_158 = arith.constant 0 : index
    %199 = vector.load %arg3[%c6_156, %c0_157, %c0_158] : memref<9x128x128xf32, #tpu.memory_space<vmem>>, vector<1x128x128xf32>
    %200 = vector.shape_cast %199 : vector<1x128x128xf32> to vector<128x128xf32>
    %cst_159 = arith.constant dense<0.000000e+00> : vector<16x128xf32>
    %201 = tpu.matmul %198, %200, %cst_159 {dimension_numbers = #tpu.dot_dimension_numbers<[1], [0], [0], [1], [0, 0, 1, 1], [], []>} : vector<16x128xf32>, vector<128x128xf32>, vector<16x128xf32> -> vector<16x128xf32>
    %202 = arith.addf %191, %201 : vector<16x128xf32>
    %203 = vector.extract_strided_slice %197 {offsets = [1, 0], sizes = [16, 128], strides = [1, 1]} : vector<18x128xf32> to vector<16x128xf32>
    %c7_160 = arith.constant 7 : index
    %c0_161 = arith.constant 0 : index
    %c0_162 = arith.constant 0 : index
    %204 = vector.load %arg3[%c7_160, %c0_161, %c0_162] : memref<9x128x128xf32, #tpu.memory_space<vmem>>, vector<1x128x128xf32>
    %205 = vector.shape_cast %204 : vector<1x128x128xf32> to vector<128x128xf32>
    %cst_163 = arith.constant dense<0.000000e+00> : vector<16x128xf32>
    %206 = tpu.matmul %203, %205, %cst_163 {dimension_numbers = #tpu.dot_dimension_numbers<[1], [0], [0], [1], [0, 0, 1, 1], [], []>} : vector<16x128xf32>, vector<128x128xf32>, vector<16x128xf32> -> vector<16x128xf32>
    %207 = arith.addf %202, %206 : vector<16x128xf32>
    %208 = vector.extract_strided_slice %197 {offsets = [2, 0], sizes = [16, 128], strides = [1, 1]} : vector<18x128xf32> to vector<16x128xf32>
    %c8_164 = arith.constant 8 : index
    %c0_165 = arith.constant 0 : index
    %c0_166 = arith.constant 0 : index
    %209 = vector.load %arg3[%c8_164, %c0_165, %c0_166] : memref<9x128x128xf32, #tpu.memory_space<vmem>>, vector<1x128x128xf32>
    %210 = vector.shape_cast %209 : vector<1x128x128xf32> to vector<128x128xf32>
    %cst_167 = arith.constant dense<0.000000e+00> : vector<16x128xf32>
    %211 = tpu.matmul %208, %210, %cst_167 {dimension_numbers = #tpu.dot_dimension_numbers<[1], [0], [0], [1], [0, 0, 1, 1], [], []>} : vector<16x128xf32>, vector<128x128xf32>, vector<16x128xf32> -> vector<16x128xf32>
    %212 = arith.addf %207, %211 : vector<16x128xf32>
    %213 = vector.broadcast %0 : vector<1x128xf32> to vector<16x128xf32>
    %214 = arith.addf %212, %213 : vector<16x128xf32>
    %cst_168 = arith.constant 0.000000e+00 : f32
    %215 = vector.broadcast %cst_168 : f32 to vector<16x128xf32>
    %216 = arith.maximumf %214, %215 : vector<16x128xf32>
    %c0_169 = arith.constant 0 : index
    %c2_170 = arith.constant 2 : index
    %c0_171 = arith.constant 0 : index
    %c0_172 = arith.constant 0 : index
    %217 = vector.load %arg5[%c0_169, %c2_170, %c0_171, %c0_172] : memref<1x4x16x128xf32, #tpu.memory_space<vmem>>, vector<1x1x16x128xf32>
    %218 = vector.shape_cast %217 : vector<1x1x16x128xf32> to vector<16x128xf32>
    %219 = vector.shape_cast %216 : vector<16x128xf32> to vector<1x1x16x128xf32>
    tpu.vector_store %arg5[%c0_169, %c2_170, %c0_171, %c0_172], %219 {strides = array<i32>} : memref<1x4x16x128xf32, #tpu.memory_space<vmem>>, vector<1x1x16x128xf32>,
    %c4_i32_173 = arith.constant 4 : i32
    %220 = arith.muli %arg1, %c4_i32_173 : i32
    %c3_i32 = arith.constant 3 : i32
    %221 = arith.addi %220, %c3_i32 : i32
    %cst_174 = arith.constant 0.000000e+00 : f32
    %222 = vector.broadcast %cst_174 : f32 to vector<16x128xf32>
    %c1_i32_175 = arith.constant 1 : i32
    %223 = arith.muli %c1_i32_175, %221 : i32
    %c0_i32_176 = arith.constant 0 : i32
    %224 = arith.addi %223, %c0_i32_176 : i32
    %c17_i32_177 = arith.constant 17 : i32
    %225 = arith.minsi %224, %c17_i32_177 : i32
    %c0_178 = arith.constant 0 : index
    %226 = arith.index_cast %225 : i32 to index
    %c0_179 = arith.constant 0 : index
    %c0_180 = arith.constant 0 : index
    %227 = vector.load %arg2[%c0_178, %226, %c0_179, %c0_180] : memref<1x18x18x128xf32, #tpu.memory_space<vmem>>, vector<1x1x18x128xf32>
    %228 = vector.shape_cast %227 : vector<1x1x18x128xf32> to vector<18x128xf32>
    %229 = vector.extract_strided_slice %228 {offsets = [0, 0], sizes = [16, 128], strides = [1, 1]} : vector<18x128xf32> to vector<16x128xf32>
    %c0_181 = arith.constant 0 : index
    %c0_182 = arith.constant 0 : index
    %c0_183 = arith.constant 0 : index
    %230 = vector.load %arg3[%c0_181, %c0_182, %c0_183] : memref<9x128x128xf32, #tpu.memory_space<vmem>>, vector<1x128x128xf32>
    %231 = vector.shape_cast %230 : vector<1x128x128xf32> to vector<128x128xf32>
    %cst_184 = arith.constant dense<0.000000e+00> : vector<16x128xf32>
    %232 = tpu.matmul %229, %231, %cst_184 {dimension_numbers = #tpu.dot_dimension_numbers<[1], [0], [0], [1], [0, 0, 1, 1], [], []>} : vector<16x128xf32>, vector<128x128xf32>, vector<16x128xf32> -> vector<16x128xf32>
    %233 = arith.addf %222, %232 : vector<16x128xf32>
    %234 = vector.extract_strided_slice %228 {offsets = [1, 0], sizes = [16, 128], strides = [1, 1]} : vector<18x128xf32> to vector<16x128xf32>
    %c1_185 = arith.constant 1 : index
    %c0_186 = arith.constant 0 : index
    %c0_187 = arith.constant 0 : index
    %235 = vector.load %arg3[%c1_185, %c0_186, %c0_187] : memref<9x128x128xf32, #tpu.memory_space<vmem>>, vector<1x128x128xf32>
    %236 = vector.shape_cast %235 : vector<1x128x128xf32> to vector<128x128xf32>
    %cst_188 = arith.constant dense<0.000000e+00> : vector<16x128xf32>
    %237 = tpu.matmul %234, %236, %cst_188 {dimension_numbers = #tpu.dot_dimension_numbers<[1], [0], [0], [1], [0, 0, 1, 1], [], []>} : vector<16x128xf32>, vector<128x128xf32>, vector<16x128xf32> -> vector<16x128xf32>
    %238 = arith.addf %233, %237 : vector<16x128xf32>
    %239 = vector.extract_strided_slice %228 {offsets = [2, 0], sizes = [16, 128], strides = [1, 1]} : vector<18x128xf32> to vector<16x128xf32>
    %c2_189 = arith.constant 2 : index
    %c0_190 = arith.constant 0 : index
    %c0_191 = arith.constant 0 : index
    %240 = vector.load %arg3[%c2_189, %c0_190, %c0_191] : memref<9x128x128xf32, #tpu.memory_space<vmem>>, vector<1x128x128xf32>
    %241 = vector.shape_cast %240 : vector<1x128x128xf32> to vector<128x128xf32>
    %cst_192 = arith.constant dense<0.000000e+00> : vector<16x128xf32>
    %242 = tpu.matmul %239, %241, %cst_192 {dimension_numbers = #tpu.dot_dimension_numbers<[1], [0], [0], [1], [0, 0, 1, 1], [], []>} : vector<16x128xf32>, vector<128x128xf32>, vector<16x128xf32> -> vector<16x128xf32>
    %243 = arith.addf %238, %242 : vector<16x128xf32>
    %c1_i32_193 = arith.constant 1 : i32
    %244 = arith.muli %c1_i32_193, %221 : i32
    %c1_i32_194 = arith.constant 1 : i32
    %245 = arith.addi %244, %c1_i32_194 : i32
    %c17_i32_195 = arith.constant 17 : i32
    %246 = arith.minsi %245, %c17_i32_195 : i32
    %c0_196 = arith.constant 0 : index
    %247 = arith.index_cast %246 : i32 to index
    %c0_197 = arith.constant 0 : index
    %c0_198 = arith.constant 0 : index
    %248 = vector.load %arg2[%c0_196, %247, %c0_197, %c0_198] : memref<1x18x18x128xf32, #tpu.memory_space<vmem>>, vector<1x1x18x128xf32>
    %249 = vector.shape_cast %248 : vector<1x1x18x128xf32> to vector<18x128xf32>
    %250 = vector.extract_strided_slice %249 {offsets = [0, 0], sizes = [16, 128], strides = [1, 1]} : vector<18x128xf32> to vector<16x128xf32>
    %c3_199 = arith.constant 3 : index
    %c0_200 = arith.constant 0 : index
    %c0_201 = arith.constant 0 : index
    %251 = vector.load %arg3[%c3_199, %c0_200, %c0_201] : memref<9x128x128xf32, #tpu.memory_space<vmem>>, vector<1x128x128xf32>
    %252 = vector.shape_cast %251 : vector<1x128x128xf32> to vector<128x128xf32>
    %cst_202 = arith.constant dense<0.000000e+00> : vector<16x128xf32>
    %253 = tpu.matmul %250, %252, %cst_202 {dimension_numbers = #tpu.dot_dimension_numbers<[1], [0], [0], [1], [0, 0, 1, 1], [], []>} : vector<16x128xf32>, vector<128x128xf32>, vector<16x128xf32> -> vector<16x128xf32>
    %254 = arith.addf %243, %253 : vector<16x128xf32>
    %255 = vector.extract_strided_slice %249 {offsets = [1, 0], sizes = [16, 128], strides = [1, 1]} : vector<18x128xf32> to vector<16x128xf32>
    %c4_203 = arith.constant 4 : index
    %c0_204 = arith.constant 0 : index
    %c0_205 = arith.constant 0 : index
    %256 = vector.load %arg3[%c4_203, %c0_204, %c0_205] : memref<9x128x128xf32, #tpu.memory_space<vmem>>, vector<1x128x128xf32>
    %257 = vector.shape_cast %256 : vector<1x128x128xf32> to vector<128x128xf32>
    %cst_206 = arith.constant dense<0.000000e+00> : vector<16x128xf32>
    %258 = tpu.matmul %255, %257, %cst_206 {dimension_numbers = #tpu.dot_dimension_numbers<[1], [0], [0], [1], [0, 0, 1, 1], [], []>} : vector<16x128xf32>, vector<128x128xf32>, vector<16x128xf32> -> vector<16x128xf32>
    %259 = arith.addf %254, %258 : vector<16x128xf32>
    %260 = vector.extract_strided_slice %249 {offsets = [2, 0], sizes = [16, 128], strides = [1, 1]} : vector<18x128xf32> to vector<16x128xf32>
    %c5_207 = arith.constant 5 : index
    %c0_208 = arith.constant 0 : index
    %c0_209 = arith.constant 0 : index
    %261 = vector.load %arg3[%c5_207, %c0_208, %c0_209] : memref<9x128x128xf32, #tpu.memory_space<vmem>>, vector<1x128x128xf32>
    %262 = vector.shape_cast %261 : vector<1x128x128xf32> to vector<128x128xf32>
    %cst_210 = arith.constant dense<0.000000e+00> : vector<16x128xf32>
    %263 = tpu.matmul %260, %262, %cst_210 {dimension_numbers = #tpu.dot_dimension_numbers<[1], [0], [0], [1], [0, 0, 1, 1], [], []>} : vector<16x128xf32>, vector<128x128xf32>, vector<16x128xf32> -> vector<16x128xf32>
    %264 = arith.addf %259, %263 : vector<16x128xf32>
    %c1_i32_211 = arith.constant 1 : i32
    %265 = arith.muli %c1_i32_211, %221 : i32
    %c2_i32_212 = arith.constant 2 : i32
    %266 = arith.addi %265, %c2_i32_212 : i32
    %c17_i32_213 = arith.constant 17 : i32
    %267 = arith.minsi %266, %c17_i32_213 : i32
    %c0_214 = arith.constant 0 : index
    %268 = arith.index_cast %267 : i32 to index
    %c0_215 = arith.constant 0 : index
    %c0_216 = arith.constant 0 : index
    %269 = vector.load %arg2[%c0_214, %268, %c0_215, %c0_216] : memref<1x18x18x128xf32, #tpu.memory_space<vmem>>, vector<1x1x18x128xf32>
    %270 = vector.shape_cast %269 : vector<1x1x18x128xf32> to vector<18x128xf32>
    %271 = vector.extract_strided_slice %270 {offsets = [0, 0], sizes = [16, 128], strides = [1, 1]} : vector<18x128xf32> to vector<16x128xf32>
    %c6_217 = arith.constant 6 : index
    %c0_218 = arith.constant 0 : index
    %c0_219 = arith.constant 0 : index
    %272 = vector.load %arg3[%c6_217, %c0_218, %c0_219] : memref<9x128x128xf32, #tpu.memory_space<vmem>>, vector<1x128x128xf32>
    %273 = vector.shape_cast %272 : vector<1x128x128xf32> to vector<128x128xf32>
    %cst_220 = arith.constant dense<0.000000e+00> : vector<16x128xf32>
    %274 = tpu.matmul %271, %273, %cst_220 {dimension_numbers = #tpu.dot_dimension_numbers<[1], [0], [0], [1], [0, 0, 1, 1], [], []>} : vector<16x128xf32>, vector<128x128xf32>, vector<16x128xf32> -> vector<16x128xf32>
    %275 = arith.addf %264, %274 : vector<16x128xf32>
    %276 = vector.extract_strided_slice %270 {offsets = [1, 0], sizes = [16, 128], strides = [1, 1]} : vector<18x128xf32> to vector<16x128xf32>
    %c7_221 = arith.constant 7 : index
    %c0_222 = arith.constant 0 : index
    %c0_223 = arith.constant 0 : index
    %277 = vector.load %arg3[%c7_221, %c0_222, %c0_223] : memref<9x128x128xf32, #tpu.memory_space<vmem>>, vector<1x128x128xf32>
    %278 = vector.shape_cast %277 : vector<1x128x128xf32> to vector<128x128xf32>
    %cst_224 = arith.constant dense<0.000000e+00> : vector<16x128xf32>
    %279 = tpu.matmul %276, %278, %cst_224 {dimension_numbers = #tpu.dot_dimension_numbers<[1], [0], [0], [1], [0, 0, 1, 1], [], []>} : vector<16x128xf32>, vector<128x128xf32>, vector<16x128xf32> -> vector<16x128xf32>
    %280 = arith.addf %275, %279 : vector<16x128xf32>
    %281 = vector.extract_strided_slice %270 {offsets = [2, 0], sizes = [16, 128], strides = [1, 1]} : vector<18x128xf32> to vector<16x128xf32>
    %c8_225 = arith.constant 8 : index
    %c0_226 = arith.constant 0 : index
    %c0_227 = arith.constant 0 : index
    %282 = vector.load %arg3[%c8_225, %c0_226, %c0_227] : memref<9x128x128xf32, #tpu.memory_space<vmem>>, vector<1x128x128xf32>
    %283 = vector.shape_cast %282 : vector<1x128x128xf32> to vector<128x128xf32>
    %cst_228 = arith.constant dense<0.000000e+00> : vector<16x128xf32>
    %284 = tpu.matmul %281, %283, %cst_228 {dimension_numbers = #tpu.dot_dimension_numbers<[1], [0], [0], [1], [0, 0, 1, 1], [], []>} : vector<16x128xf32>, vector<128x128xf32>, vector<16x128xf32> -> vector<16x128xf32>
    %285 = arith.addf %280, %284 : vector<16x128xf32>
    %286 = vector.broadcast %0 : vector<1x128xf32> to vector<16x128xf32>
    %287 = arith.addf %285, %286 : vector<16x128xf32>
    %cst_229 = arith.constant 0.000000e+00 : f32
    %288 = vector.broadcast %cst_229 : f32 to vector<16x128xf32>
    %289 = arith.maximumf %287, %288 : vector<16x128xf32>
    %c0_230 = arith.constant 0 : index
    %c3_231 = arith.constant 3 : index
    %c0_232 = arith.constant 0 : index
    %c0_233 = arith.constant 0 : index
    %290 = vector.load %arg5[%c0_230, %c3_231, %c0_232, %c0_233] : memref<1x4x16x128xf32, #tpu.memory_space<vmem>>, vector<1x1x16x128xf32>
    %291 = vector.shape_cast %290 : vector<1x1x16x128xf32> to vector<16x128xf32>
    %292 = vector.shape_cast %289 : vector<16x128xf32> to vector<1x1x16x128xf32>
    tpu.vector_store %arg5[%c0_230, %c3_231, %c0_232, %c0_233], %292 {strides = array<i32>} : memref<1x4x16x128xf32, #tpu.memory_space<vmem>>, vector<1x1x16x128xf32>,
    return
  }
  func.func @transform_0(%arg0: i32, %arg1: i32) -> (i32, i32, i32, i32) {
    %c0_i32 = arith.constant 0 : i32
    %c0_i32_0 = arith.constant 0 : i32
    %c0_i32_1 = arith.constant 0 : i32
    %c0_i32_2 = arith.constant 0 : i32
    return %arg0, %c0_i32, %c0_i32_0, %c0_i32_1 : i32, i32, i32, i32
  }
  func.func @transform_1(%arg0: i32, %arg1: i32) -> (i32, i32, i32) {
    %c0_i32 = arith.constant 0 : i32
    %c0_i32_0 = arith.constant 0 : i32
    %c0_i32_1 = arith.constant 0 : i32
    %c0_i32_2 = arith.constant 0 : i32
    return %c0_i32, %c0_i32_0, %c0_i32_1 : i32, i32, i32
  }
  func.func @transform_2(%arg0: i32, %arg1: i32) -> (i32, i32) {
    %c0_i32 = arith.constant 0 : i32
    %c0_i32_0 = arith.constant 0 : i32
    %c0_i32_1 = arith.constant 0 : i32
    return %c0_i32, %c0_i32_0 : i32, i32
  }
  func.func @transform_3(%arg0: i32, %arg1: i32) -> (i32, i32, i32, i32) {
    %c0_i32 = arith.constant 0 : i32
    %c0_i32_0 = arith.constant 0 : i32
    %c0_i32_1 = arith.constant 0 : i32
    return %arg0, %arg1, %c0_i32, %c0_i32_0 : i32, i32, i32, i32
  }
}

module attributes {stable_mosaic.version = 11 : i64} {
  func.func @kernel(%arg0: i32, %arg1: i32, %arg2: memref<1x16x8x128xf32, #tpu.memory_space<vmem>>, %arg3: memref<1x16x8x128xf32, #tpu.memory_space<vmem>>, %arg4: memref<9x128x128xf32, #tpu.memory_space<vmem>>, %arg5: memref<1x128xf32, #tpu.memory_space<vmem>>, %arg6: memref<1x1x7x128xf32, #tpu.memory_space<vmem>>) attributes {dimension_semantics = [#tpu.dimension_semantics<parallel>, #tpu.dimension_semantics<parallel>], iteration_bounds = array<i64: 2, 7>, scalar_prefetch = 0 : i64, scratch_operands = 0 : i64, tpu.core_type = #tpu.core_type<tc>, window_params = [{transform_indices = @transform_0, window_bounds = array<i64: 1, 16, 8, 128>}, {transform_indices = @transform_1, window_bounds = array<i64: 1, 16, 8, 128>}, {pipeline_mode = #tpu.pipeline_mode<synchronous>, transform_indices = @transform_2, window_bounds = array<i64: 9, 128, 128>}, {pipeline_mode = #tpu.pipeline_mode<synchronous>, transform_indices = @transform_3, window_bounds = array<i64: 1, 128>}, {transform_indices = @transform_4, window_bounds = array<i64: 1, 1, 7, 128>}]} {
    %c0 = arith.constant 0 : index
    %c0_0 = arith.constant 0 : index
    %0 = vector.load %arg5[%c0, %c0_0] : memref<1x128xf32, #tpu.memory_space<vmem>>, vector<1x128xf32>
    %c1_i32 = arith.constant 1 : i32
    %1 = arith.muli %arg1, %c1_i32 : i32
    %c0_i32 = arith.constant 0 : i32
    %2 = arith.addi %1, %c0_i32 : i32
    %cst = arith.constant 0.000000e+00 : f32
    %3 = vector.broadcast %cst : f32 to vector<7x128xf32>
    %c2_i32 = arith.constant 2 : i32
    %4 = arith.muli %c2_i32, %2 : i32
    %c0_i32_1 = arith.constant 0 : i32
    %5 = arith.addi %4, %c0_i32_1 : i32
    %c15_i32 = arith.constant 15 : i32
    %6 = arith.minsi %5, %c15_i32 : i32
    %c0_2 = arith.constant 0 : index
    %7 = arith.index_cast %6 : i32 to index
    %c0_3 = arith.constant 0 : index
    %c0_4 = arith.constant 0 : index
    %8 = vector.load %arg2[%c0_2, %7, %c0_3, %c0_4] : memref<1x16x8x128xf32, #tpu.memory_space<vmem>>, vector<1x1x8x128xf32>
    %9 = vector.shape_cast %8 : vector<1x1x8x128xf32> to vector<8x128xf32>
    %c0_5 = arith.constant 0 : index
    %10 = arith.index_cast %6 : i32 to index
    %c0_6 = arith.constant 0 : index
    %c0_7 = arith.constant 0 : index
    %11 = vector.load %arg3[%c0_5, %10, %c0_6, %c0_7] : memref<1x16x8x128xf32, #tpu.memory_space<vmem>>, vector<1x1x8x128xf32>
    %12 = vector.shape_cast %11 : vector<1x1x8x128xf32> to vector<8x128xf32>
    %13 = vector.extract_strided_slice %9 {offsets = [0, 0], sizes = [7, 128], strides = [1, 1]} : vector<8x128xf32> to vector<7x128xf32>
    %c0_8 = arith.constant 0 : index
    %c0_9 = arith.constant 0 : index
    %c0_10 = arith.constant 0 : index
    %14 = vector.load %arg4[%c0_8, %c0_9, %c0_10] : memref<9x128x128xf32, #tpu.memory_space<vmem>>, vector<1x128x128xf32>
    %15 = vector.shape_cast %14 : vector<1x128x128xf32> to vector<128x128xf32>
    %cst_11 = arith.constant dense<0.000000e+00> : vector<7x128xf32>
    %16 = tpu.matmul %13, %15, %cst_11 {dimension_numbers = #tpu.dot_dimension_numbers<[1], [0], [0], [1], [0, 0, 1, 1], [], []>} : vector<7x128xf32>, vector<128x128xf32>, vector<7x128xf32> -> vector<7x128xf32>
    %17 = arith.addf %3, %16 : vector<7x128xf32>
    %18 = vector.extract_strided_slice %12 {offsets = [0, 0], sizes = [7, 128], strides = [1, 1]} : vector<8x128xf32> to vector<7x128xf32>
    %c1 = arith.constant 1 : index
    %c0_12 = arith.constant 0 : index
    %c0_13 = arith.constant 0 : index
    %19 = vector.load %arg4[%c1, %c0_12, %c0_13] : memref<9x128x128xf32, #tpu.memory_space<vmem>>, vector<1x128x128xf32>
    %20 = vector.shape_cast %19 : vector<1x128x128xf32> to vector<128x128xf32>
    %cst_14 = arith.constant dense<0.000000e+00> : vector<7x128xf32>
    %21 = tpu.matmul %18, %20, %cst_14 {dimension_numbers = #tpu.dot_dimension_numbers<[1], [0], [0], [1], [0, 0, 1, 1], [], []>} : vector<7x128xf32>, vector<128x128xf32>, vector<7x128xf32> -> vector<7x128xf32>
    %22 = arith.addf %17, %21 : vector<7x128xf32>
    %23 = vector.extract_strided_slice %9 {offsets = [1, 0], sizes = [7, 128], strides = [1, 1]} : vector<8x128xf32> to vector<7x128xf32>
    %c2 = arith.constant 2 : index
    %c0_15 = arith.constant 0 : index
    %c0_16 = arith.constant 0 : index
    %24 = vector.load %arg4[%c2, %c0_15, %c0_16] : memref<9x128x128xf32, #tpu.memory_space<vmem>>, vector<1x128x128xf32>
    %25 = vector.shape_cast %24 : vector<1x128x128xf32> to vector<128x128xf32>
    %cst_17 = arith.constant dense<0.000000e+00> : vector<7x128xf32>
    %26 = tpu.matmul %23, %25, %cst_17 {dimension_numbers = #tpu.dot_dimension_numbers<[1], [0], [0], [1], [0, 0, 1, 1], [], []>} : vector<7x128xf32>, vector<128x128xf32>, vector<7x128xf32> -> vector<7x128xf32>
    %27 = arith.addf %22, %26 : vector<7x128xf32>
    %c2_i32_18 = arith.constant 2 : i32
    %28 = arith.muli %c2_i32_18, %2 : i32
    %c1_i32_19 = arith.constant 1 : i32
    %29 = arith.addi %28, %c1_i32_19 : i32
    %c15_i32_20 = arith.constant 15 : i32
    %30 = arith.minsi %29, %c15_i32_20 : i32
    %c0_21 = arith.constant 0 : index
    %31 = arith.index_cast %30 : i32 to index
    %c0_22 = arith.constant 0 : index
    %c0_23 = arith.constant 0 : index
    %32 = vector.load %arg2[%c0_21, %31, %c0_22, %c0_23] : memref<1x16x8x128xf32, #tpu.memory_space<vmem>>, vector<1x1x8x128xf32>
    %33 = vector.shape_cast %32 : vector<1x1x8x128xf32> to vector<8x128xf32>
    %c0_24 = arith.constant 0 : index
    %34 = arith.index_cast %30 : i32 to index
    %c0_25 = arith.constant 0 : index
    %c0_26 = arith.constant 0 : index
    %35 = vector.load %arg3[%c0_24, %34, %c0_25, %c0_26] : memref<1x16x8x128xf32, #tpu.memory_space<vmem>>, vector<1x1x8x128xf32>
    %36 = vector.shape_cast %35 : vector<1x1x8x128xf32> to vector<8x128xf32>
    %37 = vector.extract_strided_slice %33 {offsets = [0, 0], sizes = [7, 128], strides = [1, 1]} : vector<8x128xf32> to vector<7x128xf32>
    %c3 = arith.constant 3 : index
    %c0_27 = arith.constant 0 : index
    %c0_28 = arith.constant 0 : index
    %38 = vector.load %arg4[%c3, %c0_27, %c0_28] : memref<9x128x128xf32, #tpu.memory_space<vmem>>, vector<1x128x128xf32>
    %39 = vector.shape_cast %38 : vector<1x128x128xf32> to vector<128x128xf32>
    %cst_29 = arith.constant dense<0.000000e+00> : vector<7x128xf32>
    %40 = tpu.matmul %37, %39, %cst_29 {dimension_numbers = #tpu.dot_dimension_numbers<[1], [0], [0], [1], [0, 0, 1, 1], [], []>} : vector<7x128xf32>, vector<128x128xf32>, vector<7x128xf32> -> vector<7x128xf32>
    %41 = arith.addf %27, %40 : vector<7x128xf32>
    %42 = vector.extract_strided_slice %36 {offsets = [0, 0], sizes = [7, 128], strides = [1, 1]} : vector<8x128xf32> to vector<7x128xf32>
    %c4 = arith.constant 4 : index
    %c0_30 = arith.constant 0 : index
    %c0_31 = arith.constant 0 : index
    %43 = vector.load %arg4[%c4, %c0_30, %c0_31] : memref<9x128x128xf32, #tpu.memory_space<vmem>>, vector<1x128x128xf32>
    %44 = vector.shape_cast %43 : vector<1x128x128xf32> to vector<128x128xf32>
    %cst_32 = arith.constant dense<0.000000e+00> : vector<7x128xf32>
    %45 = tpu.matmul %42, %44, %cst_32 {dimension_numbers = #tpu.dot_dimension_numbers<[1], [0], [0], [1], [0, 0, 1, 1], [], []>} : vector<7x128xf32>, vector<128x128xf32>, vector<7x128xf32> -> vector<7x128xf32>
    %46 = arith.addf %41, %45 : vector<7x128xf32>
    %47 = vector.extract_strided_slice %33 {offsets = [1, 0], sizes = [7, 128], strides = [1, 1]} : vector<8x128xf32> to vector<7x128xf32>
    %c5 = arith.constant 5 : index
    %c0_33 = arith.constant 0 : index
    %c0_34 = arith.constant 0 : index
    %48 = vector.load %arg4[%c5, %c0_33, %c0_34] : memref<9x128x128xf32, #tpu.memory_space<vmem>>, vector<1x128x128xf32>
    %49 = vector.shape_cast %48 : vector<1x128x128xf32> to vector<128x128xf32>
    %cst_35 = arith.constant dense<0.000000e+00> : vector<7x128xf32>
    %50 = tpu.matmul %47, %49, %cst_35 {dimension_numbers = #tpu.dot_dimension_numbers<[1], [0], [0], [1], [0, 0, 1, 1], [], []>} : vector<7x128xf32>, vector<128x128xf32>, vector<7x128xf32> -> vector<7x128xf32>
    %51 = arith.addf %46, %50 : vector<7x128xf32>
    %c2_i32_36 = arith.constant 2 : i32
    %52 = arith.muli %c2_i32_36, %2 : i32
    %c2_i32_37 = arith.constant 2 : i32
    %53 = arith.addi %52, %c2_i32_37 : i32
    %c15_i32_38 = arith.constant 15 : i32
    %54 = arith.minsi %53, %c15_i32_38 : i32
    %c0_39 = arith.constant 0 : index
    %55 = arith.index_cast %54 : i32 to index
    %c0_40 = arith.constant 0 : index
    %c0_41 = arith.constant 0 : index
    %56 = vector.load %arg2[%c0_39, %55, %c0_40, %c0_41] : memref<1x16x8x128xf32, #tpu.memory_space<vmem>>, vector<1x1x8x128xf32>
    %57 = vector.shape_cast %56 : vector<1x1x8x128xf32> to vector<8x128xf32>
    %c0_42 = arith.constant 0 : index
    %58 = arith.index_cast %54 : i32 to index
    %c0_43 = arith.constant 0 : index
    %c0_44 = arith.constant 0 : index
    %59 = vector.load %arg3[%c0_42, %58, %c0_43, %c0_44] : memref<1x16x8x128xf32, #tpu.memory_space<vmem>>, vector<1x1x8x128xf32>
    %60 = vector.shape_cast %59 : vector<1x1x8x128xf32> to vector<8x128xf32>
    %61 = vector.extract_strided_slice %57 {offsets = [0, 0], sizes = [7, 128], strides = [1, 1]} : vector<8x128xf32> to vector<7x128xf32>
    %c6 = arith.constant 6 : index
    %c0_45 = arith.constant 0 : index
    %c0_46 = arith.constant 0 : index
    %62 = vector.load %arg4[%c6, %c0_45, %c0_46] : memref<9x128x128xf32, #tpu.memory_space<vmem>>, vector<1x128x128xf32>
    %63 = vector.shape_cast %62 : vector<1x128x128xf32> to vector<128x128xf32>
    %cst_47 = arith.constant dense<0.000000e+00> : vector<7x128xf32>
    %64 = tpu.matmul %61, %63, %cst_47 {dimension_numbers = #tpu.dot_dimension_numbers<[1], [0], [0], [1], [0, 0, 1, 1], [], []>} : vector<7x128xf32>, vector<128x128xf32>, vector<7x128xf32> -> vector<7x128xf32>
    %65 = arith.addf %51, %64 : vector<7x128xf32>
    %66 = vector.extract_strided_slice %60 {offsets = [0, 0], sizes = [7, 128], strides = [1, 1]} : vector<8x128xf32> to vector<7x128xf32>
    %c7 = arith.constant 7 : index
    %c0_48 = arith.constant 0 : index
    %c0_49 = arith.constant 0 : index
    %67 = vector.load %arg4[%c7, %c0_48, %c0_49] : memref<9x128x128xf32, #tpu.memory_space<vmem>>, vector<1x128x128xf32>
    %68 = vector.shape_cast %67 : vector<1x128x128xf32> to vector<128x128xf32>
    %cst_50 = arith.constant dense<0.000000e+00> : vector<7x128xf32>
    %69 = tpu.matmul %66, %68, %cst_50 {dimension_numbers = #tpu.dot_dimension_numbers<[1], [0], [0], [1], [0, 0, 1, 1], [], []>} : vector<7x128xf32>, vector<128x128xf32>, vector<7x128xf32> -> vector<7x128xf32>
    %70 = arith.addf %65, %69 : vector<7x128xf32>
    %71 = vector.extract_strided_slice %57 {offsets = [1, 0], sizes = [7, 128], strides = [1, 1]} : vector<8x128xf32> to vector<7x128xf32>
    %c8 = arith.constant 8 : index
    %c0_51 = arith.constant 0 : index
    %c0_52 = arith.constant 0 : index
    %72 = vector.load %arg4[%c8, %c0_51, %c0_52] : memref<9x128x128xf32, #tpu.memory_space<vmem>>, vector<1x128x128xf32>
    %73 = vector.shape_cast %72 : vector<1x128x128xf32> to vector<128x128xf32>
    %cst_53 = arith.constant dense<0.000000e+00> : vector<7x128xf32>
    %74 = tpu.matmul %71, %73, %cst_53 {dimension_numbers = #tpu.dot_dimension_numbers<[1], [0], [0], [1], [0, 0, 1, 1], [], []>} : vector<7x128xf32>, vector<128x128xf32>, vector<7x128xf32> -> vector<7x128xf32>
    %75 = arith.addf %70, %74 : vector<7x128xf32>
    %76 = vector.broadcast %0 : vector<1x128xf32> to vector<7x128xf32>
    %77 = arith.addf %75, %76 : vector<7x128xf32>
    %cst_54 = arith.constant 0.000000e+00 : f32
    %78 = vector.broadcast %cst_54 : f32 to vector<7x128xf32>
    %79 = arith.maximumf %77, %78 : vector<7x128xf32>
    %c0_55 = arith.constant 0 : index
    %c0_56 = arith.constant 0 : index
    %c0_57 = arith.constant 0 : index
    %c0_58 = arith.constant 0 : index
    %80 = vector.load %arg6[%c0_55, %c0_56, %c0_57, %c0_58] : memref<1x1x7x128xf32, #tpu.memory_space<vmem>>, vector<1x1x7x128xf32>
    %81 = vector.shape_cast %80 : vector<1x1x7x128xf32> to vector<7x128xf32>
    %82 = vector.shape_cast %79 : vector<7x128xf32> to vector<1x1x7x128xf32>
    tpu.vector_store %arg6[%c0_55, %c0_56, %c0_57, %c0_58], %82 {strides = array<i32>} : memref<1x1x7x128xf32, #tpu.memory_space<vmem>>, vector<1x1x7x128xf32>,
    return
  }
  func.func @transform_0(%arg0: i32, %arg1: i32) -> (i32, i32, i32, i32) {
    %c0_i32 = arith.constant 0 : i32
    %c0_i32_0 = arith.constant 0 : i32
    %c0_i32_1 = arith.constant 0 : i32
    %c0_i32_2 = arith.constant 0 : i32
    return %arg0, %c0_i32, %c0_i32_0, %c0_i32_1 : i32, i32, i32, i32
  }
  func.func @transform_1(%arg0: i32, %arg1: i32) -> (i32, i32, i32, i32) {
    %c0_i32 = arith.constant 0 : i32
    %c0_i32_0 = arith.constant 0 : i32
    %c0_i32_1 = arith.constant 0 : i32
    %c0_i32_2 = arith.constant 0 : i32
    return %arg0, %c0_i32, %c0_i32_0, %c0_i32_1 : i32, i32, i32, i32
  }
  func.func @transform_2(%arg0: i32, %arg1: i32) -> (i32, i32, i32) {
    %c0_i32 = arith.constant 0 : i32
    %c0_i32_0 = arith.constant 0 : i32
    %c0_i32_1 = arith.constant 0 : i32
    %c0_i32_2 = arith.constant 0 : i32
    return %c0_i32, %c0_i32_0, %c0_i32_1 : i32, i32, i32
  }
  func.func @transform_3(%arg0: i32, %arg1: i32) -> (i32, i32) {
    %c0_i32 = arith.constant 0 : i32
    %c0_i32_0 = arith.constant 0 : i32
    %c0_i32_1 = arith.constant 0 : i32
    return %c0_i32, %c0_i32_0 : i32, i32
  }
  func.func @transform_4(%arg0: i32, %arg1: i32) -> (i32, i32, i32, i32) {
    %c0_i32 = arith.constant 0 : i32
    %c0_i32_0 = arith.constant 0 : i32
    %c0_i32_1 = arith.constant 0 : i32
    return %arg0, %arg1, %c0_i32, %c0_i32_0 : i32, i32, i32, i32
  }
}

</mosaic_0001>

<bundles_post_ra>
// kernel: _lambda_.5
= control target key start
LH: loop header
LB: loop body
LE: loop exit
PB: predicated region body
PF: predicated region fallthrough
CT: control target
= control target key end

     0   :  { %s142_s0 = inlined_call_operand.vmem [shape: f32[9,16,128], index: 0, kind: input, shape index: {}]   ;;  %s143_s1 = inlined_call_operand.vmem [shape: f32[16,128], index: 1, kind: output, shape index: {}]  }
   0x1   :  { %v8_v0 = vld [vmem:[%s142_s0] sm:$0xff]  ;;  %v56_v1 = vld [vmem:[%s142_s0 + $0x10] sm:$0xff]  ;;  %v9_v6 = vld [vmem:[%s142_s0 + $0x8] sm:$0xff] }
   0x2   :  { %v58_v2 = vld [vmem:[%s142_s0 + $0x20] sm:$0xff]  ;;  %v13_v3 = vmax.f32 %v8_v0, %v56_v1  ;;  %v60_v4 = vld [vmem:[%s142_s0 + $0x30] sm:$0xff]  ;;  %v57_v7 = vld [vmem:[%s142_s0 + $0x18] sm:$0xff] }
   0x3   :  { %v59_v8 = vld [vmem:[%s142_s0 + $0x28] sm:$0xff]  ;;  %v62_v9 = vld [vmem:[%s142_s0 + $0x40] sm:$0xff]  ;;  %v14_v10 = vmax.f32 %v9_v6, %v57_v7  ;;  %v61_v12 = vld [vmem:[%s142_s0 + $0x38] sm:$0xff] }
   0x4   :  { %v18_v5 = vmax.f32 %v13_v3, %v58_v2  ;;  %v64_v13 = vld [vmem:[%s142_s0 + $0x50] sm:$0xff]  ;;  %v63_v16 = vld [vmem:[%s142_s0 + $0x48] sm:$0xff]  ;;  %v66_v17 = vld [vmem:[%s142_s0 + $0x60] sm:$0xff] }
   0x5   :  { %v19_v14 = vmax.f32 %v14_v10, %v59_v8  ;;  %v65_v20 = vld [vmem:[%s142_s0 + $0x58] sm:$0xff]  ;;  %v68_v21 = vld [vmem:[%s142_s0 + $0x70] sm:$0xff]  ;;  %v67_v24 = vld [vmem:[%s142_s0 + $0x68] sm:$0xff] }
   0x6   :  { %v23_v11 = vmax.f32 %v18_v5, %v60_v4  ;;  %v70_v25 = vld [vmem:[%s142_s0 + $0x80] sm:$0xff]  ;;  %v69_v28 = vld [vmem:[%s142_s0 + $0x78] sm:$0xff]  ;;  %v71_v31 = vld [vmem:[%s142_s0 + $0x88] sm:$0xff] }
   0x7   :  { %v24_v18 = vmax.f32 %v19_v14, %v61_v12 }
   0x8   :  { %v28_v15 = vmax.f32 %v23_v11, %v62_v9 }
   0x9   :  { %v29_v22 = vmax.f32 %v24_v18, %v63_v16 }
   0xa   :  { %v33_v19 = vmax.f32 %v28_v15, %v64_v13 }
   0xb   :  { %v34_v26 = vmax.f32 %v29_v22, %v65_v20 }
   0xc   :  { %v38_v23 = vmax.f32 %v33_v19, %v66_v17 }
   0xd   :  { %v39_v29 = vmax.f32 %v34_v26, %v67_v24 }
   0xe   :  { %v43_v27 = vmax.f32 %v38_v23, %v68_v21 }
   0xf   :  { %v44_v32 = vmax.f32 %v39_v29, %v69_v28 }
  0x10   :  { %v48_v30 = vmax.f32 %v43_v27, %v70_v25 }
  0x11   :  { %v49_v33 = vmax.f32 %v44_v32, %v71_v31 }
  0x12   :  { %50 = vst [vmem:[%s143_s1] sm:$0xff] %v48_v30 }
  0x13   :  { %51 = vst [vmem:[%s143_s1 + $0x8] sm:$0xff] %v49_v33 }

// kernel: _lambda_.7
= control target key start
LH: loop header
LB: loop body
LE: loop exit
PB: predicated region body
PF: predicated region fallthrough
CT: control target
= control target key end

     0   :  { %s826_s12 = smov 0   ;;  %s990_s0 = inlined_call_operand.vmem [shape: f32[512,4], index: 0, kind: input, shape index: {}]   ;;  %s991_s1 = inlined_call_operand.vmem [shape: f32[4,128], index: 1, kind: input, shape index: {}]   ;;  %s992_s2 = inlined_call_operand.vmem [shape: f32[1,128], index: 2, kind: input, shape index: {}]   ;;  %s993_s3 = inlined_call_operand.vmem [shape: f32[512,128], index: 3, kind: output, shape index: {}]  }
   0x1 LB: > { %s660_s13 = sadd.s32 4294967295, %s804_s12   ;;  %p664_p0 = scmp.ge.s32.totalorder %s804_s12, 1  ;;  %s804_s12 = sphi %s826_s12, %s13_s12  }
   0x2   : > { %p138_p1 = scmp.lt.s32.totalorder %s804_s12, 3 }
   0x4   : > { %p139_p2 = pnand %p664_p0, %p138_p1 }
   0x5   : > { %v206_v0 = vld [vmem:[%s991_s1] sm:$0xf] (!%p139_p2)  ;;  %vm311_vm0 = vcmask (!%p139_p2), 1043456   ;;  %s665_s16 = sshll.u32 (!%p139_p2), %s660_s13, 5  ;;  %vm214_vm1 = vcmask (!%p139_p2), 31744  }
   0x6   : > { %142 = sbr.rel (%p139_p2) target bundleno = 265 (0x109), region = 32  ;;  %738 = vmatprep.subr.msk.mxu0 (!%p139_p2), %vm311_vm0, %v206_v0  ;;  %788 = vmatprep.subr.msk.mxu1 (!%p139_p2), %vm311_vm0, %v206_v0  ;;  %p163_p3 = scmp.lt.s32.totalorder (!%p139_p2), %s665_s16, 63  ;;  %v914_v33 = vld [vmem:[%s992_s2] ss:$0 sm:$0xff] (!%p139_p2) }
   0x7   : > { %739 = vmatpush3.msk.msra.mxu0 (!%p139_p2), %vm311_vm0, %v206_v0  ;;  %789 = vmatpush3.msk.msra.mxu1 (!%p139_p2), %vm311_vm0, %v206_v0 }
   0xd   : > { %s995_s16 = smov (!%p163_p3, %s665_s16), 63 }
   0xe   : > { %s666_s17 = sshll.u32 %s995_s16, 3 }
   0xf   : > { %s845_s20 = scalar_lea.vmem %s990_s0, %s666_s17  ;;  %s923_s25 = scalar_lea.vmem %s993_s3, %s666_s17 }
  0x10   : > { %v174_v1 = vld [vmem:[%s845_s20] sm:$0xff]  ;;  %v175_v3 = vld [vmem:[%s845_s20 + $0x8] sm:$0xff]  ;;  %v176_v5 = vld [vmem:[%s845_s20 + $0x10] sm:$0xff] }
  0x11   : > { %v190_v2 = vld [vmem:[%s845_s20 + $0x80] sm:$0xff]  ;;  %740 = vmatprep.mubr.msk.f32.mxu0 %vm214_vm1, %v174_v1  ;;  %v191_v4 = vld [vmem:[%s845_s20 + $0x88] sm:$0xff]  ;;  %v192_v6 = vld [vmem:[%s845_s20 + $0x90] sm:$0xff] }
  0x12   : > { %764 = vmatprep.mubr.msk.f32.mxu1 %vm214_vm1, %v190_v2  ;;  %741 = vmatmul.mubr.msk.f32.vlgmr.msra.gmra.mrb[0].mxu0 %vm214_vm1, %v175_v3  ;;  %v177_v7 = vld [vmem:[%s845_s20 + $0x18] sm:$0xff]  ;;  %v178_v9 = vld [vmem:[%s845_s20 + $0x20] sm:$0xff]  ;;  %v179_v11 = vld [vmem:[%s845_s20 + $0x28] sm:$0xff] }
  0x13   : > { %765 = vmatmul.mubr.msk.f32.vlgmr.msra.gmra.mrb[0].mxu1 %vm214_vm1, %v191_v4  ;;  %743 = vmatprep.mubr.msk.f32.mxu0 %vm214_vm1, %v176_v5  ;;  %v193_v8 = vld [vmem:[%s845_s20 + $0x98] sm:$0xff]  ;;  %v194_v10 = vld [vmem:[%s845_s20 + $0xa0] sm:$0xff]  ;;  %v195_v12 = vld [vmem:[%s845_s20 + $0xa8] sm:$0xff] }
  0x14   : > { %767 = vmatprep.mubr.msk.f32.mxu1 %vm214_vm1, %v192_v6  ;;  %v180_v13 = vld [vmem:[%s845_s20 + $0x30] sm:$0xff]  ;;  %v181_v15 = vld [vmem:[%s845_s20 + $0x38] sm:$0xff]  ;;  %v182_v17 = vld [vmem:[%s845_s20 + $0x40] sm:$0xff] }
  0x15   : > { %v196_v14 = vld [vmem:[%s845_s20 + $0xb0] sm:$0xff]  ;;  %v197_v16 = vld [vmem:[%s845_s20 + $0xb8] sm:$0xff]  ;;  %v198_v18 = vld [vmem:[%s845_s20 + $0xc0] sm:$0xff] }
  0x16   : > { %744 = vmatmul.mubr.msk.f32.gmra.mrb[2].mxu0 %vm214_vm1, %v177_v7  ;;  %v183_v19 = vld [vmem:[%s845_s20 + $0x48] sm:$0xff]  ;;  %v184_v21 = vld [vmem:[%s845_s20 + $0x50] sm:$0xff]  ;;  %v185_v23 = vld [vmem:[%s845_s20 + $0x58] sm:$0xff] }
  0x17   : > { %768 = vmatmul.mubr.msk.f32.gmra.mrb[2].mxu1 %vm214_vm1, %v193_v8  ;;  %746 = vmatprep.mubr.msk.f32.mxu0 %vm214_vm1, %v178_v9  ;;  %v199_v20 = vld [vmem:[%s845_s20 + $0xc8] sm:$0xff]  ;;  %v200_v22 = vld [vmem:[%s845_s20 + $0xd0] sm:$0xff]  ;;  %v201_v24 = vld [vmem:[%s845_s20 + $0xd8] sm:$0xff] }
  0x18   : > { %770 = vmatprep.mubr.msk.f32.mxu1 %vm214_vm1, %v194_v10  ;;  %v186_v25 = vld [vmem:[%s845_s20 + $0x60] sm:$0xff]  ;;  %v187_v27 = vld [vmem:[%s845_s20 + $0x68] sm:$0xff]  ;;  %v188_v29 = vld [vmem:[%s845_s20 + $0x70] sm:$0xff] }
  0x19   : > { %v202_v26 = vld [vmem:[%s845_s20 + $0xe0] sm:$0xff]  ;;  %v203_v28 = vld [vmem:[%s845_s20 + $0xe8] sm:$0xff]  ;;  %v204_v30 = vld [vmem:[%s845_s20 + $0xf0] sm:$0xff] }
  0x1a   : > { %747 = vmatmul.mubr.msk.f32.gmra.mrb[4].mxu0 %vm214_vm1, %v179_v11  ;;  %v189_v31 = vld [vmem:[%s845_s20 + $0x78] sm:$0xff] }
  0x1b   : > { %771 = vmatmul.mubr.msk.f32.gmra.mrb[4].mxu1 %vm214_vm1, %v195_v12  ;;  %749 = vmatprep.mubr.msk.f32.mxu0 %vm214_vm1, %v180_v13  ;;  %v205_v32 = vld [vmem:[%s845_s20 + $0xf8] sm:$0xff] }
  0x1c   : > { %773 = vmatprep.mubr.msk.f32.mxu1 %vm214_vm1, %v196_v14 }
  0x1e   : > { %750 = vmatmul.mubr.msk.f32.gmra.mrb[6].mxu0 %vm214_vm1, %v181_v15 }
  0x1f   : > { %774 = vmatmul.mubr.msk.f32.gmra.mrb[6].mxu1 %vm214_vm1, %v197_v16  ;;  %752 = vmatprep.mubr.msk.f32.mxu0 %vm214_vm1, %v182_v17 }
  0x20   : > { %776 = vmatprep.mubr.msk.f32.mxu1 %vm214_vm1, %v198_v18 }
  0x22   : > { %753 = vmatmul.mubr.msk.f32.gmra.mrb[8].mxu0 %vm214_vm1, %v183_v19 }
  0x23   : > { %777 = vmatmul.mubr.msk.f32.gmra.mrb[8].mxu1 %vm214_vm1, %v199_v20  ;;  %755 = vmatprep.mubr.msk.f32.mxu0 %vm214_vm1, %v184_v21 }
  0x24   : > { %779 = vmatprep.mubr.msk.f32.mxu1 %vm214_vm1, %v200_v22 }
  0x26   : > { %756 = vmatmul.mubr.msk.f32.gmra.mrb[10].mxu0 %vm214_vm1, %v185_v23 }
  0x27   : > { %780 = vmatmul.mubr.msk.f32.gmra.mrb[10].mxu1 %vm214_vm1, %v201_v24  ;;  %758 = vmatprep.mubr.msk.f32.mxu0 %vm214_vm1, %v186_v25 }
  0x28   : > { %782 = vmatprep.mubr.msk.f32.mxu1 %vm214_vm1, %v202_v26 }
  0x2a   : > { %759 = vmatmul.mubr.msk.f32.gmra.mrb[12].mxu0 %vm214_vm1, %v187_v27 }
  0x2b   : > { %783 = vmatmul.mubr.msk.f32.gmra.mrb[12].mxu1 %vm214_vm1, %v203_v28  ;;  %761 = vmatprep.mubr.msk.f32.mxu0 %vm214_vm1, %v188_v29 }
  0x2c   : > { %785 = vmatprep.mubr.msk.f32.mxu1 %vm214_vm1, %v204_v30 }
  0x2e   : > { %762 = vmatmul.mubr.msk.f32.gmra.mrb[14].mxu0 %vm214_vm1, %v189_v31 }
  0x2f   : > { %786 = vmatmul.mubr.msk.f32.gmra.mrb[14].mxu1 %vm214_vm1, %v205_v32 }
  0xe5   : > { %v742_v34 = vpop.f32.mrb[0].mxu0 }
  0xe6   : > { %v766_v35 = vpop.f32.mrb[0].mxu1  ;;  %v387_v36 = vadd.f32 %v742_v34, %v914_v33  ;;  %v381_v38 = vpop.f32.mrb[1].mxu0 }
  0xe7   : > { %v467_v37 = vadd.f32 %v766_v35, %v914_v33  ;;  %v461_v39 = vpop.f32.mrb[1].mxu1  ;;  %v382_v40 = vadd.f32 %v914_v33, %v381_v38 }
  0xe8   : > { %v462_v41 = vadd.f32 %v914_v33, %v461_v39  ;;  %v541_v42 = vmax.f32 %v387_v36, 0.0 }
  0xe9   : > { %v557_v43 = vmax.f32 %v467_v37, 0.0  ;;  %v540_v44 = vmax.f32 %v382_v40, 0.0  ;;  %v745_v46 = vpop.f32.mrb[2].mxu0 }
  0xea   : > { %v556_v45 = vmax.f32 %v462_v41, 0.0  ;;  %v769_v47 = vpop.f32.mrb[2].mxu1  ;;  %573 = vst [vmem:[%s923_s25 + $0x8] sm:$0xff] %v541_v42  ;;  %v397_v48 = vadd.f32 %v745_v46, %v914_v33  ;;  %v391_v50 = vpop.f32.mrb[3].mxu0 }
  0xeb   : > { %589 = vst [vmem:[%s923_s25 + $0x88] sm:$0xff] %v557_v43  ;;  %v477_v49 = vadd.f32 %v769_v47, %v914_v33  ;;  %v471_v51 = vpop.f32.mrb[3].mxu1  ;;  %572 = vst [vmem:[%s923_s25] sm:$0xff] %v540_v44  ;;  %v392_v52 = vadd.f32 %v914_v33, %v391_v50 }
  0xec   : > { %588 = vst [vmem:[%s923_s25 + $0x80] sm:$0xff] %v556_v45  ;;  %v472_v53 = vadd.f32 %v914_v33, %v471_v51  ;;  %v543_v54 = vmax.f32 %v397_v48, 0.0 }
  0xed   : > { %v559_v55 = vmax.f32 %v477_v49, 0.0  ;;  %v542_v56 = vmax.f32 %v392_v52, 0.0  ;;  %v748_v58 = vpop.f32.mrb[4].mxu0 }
  0xee   : > { %v558_v57 = vmax.f32 %v472_v53, 0.0  ;;  %v772_v59 = vpop.f32.mrb[4].mxu1  ;;  %575 = vst [vmem:[%s923_s25 + $0x18] sm:$0xff] %v543_v54  ;;  %v407_v60 = vadd.f32 %v748_v58, %v914_v33  ;;  %v401_v62 = vpop.f32.mrb[5].mxu0 }
  0xef   : > { %591 = vst [vmem:[%s923_s25 + $0x98] sm:$0xff] %v559_v55  ;;  %v487_v61 = vadd.f32 %v772_v59, %v914_v33  ;;  %v481_v63 = vpop.f32.mrb[5].mxu1  ;;  %574 = vst [vmem:[%s923_s25 + $0x10] sm:$0xff] %v542_v56  ;;  %v402_v0 = vadd.f32 %v914_v33, %v401_v62 }
  0xf0   : > { %590 = vst [vmem:[%s923_s25 + $0x90] sm:$0xff] %v558_v57  ;;  %v482_v1 = vadd.f32 %v914_v33, %v481_v63  ;;  %v545_v2 = vmax.f32 %v407_v60, 0.0 }
  0xf1   : > { %v561_v3 = vmax.f32 %v487_v61, 0.0  ;;  %v544_v4 = vmax.f32 %v402_v0, 0.0  ;;  %v751_v6 = vpop.f32.mrb[6].mxu0 }
  0xf2   : > { %v560_v5 = vmax.f32 %v482_v1, 0.0  ;;  %v775_v7 = vpop.f32.mrb[6].mxu1  ;;  %577 = vst [vmem:[%s923_s25 + $0x28] sm:$0xff] %v545_v2  ;;  %v417_v8 = vadd.f32 %v751_v6, %v914_v33  ;;  %v411_v10 = vpop.f32.mrb[7].mxu0 }
  0xf3   : > { %593 = vst [vmem:[%s923_s25 + $0xa8] sm:$0xff] %v561_v3  ;;  %v497_v9 = vadd.f32 %v775_v7, %v914_v33  ;;  %v491_v11 = vpop.f32.mrb[7].mxu1  ;;  %576 = vst [vmem:[%s923_s25 + $0x20] sm:$0xff] %v544_v4  ;;  %v412_v12 = vadd.f32 %v914_v33, %v411_v10 }
  0xf4   : > { %592 = vst [vmem:[%s923_s25 + $0xa0] sm:$0xff] %v560_v5  ;;  %v492_v13 = vadd.f32 %v914_v33, %v491_v11  ;;  %v547_v14 = vmax.f32 %v417_v8, 0.0 }
  0xf5   : > { %v563_v15 = vmax.f32 %v497_v9, 0.0  ;;  %v546_v16 = vmax.f32 %v412_v12, 0.0  ;;  %v754_v18 = vpop.f32.mrb[8].mxu0 }
  0xf6   : > { %v562_v17 = vmax.f32 %v492_v13, 0.0  ;;  %v778_v19 = vpop.f32.mrb[8].mxu1  ;;  %579 = vst [vmem:[%s923_s25 + $0x38] sm:$0xff] %v547_v14  ;;  %v427_v20 = vadd.f32 %v754_v18, %v914_v33  ;;  %v421_v22 = vpop.f32.mrb[9].mxu0 }
  0xf7   : > { %595 = vst [vmem:[%s923_s25 + $0xb8] sm:$0xff] %v563_v15  ;;  %v507_v21 = vadd.f32 %v778_v19, %v914_v33  ;;  %v501_v23 = vpop.f32.mrb[9].mxu1  ;;  %578 = vst [vmem:[%s923_s25 + $0x30] sm:$0xff] %v546_v16  ;;  %v422_v24 = vadd.f32 %v914_v33, %v421_v22 }
  0xf8   : > { %594 = vst [vmem:[%s923_s25 + $0xb0] sm:$0xff] %v562_v17  ;;  %v502_v25 = vadd.f32 %v914_v33, %v501_v23  ;;  %v549_v26 = vmax.f32 %v427_v20, 0.0 }
  0xf9   : > { %v565_v27 = vmax.f32 %v507_v21, 0.0  ;;  %v548_v28 = vmax.f32 %v422_v24, 0.0  ;;  %v757_v30 = vpop.f32.mrb[10].mxu0 }
  0xfa   : > { %v564_v29 = vmax.f32 %v502_v25, 0.0  ;;  %v781_v31 = vpop.f32.mrb[10].mxu1  ;;  %581 = vst [vmem:[%s923_s25 + $0x48] sm:$0xff] %v549_v26  ;;  %v437_v32 = vadd.f32 %v757_v30, %v914_v33  ;;  %v431_v35 = vpop.f32.mrb[11].mxu0 }
  0xfb   : > { %597 = vst [vmem:[%s923_s25 + $0xc8] sm:$0xff] %v565_v27  ;;  %v517_v34 = vadd.f32 %v781_v31, %v914_v33  ;;  %v511_v36 = vpop.f32.mrb[11].mxu1  ;;  %580 = vst [vmem:[%s923_s25 + $0x40] sm:$0xff] %v548_v28  ;;  %v432_v37 = vadd.f32 %v914_v33, %v431_v35 }
  0xfc   : > { %596 = vst [vmem:[%s923_s25 + $0xc0] sm:$0xff] %v564_v29  ;;  %v512_v38 = vadd.f32 %v914_v33, %v511_v36  ;;  %v551_v39 = vmax.f32 %v437_v32, 0.0 }
  0xfd   : > { %v567_v40 = vmax.f32 %v517_v34, 0.0  ;;  %v550_v41 = vmax.f32 %v432_v37, 0.0  ;;  %v760_v43 = vpop.f32.mrb[12].mxu0 }
  0xfe   : > { %v566_v42 = vmax.f32 %v512_v38, 0.0  ;;  %v784_v44 = vpop.f32.mrb[12].mxu1  ;;  %583 = vst [vmem:[%s923_s25 + $0x58] sm:$0xff] %v551_v39  ;;  %v447_v45 = vadd.f32 %v760_v43, %v914_v33  ;;  %v441_v47 = vpop.f32.mrb[13].mxu0 }
  0xff   : > { %599 = vst [vmem:[%s923_s25 + $0xd8] sm:$0xff] %v567_v40  ;;  %v527_v46 = vadd.f32 %v784_v44, %v914_v33  ;;  %v521_v48 = vpop.f32.mrb[13].mxu1  ;;  %582 = vst [vmem:[%s923_s25 + $0x50] sm:$0xff] %v550_v41  ;;  %v442_v49 = vadd.f32 %v914_v33, %v441_v47 }
 0x100   : > { %598 = vst [vmem:[%s923_s25 + $0xd0] sm:$0xff] %v566_v42  ;;  %v522_v50 = vadd.f32 %v914_v33, %v521_v48  ;;  %v553_v51 = vmax.f32 %v447_v45, 0.0 }
 0x101   : > { %v569_v52 = vmax.f32 %v527_v46, 0.0  ;;  %v552_v53 = vmax.f32 %v442_v49, 0.0  ;;  %v763_v55 = vpop.f32.mrb[14].mxu0 }
 0x102   : > { %v568_v54 = vmax.f32 %v522_v50, 0.0  ;;  %v787_v56 = vpop.f32.mrb[14].mxu1  ;;  %585 = vst [vmem:[%s923_s25 + $0x68] sm:$0xff] %v553_v51  ;;  %v457_v57 = vadd.f32 %v763_v55, %v914_v33  ;;  %v451_v59 = vpop.f32.mrb[15].mxu0 }
 0x103   : > { %601 = vst [vmem:[%s923_s25 + $0xe8] sm:$0xff] %v569_v52  ;;  %v537_v58 = vadd.f32 %v787_v56, %v914_v33  ;;  %v531_v60 = vpop.f32.mrb[15].mxu1  ;;  %584 = vst [vmem:[%s923_s25 + $0x60] sm:$0xff] %v552_v53  ;;  %v452_v61 = vadd.f32 %v914_v33, %v451_v59 }
 0x104   : > { %600 = vst [vmem:[%s923_s25 + $0xe0] sm:$0xff] %v568_v54  ;;  %v532_v62 = vadd.f32 %v914_v33, %v531_v60  ;;  %v555_v63 = vmax.f32 %v457_v57, 0.0 }
 0x105   : > { %v571_v0 = vmax.f32 %v537_v58, 0.0  ;;  %v554_v1 = vmax.f32 %v452_v61, 0.0 }
 0x106   : > { %v570_v2 = vmax.f32 %v532_v62, 0.0  ;;  %587 = vst [vmem:[%s923_s25 + $0x78] sm:$0xff] %v555_v63 }
 0x107   : > { %603 = vst [vmem:[%s923_s25 + $0xf8] sm:$0xff] %v571_v0  ;;  %586 = vst [vmem:[%s923_s25 + $0x70] sm:$0xff] %v554_v1 }
 0x108   : > { %602 = vst [vmem:[%s923_s25 + $0xf0] sm:$0xff] %v570_v2 }
 0x109 PF: > { %s13_s12 = sadd.s32 1, %s804_s12  }
 0x10a   : > { %p10_p4 = scmp.ge.s32.totalorder %s13_s12, 4  }
 0x10c   :  { %12 = sbr.rel (!%p10_p4) target bundleno = 1 (0x1), region = 62 }

// kernel: _lambda_.6
= control target key start
LH: loop header
LB: loop body
LE: loop exit
PB: predicated region body
PF: predicated region fallthrough
CT: control target
= control target key end

     0   :  { %s1304_s15 = smov 0   ;;  %s1306_s16 = smov 0   ;;  %s1458_s0 = inlined_call_operand.vmem [shape: f32[2,16,8,4], index: 0, kind: input, shape index: {}]   ;;  %s1459_s1 = inlined_call_operand.vmem [shape: f32[2,16,8,4], index: 1, kind: input, shape index: {}]   ;;  %s1460_s2 = inlined_call_operand.vmem [shape: f32[9,4,128], index: 2, kind: input, shape index: {}]   ;;  %s1461_s3 = inlined_call_operand.vmem [shape: f32[1,128], index: 3, kind: input, shape index: {}]   ;;  %s1462_s4 = inlined_call_operand.vmem [shape: f32[2,7,7,128], index: 4, kind: output, shape index: {}]  }
   0x1   :  { %s1308_s17 = smov 0   ;;  %s1310_s18 = smov 0  }
   0x2   :  { %s1312_s19 = smov 0  }
   0x3 LB: > { %s23_s20 = sadd.s32 1, %s1267_s17  ;;  %s26_s21 = sadd.s32 1, %s1271_s18  ;;  %s1275_s19 = sphi %s1312_s19, %s14_s19   ;;  %s1271_s18 = sphi %s1310_s18, %s1466_s18   ;;  %s1267_s17 = sphi %s1308_s17, %s1465_s17   ;;  %s1263_s16 = sphi %s1306_s16, %s1464_s16   ;;  %s1259_s15 = sphi %s1304_s15, %s1463_s15  }
   0x4   : > { %p24_p0 = scmp.ge.s32.totalorder %s23_s20, 7  ;;  %p1090_p1 = scmp.ge.s32.totalorder %s1275_s19, 1 }
   0x5   : > { %p186_p2 = scmp.lt.s32.totalorder %s1275_s19, 15 }
   0x6   : > { %s1468_s20 = smov (%p24_p0, %s23_s20), 0  ;;  %s1470_s21 = smov (!%p24_p0, %s26_s21), %s1271_s18 }
   0x7   : > { %p187_p3 = pnand %p1090_p1, %p186_p2  ;;  %p28_p4 = scmp.ge.s32.totalorder %s1470_s21, 2 }
   0x8   : > { %v1098_v0 = vld [vmem:[%s1460_s2 + $0x4] sm:$0xf] (!%p187_p3)  ;;  %vm254_vm0 = vcmask (!%p187_p3), 1043456   ;;  %p220_p5 = scmp.lt.s32.totalorder (!%p187_p3), %s1263_s16, 1  ;;  %v1277_v1 = vmov (!%p187_p3), 0.0   ;;  %s1345_s26 = sshll.u32 (!%p187_p3), %s1259_s15, 1 }
   0x9   : > { %s1472_s21 = smov (%p28_p4, %s1470_s21), 0  ;;  %190 = sbr.rel (%p187_p3) target bundleno = 259 (0x103), region = 36 }
   0xa   : > { %1149 = vmatprep.subr.mxu0 (!%p187_p3), %v1277_v1  ;;  %1154 = vmatprep.subr.mxu1 (!%p187_p3), %v1277_v1  ;;  %v247_v2 = vld [vmem:[%s1460_s2] sm:$0xf] (!%p187_p3)  ;;  %vm1278_vm1 = vmmov (!%p187_p3), 0   ;;  %p240_p6 = scmp.lt.s32.totalorder (!%p187_p3), %s1345_s26, 15  ;;  %s483_s27 = sadd.s32 (!%p187_p3), 1, %s1345_s26  ;;  %vm250_vm2 = vcmask (!%p187_p3), 31744  }
   0xb   : > { %1150 = vmatpush3.msk.msra.mxu0 (!%p187_p3), %vm254_vm0, %v1098_v0  ;;  %1151 = vmatprep.mubr.msk.f32.mxu0 (!%p187_p3), %vm1278_vm1, %v1277_v1  ;;  %p484_p7 = scmp.lt.s32.totalorder (!%p187_p3), %s483_s27, 15  ;;  %s728_s11 = sadd.s32 (!%p187_p3), 2, %s1345_s26  ;;  %v1103_v3 = vld [vmem:[%s1460_s2 + $0x8] sm:$0xf] (!%p187_p3)  ;;  %v1107_v4 = vld [vmem:[%s1460_s2 + $0xc] sm:$0xf] (!%p187_p3) }
   0xc   : > { %1155 = vmatpush3.msk.msra.mxu1 (!%p187_p3), %vm254_vm0, %v247_v2  ;;  %1156 = vmatprep.mubr.msk.f32.mxu1 (!%p187_p3), %vm1278_vm1, %v1277_v1  ;;  %p729_p8 = scmp.lt.s32.totalorder (!%p187_p3), %s728_s11, 15  ;;  %v1110_v9 = vld [vmem:[%s1460_s2 + $0x10] sm:$0xf] (!%p187_p3)  ;;  %v1113_v10 = vld [vmem:[%s1460_s2 + $0x14] sm:$0xf] (!%p187_p3)  ;;  %p232_p9 = scmp.lt.s32.totalorder (!%p187_p3), %s1259_s15, 6 }
   0xd   : > { %1159 = vmatprep.subr.mxu0 (!%p187_p3), %v1277_v1  ;;  %1164 = vmatprep.subr.mxu1 (!%p187_p3), %v1277_v1  ;;  %v1117_v13 = vld [vmem:[%s1460_s2 + $0x18] sm:$0xf] (!%p187_p3)  ;;  %v1120_v14 = vld [vmem:[%s1460_s2 + $0x1c] sm:$0xf] (!%p187_p3)  ;;  %v1123_v17 = vld [vmem:[%s1460_s2 + $0x20] sm:$0xf] (!%p187_p3) }
   0xe   : > { %v1126_v42 = vld [vmem:[%s1461_s3] ss:$0 sm:$0xff] (!%p187_p3) }
  0x10   : > { %s1474_s16 = smov (!%p220_p5, %s1263_s16), 1  ;;  %s1476_s27 = smov (!%p484_p7, %s483_s27), 15 }
  0x11   : > { %s1129_s28 = sshll.u32 %s1474_s16, 7  ;;  %s1106_s25 = sshll.u32 %s1476_s27, 3 }
  0x12   : > { %s1363_s5 = scalar_lea.vmem %s1459_s1, %s1129_s28  ;;  %s1368_s8 = scalar_lea.vmem %s1458_s0, %s1129_s28 }
  0x13   : > { %s241_s9 = scalar_select %p240_p6, %s1345_s26, 15 }
  0x14   : > { %s487_s26 = scalar_lea.vmem %s1368_s8, %s1106_s25  ;;  %s1478_s11 = smov (!%p729_p8, %s728_s11), 15 }
  0x15   : > { %s1097_s10 = sshll.u32 %s241_s9, 3  ;;  %v488_v8 = vld [vmem:[%s487_s26] sm:$0xff]  ;;  %s489_s6 = scalar_lea.vmem %s1363_s5, %s1106_s25 }
  0x16   : > { %s245_s12 = scalar_lea.vmem %s1363_s5, %s1097_s10  ;;  %s243_s13 = scalar_lea.vmem %s1368_s8, %s1097_s10  ;;  %v651_v11 = vrot.slane %v488_v8, 1  ;;  %v490_v12 = vld [vmem:[%s489_s6] sm:$0xff] }
  0x17   : > { %v246_v5 = vld [vmem:[%s245_s12] sm:$0xff]  ;;  %s1116_s7 = sshll.u32 %s1478_s11, 3  ;;  %s1194_s22 = smul.u32 7, %s1474_s16 }
  0x18   : > { %v244_v6 = vld [vmem:[%s243_s13] sm:$0xff]  ;;  %1152 = vmatmul.mubr.msk.f32.vlgmr.msra.gmra.mrb[0].mxu0 %vm250_vm2, %v246_v5  ;;  %s732_s13 = scalar_lea.vmem %s1368_s8, %s1116_s7  ;;  %s734_s14 = scalar_lea.vmem %s1363_s5, %s1116_s7 }
  0x19   : > { %1157 = vmatmul.mubr.msk.f32.vlgmr.msra.gmra.mrb[0].mxu1 %vm250_vm2, %v244_v6  ;;  %v406_v7 = vrot.slane %v244_v6, 1  ;;  %1160 = vmatpush3.msk.msra.mxu0 %vm254_vm0, %v1103_v3  ;;  %v733_v15 = vld [vmem:[%s732_s13] sm:$0xff]  ;;  %s1480_s15 = smov (!%p232_p9, %s1259_s15), 6 }
  0x1a   : > { %1165 = vmatpush3.msk.msra.mxu1 %vm254_vm0, %v1107_v4  ;;  %1161 = vmatprep.mubr.msk.f32.mxu0 %vm1278_vm1, %v1277_v1  ;;  %v735_v16 = vld [vmem:[%s734_s14] sm:$0xff]  ;;  %v896_v18 = vrot.slane %v733_v15, 1  ;;  %s235_s23 = sadd.s32 %s1194_s22, %s1480_s15 }
  0x1b   : > { %1169 = vmatprep.subr.mxu0 %v1277_v1  ;;  %1166 = vmatprep.mubr.msk.f32.mxu1 %vm1278_vm1, %v1277_v1  ;;  %s1095_s26 = sshll.u32 %s235_s23, 3 }
  0x1c   : > { %1174 = vmatprep.subr.mxu1 %v1277_v1  ;;  %1162 = vmatmul.mubr.msk.f32.vlgmr.msra.gmra.mrb[2].mxu0 %vm250_vm2, %v406_v7  ;;  %s237_s27 = scalar_lea.vmem %s1462_s4, %s1095_s26 }
  0x1d   : > { %1167 = vmatmul.mubr.msk.f32.vlgmr.msra.gmra.mrb[2].mxu1 %vm250_vm2, %v488_v8  ;;  %1170 = vmatpush3.msk.msra.mxu0 %vm254_vm0, %v1110_v9 }
  0x1e   : > { %1175 = vmatpush3.msk.msra.mxu1 %vm254_vm0, %v1113_v10  ;;  %1171 = vmatprep.mubr.msk.f32.mxu0 %vm1278_vm1, %v1277_v1 }
  0x1f   : > { %1179 = vmatprep.subr.mxu0 %v1277_v1  ;;  %1176 = vmatprep.mubr.msk.f32.mxu1 %vm1278_vm1, %v1277_v1 }
  0x20   : > { %1184 = vmatprep.subr.mxu1 %v1277_v1  ;;  %1172 = vmatmul.mubr.msk.f32.vlgmr.msra.gmra.mrb[4].mxu0 %vm250_vm2, %v490_v12 }
  0x21   : > { %1177 = vmatmul.mubr.msk.f32.vlgmr.msra.gmra.mrb[4].mxu1 %vm250_vm2, %v651_v11  ;;  %1180 = vmatpush3.msk.msra.mxu0 %vm254_vm0, %v1117_v13 }
  0x22   : > { %1185 = vmatpush3.msk.msra.mxu1 %vm254_vm0, %v1120_v14  ;;  %1181 = vmatprep.mubr.msk.f32.mxu0 %vm1278_vm1, %v1277_v1 }
  0x23   : > { %1189 = vmatprep.subr.mxu0 %v1277_v1  ;;  %1186 = vmatprep.mubr.msk.f32.mxu1 %vm1278_vm1, %v1277_v1 }
  0x24   : > { %1182 = vmatmul.mubr.msk.f32.vlgmr.msra.gmra.mrb[6].mxu0 %vm250_vm2, %v733_v15 }
  0x25   : > { %1187 = vmatmul.mubr.msk.f32.vlgmr.msra.gmra.mrb[6].mxu1 %vm250_vm2, %v735_v16  ;;  %1190 = vmatpush3.msk.msra.mxu0 %vm254_vm0, %v1123_v17 }
  0x26   : > { %1191 = vmatprep.mubr.msk.f32.mxu0 %vm1278_vm1, %v1277_v1 }
  0x28   : > { %1192 = vmatmul.mubr.msk.f32.vlgmr.msra.gmra.mrb[8].mxu0 %vm250_vm2, %v896_v18 }
  0xeb   : > { %v324_v19 = vpop.f32.mrb[0].mxu0 }
  0xec   : > { %v400_v20 = vpop.f32.mrb[0].mxu1  ;;  %v1153_v22 = vpop.f32.mrb[1].mxu0 }
  0xed   : > { %v401_v21 = vadd.f32 %v400_v20, %v324_v19  ;;  %v1158_v23 = vpop.f32.mrb[1].mxu1 }
  0xef   : > { %v478_v24 = vpop.f32.mrb[2].mxu0 }
  0xf0   : > { %v565_v25 = vpop.f32.mrb[2].mxu1  ;;  %v482_v26 = vadd.f32 %v478_v24, %v401_v21  ;;  %v1163_v27 = vpop.f32.mrb[3].mxu0 }
  0xf1   : > { %v1168_v28 = vpop.f32.mrb[3].mxu1 }
  0xf2   : > { %v569_v29 = vadd.f32 %v565_v25, %v482_v26 }
  0xf3   : > { %v644_v30 = vpop.f32.mrb[4].mxu0 }
  0xf4   : > { %v723_v31 = vpop.f32.mrb[4].mxu1  ;;  %v648_v32 = vadd.f32 %v644_v30, %v569_v29  ;;  %v1173_v33 = vpop.f32.mrb[5].mxu0 }
  0xf5   : > { %v1178_v34 = vpop.f32.mrb[5].mxu1 }
  0xf6   : > { %v727_v35 = vadd.f32 %v723_v31, %v648_v32 }
  0xf7   : > { %v810_v36 = vpop.f32.mrb[6].mxu0 }
  0xf8   : > { %v889_v37 = vpop.f32.mrb[6].mxu1  ;;  %v814_v38 = vadd.f32 %v810_v36, %v727_v35  ;;  %v1183_v39 = vpop.f32.mrb[7].mxu0 }
  0xf9   : > { %v1188_v40 = vpop.f32.mrb[7].mxu1 }
  0xfa   : > { %v893_v41 = vadd.f32 %v889_v37, %v814_v38 }
  0xfb   : > { %v968_v43 = vpop.f32.mrb[8].mxu0 }
  0xfc   : > { %v972_v44 = vadd.f32 %v968_v43, %v893_v41  ;;  %v1193_v45 = vpop.f32.mrb[9].mxu0 }
  0xfe   : > { %v979_v46 = vadd.f32 %v1126_v42, %v972_v44 }
 0x100   : > { %v980_v47 = vmax.f32 %v979_v46, 0.0 }
 0x102   : > { %981 = vst [vmem:[%s237_s27] sm:$0x7f] %v980_v47 }
 0x103 PF: > { %s14_s19 = sadd.s32 1, %s1275_s19   ;;  %s1463_s15 = smov %s1267_s17 }
 0x104   : > { %p11_p10 = scmp.ge.s32.totalorder %s14_s19, 16   ;;  %s1464_s16 = smov %s1271_s18 }
 0x105   : > { %s1465_s17 = smov %s1468_s20  ;;  %s1466_s18 = smov %s1472_s21 }
 0x106   :  { %13 = sbr.rel (!%p11_p10) target bundleno = 3 (0x3), region = 83 }

// kernel: _lambda_.9
= control target key start
LH: loop header
LB: loop body
LE: loop exit
PB: predicated region body
PF: predicated region fallthrough
CT: control target
= control target key end

     0   :  { %s2117_s15 = smov 0   ;;  %s2119_s16 = smov 0   ;;  %s2746_s0 = inlined_call_operand.vmem [shape: f32[2,16,8,128], index: 0, kind: input, shape index: {}]   ;;  %s2747_s1 = inlined_call_operand.vmem [shape: f32[2,16,8,128], index: 1, kind: input, shape index: {}]   ;;  %s2748_s2 = inlined_call_operand.vmem [shape: f32[9,128,128], index: 2, kind: input, shape index: {}]   ;;  %s2749_s3 = inlined_call_operand.vmem [shape: f32[1,128], index: 3, kind: input, shape index: {}]   ;;  %s2750_s4 = inlined_call_operand.vmem [shape: f32[2,7,7,128], index: 4, kind: output, shape index: {}]  }
   0x1   :  { %s2121_s17 = smov 0   ;;  %s2123_s18 = smov 0  }
   0x2   :  { %s2125_s19 = smov 0  }
   0x3 LB: > { %s23_s20 = sadd.s32 1, %s2079_s17  ;;  %s26_s21 = sadd.s32 1, %s2083_s18  ;;  %s2087_s19 = sphi %s2125_s19, %s14_s19   ;;  %s2083_s18 = sphi %s2123_s18, %s2754_s18   ;;  %s2079_s17 = sphi %s2121_s17, %s2753_s17   ;;  %s2075_s16 = sphi %s2119_s16, %s2752_s16   ;;  %s2071_s15 = sphi %s2117_s15, %s2751_s15  }
   0x4   : > { %p24_p0 = scmp.ge.s32.totalorder %s23_s20, 7  ;;  %p1178_p1 = scmp.ge.s32.totalorder %s2087_s19, 1 }
   0x5   : > { %p186_p2 = scmp.lt.s32.totalorder %s2087_s19, 15 }
   0x6   : > { %s2756_s20 = smov (%p24_p0, %s23_s20), 0  ;;  %s2758_s21 = smov (!%p24_p0, %s26_s21), %s2083_s18 }
   0x7   : > { %p187_p3 = pnand %p1178_p1, %p186_p2  ;;  %p28_p4 = scmp.ge.s32.totalorder %s2758_s21, 2 }
   0x8   : > { %v1186_v0 = vld [vmem:[%s2748_s2 + $0x80] sm:$0xff] (!%p187_p3)  ;;  %v1187_v1 = vld [vmem:[%s2748_s2 + $0x88] sm:$0xff] (!%p187_p3)  ;;  %v2089_v3 = vmov (!%p187_p3), 0.0|0.0   ;;  %v1188_v6 = vld [vmem:[%s2748_s2 + $0x90] sm:$0xff] (!%p187_p3)  ;;  %vm2090_vm0 = vmmov (!%p187_p3), 0   ;;  %v2091_v11 = vmov (!%p187_p3), 0.0  }
   0x9   : > { %s2760_s21 = smov (%p28_p4, %s2758_s21), 0  ;;  %190 = sbr.rel (%p187_p3) target bundleno = 390 (0x186), region = 36 }
   0xa   : > { %v247_v2 = vld [vmem:[%s2748_s2] sm:$0xff] (!%p187_p3)  ;;  %1789 = vmatprep.subr.bf16.mxu0 (!%p187_p3), %v2089_v3  ;;  %v1790_v4 = vpack.c.bf16 (!%p187_p3), %v1187_v1, %v1186_v0  ;;  %1813 = vmatprep.subr.bf16.mxu1 (!%p187_p3), %v2089_v3  ;;  %v248_v5 = vld [vmem:[%s2748_s2 + $0x8] sm:$0xff] (!%p187_p3)  ;;  %v1189_v7 = vld [vmem:[%s2748_s2 + $0x98] sm:$0xff] (!%p187_p3)  ;;  %p220_p5 = scmp.lt.s32.totalorder (!%p187_p3), %s2075_s16, 1  ;;  %s2197_s27 = sshll.u32 (!%p187_p3), %s2071_s15, 1 }
   0xb   : > { %v1814_v8 = vpack.c.bf16 (!%p187_p3), %v248_v5, %v247_v2  ;;  %v249_v9 = vld [vmem:[%s2748_s2 + $0x10] sm:$0xff] (!%p187_p3)  ;;  %v250_v10 = vld [vmem:[%s2748_s2 + $0x18] sm:$0xff] (!%p187_p3)  ;;  %1506 = vmatprep.mubr.msk.f32.mxu0 (!%p187_p3), %vm2090_vm0, %v2091_v11  ;;  %1541 = vmatprep.mubr.msk.f32.mxu1 (!%p187_p3), %vm2090_vm0, %v2091_v11  ;;  %v1793_v12 = vpack.c.bf16 (!%p187_p3), %v1189_v7, %v1188_v6  ;;  %v1190_v14 = vld [vmem:[%s2748_s2 + $0xa0] sm:$0xff] (!%p187_p3)  ;;  %s786_s6 = sadd.s32 (!%p187_p3), 2, %s2197_s27  ;;  %p240_p7 = scmp.lt.s32.totalorder (!%p187_p3), %s2197_s27, 15 }
   0xc   : > { %1791 = vmatpush3.bf16.msra.mxu0 (!%p187_p3), %v1790_v4  ;;  %v1817_v13 = vpack.c.bf16 (!%p187_p3), %v250_v10, %v249_v9  ;;  %v1191_v15 = vld [vmem:[%s2748_s2 + $0xa8] sm:$0xff] (!%p187_p3)  ;;  %v251_v16 = vld [vmem:[%s2748_s2 + $0x20] sm:$0xff] (!%p187_p3)  ;;  %v1192_v20 = vld [vmem:[%s2748_s2 + $0xb0] sm:$0xff] (!%p187_p3)  ;;  %p787_p6 = scmp.lt.s32.totalorder (!%p187_p3), %s786_s6, 15  ;;  %p232_p9 = scmp.lt.s32.totalorder (!%p187_p3), %s2071_s15, 6 }
   0xd   : > { %1815 = vmatpush3.bf16.msra.mxu1 (!%p187_p3), %v1814_v8  ;;  %1792 = vmatprep.subr.bf16.mxu0 (!%p187_p3), %v2089_v3  ;;  %v252_v17 = vld [vmem:[%s2748_s2 + $0x28] sm:$0xff] (!%p187_p3)  ;;  %v1796_v18 = vpack.c.bf16 (!%p187_p3), %v1191_v15, %v1190_v14  ;;  %v1193_v21 = vld [vmem:[%s2748_s2 + $0xb8] sm:$0xff] (!%p187_p3)  ;;  %v253_v22 = vld [vmem:[%s2748_s2 + $0x30] sm:$0xff] (!%p187_p3) }
   0xe   : > { %1816 = vmatprep.subr.bf16.mxu1 (!%p187_p3), %v2089_v3  ;;  %v1820_v19 = vpack.c.bf16 (!%p187_p3), %v252_v17, %v251_v16  ;;  %v254_v23 = vld [vmem:[%s2748_s2 + $0x38] sm:$0xff] (!%p187_p3)  ;;  %v1799_v24 = vpack.c.bf16 (!%p187_p3), %v1193_v21, %v1192_v20  ;;  %v1194_v26 = vld [vmem:[%s2748_s2 + $0xc0] sm:$0xff] (!%p187_p3)  ;;  %v1195_v27 = vld [vmem:[%s2748_s2 + $0xc8] sm:$0xff] (!%p187_p3) }
   0xf   : > { %v1823_v25 = vpack.c.bf16 (!%p187_p3), %v254_v23, %v253_v22  ;;  %v255_v28 = vld [vmem:[%s2748_s2 + $0x40] sm:$0xff] (!%p187_p3)  ;;  %v256_v29 = vld [vmem:[%s2748_s2 + $0x48] sm:$0xff] (!%p187_p3)  ;;  %v1802_v30 = vpack.c.bf16 (!%p187_p3), %v1195_v27, %v1194_v26  ;;  %v1196_v32 = vld [vmem:[%s2748_s2 + $0xd0] sm:$0xff] (!%p187_p3) }
  0x10   : > { %1794 = vmatpush3.bf16.msra.mxu0 %v1793_v12  ;;  %s2762_s16 = smov (!%p220_p5, %s2075_s16), 1  ;;  %s2764_s6 = smov (!%p787_p6, %s786_s6), 15  ;;  %v1826_v31 = vpack.c.bf16 %v256_v29, %v255_v28  ;;  %v1197_v33 = vld [vmem:[%s2748_s2 + $0xd8] sm:$0xff]  ;;  %v257_v34 = vld [vmem:[%s2748_s2 + $0x50] sm:$0xff]  ;;  %v1198_v38 = vld [vmem:[%s2748_s2 + $0xe0] sm:$0xff] }
  0x11   : > { %1818 = vmatpush3.bf16.msra.mxu1 %v1817_v13  ;;  %1795 = vmatprep.subr.bf16.mxu0 %v2089_v3  ;;  %s1319_s11 = sshll.u32 %s2762_s16, 7  ;;  %s1267_s9 = sshll.u32 %s2764_s6, 3  ;;  %v258_v35 = vld [vmem:[%s2748_s2 + $0x58] sm:$0xff]  ;;  %v1805_v36 = vpack.c.bf16 %v1197_v33, %v1196_v32  ;;  %v1199_v39 = vld [vmem:[%s2748_s2 + $0xe8] sm:$0xff]  ;;  %v259_v40 = vld [vmem:[%s2748_s2 + $0x60] sm:$0xff] }
  0x12   : > { %1819 = vmatprep.subr.bf16.mxu1 %v2089_v3  ;;  %s2235_s30 = scalar_lea.vmem %s2747_s1, %s1319_s11  ;;  %s2240_s8 = scalar_lea.vmem %s2746_s0, %s1319_s11  ;;  %v1829_v37 = vpack.c.bf16 %v258_v35, %v257_v34  ;;  %v260_v41 = vld [vmem:[%s2748_s2 + $0x68] sm:$0xff]  ;;  %v1808_v42 = vpack.c.bf16 %v1199_v39, %v1198_v38  ;;  %v1200_v44 = vld [vmem:[%s2748_s2 + $0xf0] sm:$0xff]  ;;  %v1201_v45 = vld [vmem:[%s2748_s2 + $0xf8] sm:$0xff] }
  0x13   : > { %s2250_s22 = scalar_lea.vmem %s2240_s8, %s1267_s9  ;;  %s2253_s23 = scalar_lea.vmem %s2235_s30, %s1267_s9  ;;  %v1832_v43 = vpack.c.bf16 %v260_v41, %v259_v40  ;;  %v261_v46 = vld [vmem:[%s2748_s2 + $0x70] sm:$0xff]  ;;  %v262_v47 = vld [vmem:[%s2748_s2 + $0x78] sm:$0xff]  ;;  %v1811_v48 = vpack.c.bf16 %v1201_v45, %v1200_v44  ;;  %v1202_v50 = vld [vmem:[%s2748_s2 + $0x100] sm:$0xff] }
  0x14   : > { %1797 = vmatpush3.bf16.msra.mxu0 %v1796_v18  ;;  %s241_s13 = scalar_select %p240_p7, %s2197_s27, 15  ;;  %v1835_v49 = vpack.c.bf16 %v262_v47, %v261_v46  ;;  %v1203_v51 = vld [vmem:[%s2748_s2 + $0x108] sm:$0xff]  ;;  %v1219_v52 = vld [vmem:[%s2748_s2 + $0x180] sm:$0xff]  ;;  %v1204_v58 = vld [vmem:[%s2748_s2 + $0x110] sm:$0xff] }
  0x15   : > { %1821 = vmatpush3.bf16.msra.mxu1 %v1820_v19  ;;  %1798 = vmatprep.subr.bf16.mxu0 %v2089_v3  ;;  %v1220_v53 = vld [vmem:[%s2748_s2 + $0x188] sm:$0xff]  ;;  %v1838_v55 = vpack.c.bf16 %v1203_v51, %v1202_v50  ;;  %v1205_v59 = vld [vmem:[%s2748_s2 + $0x118] sm:$0xff]  ;;  %v1221_v60 = vld [vmem:[%s2748_s2 + $0x190] sm:$0xff]  ;;  %s511_s9 = sadd.s32 1, %s2197_s27  ;;  %s2005_s10 = smul.u32 7, %s2762_s16 }
  0x16   : > { %1822 = vmatprep.subr.bf16.mxu1 %v2089_v3  ;;  %s1185_s5 = sshll.u32 %s241_s13, 3  ;;  %v1862_v57 = vpack.c.bf16 %v1220_v53, %v1219_v52  ;;  %v1222_v61 = vld [vmem:[%s2748_s2 + $0x198] sm:$0xff]  ;;  %v1841_v62 = vpack.c.bf16 %v1205_v59, %v1204_v58  ;;  %v1206_v0 = vld [vmem:[%s2748_s2 + $0x120] sm:$0xff]  ;;  %v1207_v1 = vld [vmem:[%s2748_s2 + $0x128] sm:$0xff]  ;;  %p512_p8 = scmp.lt.s32.totalorder %s511_s9, 15 }
  0x17   : > { %s245_s7 = scalar_lea.vmem %s2235_s30, %s1185_s5  ;;  %s243_s6 = scalar_lea.vmem %s2240_s8, %s1185_s5  ;;  %v1865_v63 = vpack.c.bf16 %v1222_v61, %v1221_v60  ;;  %v1223_v2 = vld [vmem:[%s2748_s2 + $0x1a0] sm:$0xff]  ;;  %v1224_v4 = vld [vmem:[%s2748_s2 + $0x1a8] sm:$0xff]  ;;  %v1844_v5 = vpack.c.bf16 %v1207_v1, %v1206_v0  ;;  %v1208_v7 = vld [vmem:[%s2748_s2 + $0x130] sm:$0xff] }
  0x18   : > { %1800 = vmatpush3.bf16.msra.mxu0 %v1799_v24  ;;  %v246_v54 = vld [vmem:[%s245_s7] sm:$0xff]  ;;  %v1868_v6 = vpack.c.bf16 %v1224_v4, %v1223_v2  ;;  %v1209_v8 = vld [vmem:[%s2748_s2 + $0x138] sm:$0xff]  ;;  %v1225_v9 = vld [vmem:[%s2748_s2 + $0x1b0] sm:$0xff]  ;;  %s2766_s9 = smov (!%p512_p8, %s511_s9), 15  ;;  %s2768_s15 = smov (!%p232_p9, %s2071_s15), 6 }
  0x19   : > { %1824 = vmatpush3.bf16.msra.mxu1 %v1823_v25  ;;  %1801 = vmatprep.subr.bf16.mxu0 %v2089_v3  ;;  %v2309_v56 = vld [vmem:[%s243_s6] sm:$0xff]  ;;  %v1226_v10 = vld [vmem:[%s2748_s2 + $0x1b8] sm:$0xff]  ;;  %v1847_v12 = vpack.c.bf16 %v1209_v8, %v1208_v7  ;;  %v1211_v15 = vld [vmem:[%s2748_s2 + $0x148] sm:$0xff]  ;;  %s1218_s26 = sshll.u32 %s2766_s9, 3 }
  0x1a   : > { %1825 = vmatprep.subr.bf16.mxu1 %v2089_v3  ;;  %v1871_v13 = vpack.c.bf16 %v1226_v10, %v1225_v9  ;;  %v1210_v14 = vld [vmem:[%s2748_s2 + $0x140] sm:$0xff]  ;;  %v1228_v17 = vld [vmem:[%s2748_s2 + $0x1c8] sm:$0xff]  ;;  %v1212_v20 = vld [vmem:[%s2748_s2 + $0x150] sm:$0xff]  ;;  %s515_s7 = scalar_lea.vmem %s2240_s8, %s1218_s26  ;;  %s517_s13 = scalar_lea.vmem %s2235_s30, %s1218_s26 }
  0x1b   : > { %v1227_v16 = vld [vmem:[%s2748_s2 + $0x1c0] sm:$0xff]  ;;  %v1850_v18 = vpack.c.bf16 %v1211_v15, %v1210_v14  ;;  %v1213_v21 = vld [vmem:[%s2748_s2 + $0x158] sm:$0xff]  ;;  %v1229_v22 = vld [vmem:[%s2748_s2 + $0x1d0] sm:$0xff]  ;;  %s235_s30 = sadd.s32 %s2005_s10, %s2768_s15 }
  0x1c   : > { %1803 = vmatpush3.bf16.msra.mxu0 %v1802_v30  ;;  %v1874_v19 = vpack.c.bf16 %v1228_v17, %v1227_v16  ;;  %v1230_v23 = vld [vmem:[%s2748_s2 + $0x1d8] sm:$0xff]  ;;  %v1853_v24 = vpack.c.bf16 %v1213_v21, %v1212_v20  ;;  %v1214_v26 = vld [vmem:[%s2748_s2 + $0x160] sm:$0xff]  ;;  %v1215_v27 = vld [vmem:[%s2748_s2 + $0x168] sm:$0xff] }
  0x1d   : > { %1827 = vmatpush3.bf16.msra.mxu1 %v1826_v31  ;;  %1804 = vmatprep.subr.bf16.mxu0 %v2089_v3  ;;  %v1877_v25 = vpack.c.bf16 %v1230_v23, %v1229_v22  ;;  %v1231_v28 = vld [vmem:[%s2748_s2 + $0x1e0] sm:$0xff]  ;;  %v1232_v29 = vld [vmem:[%s2748_s2 + $0x1e8] sm:$0xff]  ;;  %v1856_v30 = vpack.c.bf16 %v1215_v27, %v1214_v26  ;;  %v1216_v32 = vld [vmem:[%s2748_s2 + $0x170] sm:$0xff] }
  0x1e   : > { %1828 = vmatprep.subr.bf16.mxu1 %v2089_v3  ;;  %v1880_v31 = vpack.c.bf16 %v1232_v29, %v1231_v28  ;;  %v1217_v33 = vld [vmem:[%s2748_s2 + $0x178] sm:$0xff]  ;;  %v1233_v34 = vld [vmem:[%s2748_s2 + $0x1f0] sm:$0xff]  ;;  %v1235_v38 = vld [vmem:[%s2748_s2 + $0x200] sm:$0xff] }
  0x1f   : > { %v1234_v35 = vld [vmem:[%s2748_s2 + $0x1f8] sm:$0xff]  ;;  %v1236_v39 = vld [vmem:[%s2748_s2 + $0x208] sm:$0xff]  ;;  %v1251_v40 = vld [vmem:[%s2748_s2 + $0x280] sm:$0xff] }
  0x20   : > { %1806 = vmatpush3.bf16.msra.mxu0 %v1805_v36  ;;  %v1859_v36 = vpack.c.bf16 %v1217_v33, %v1216_v32  ;;  %v1252_v41 = vld [vmem:[%s2748_s2 + $0x288] sm:$0xff]  ;;  %v2436_v44 = vld [vmem:[%s515_s7] sm:$0xff]  ;;  %v1237_v46 = vld [vmem:[%s2748_s2 + $0x210] sm:$0xff]  ;;  %s1183_s7 = sshll.u32 %s235_s30, 3 }
  0x21   : > { %1830 = vmatpush3.bf16.msra.mxu1 %v1829_v37  ;;  %1807 = vmatprep.subr.bf16.mxu0 %v2089_v3  ;;  %v1883_v37 = vpack.c.bf16 %v1234_v35, %v1233_v34  ;;  %v1910_v45 = vpack.c.bf16 %v1252_v41, %v1251_v40  ;;  %v1238_v47 = vld [vmem:[%s2748_s2 + $0x218] sm:$0xff]  ;;  %v1239_v52 = vld [vmem:[%s2748_s2 + $0x220] sm:$0xff]  ;;  %v1240_v53 = vld [vmem:[%s2748_s2 + $0x228] sm:$0xff]  ;;  %s237_s6 = scalar_lea.vmem %s2750_s4, %s1183_s7 }
  0x22   : > { %1831 = vmatprep.subr.bf16.mxu1 %v2089_v3  ;;  %v1889_v50 = vpack.c.bf16 %v1238_v47, %v1237_v46  ;;  %v1241_v58 = vld [vmem:[%s2748_s2 + $0x230] sm:$0xff]  ;;  %v1242_v59 = vld [vmem:[%s2748_s2 + $0x238] sm:$0xff]  ;;  %v1243_v0 = vld [vmem:[%s2748_s2 + $0x240] sm:$0xff] }
  0x23   : > { %v1257_v60 = vld [vmem:[%s2748_s2 + $0x2b0] sm:$0xff]  ;;  %v1258_v61 = vld [vmem:[%s2748_s2 + $0x2b8] sm:$0xff]  ;;  %v1244_v1 = vld [vmem:[%s2748_s2 + $0x248] sm:$0xff] }
  0x24   : > { %1809 = vmatpush3.bf16.msra.mxu0 %v1808_v42  ;;  %v438_v42 = vrot.slane %v2309_v56, 1  ;;  %v1259_v2 = vld [vmem:[%s2748_s2 + $0x2c0] sm:$0xff]  ;;  %v1260_v4 = vld [vmem:[%s2748_s2 + $0x2c8] sm:$0xff]  ;;  %v1245_v7 = vld [vmem:[%s2748_s2 + $0x250] sm:$0xff] }
  0x25   : > { %1833 = vmatpush3.bf16.msra.mxu1 %v1832_v43  ;;  %1810 = vmatprep.subr.bf16.mxu0 %v2089_v3  ;;  %v1886_v43 = vpack.c.bf16 %v1236_v39, %v1235_v38  ;;  %v1246_v8 = vld [vmem:[%s2748_s2 + $0x258] sm:$0xff]  ;;  %v1261_v9 = vld [vmem:[%s2748_s2 + $0x2d0] sm:$0xff]  ;;  %v1247_v14 = vld [vmem:[%s2748_s2 + $0x260] sm:$0xff] }
  0x26   : > { %1834 = vmatprep.subr.bf16.mxu1 %v2089_v3  ;;  %v1262_v10 = vld [vmem:[%s2748_s2 + $0x2d8] sm:$0xff]  ;;  %v1248_v15 = vld [vmem:[%s2748_s2 + $0x268] sm:$0xff]  ;;  %v1263_v16 = vld [vmem:[%s2748_s2 + $0x2e0] sm:$0xff] }
  0x27   : > { %v1264_v17 = vld [vmem:[%s2748_s2 + $0x2e8] sm:$0xff]  ;;  %v1249_v20 = vld [vmem:[%s2748_s2 + $0x270] sm:$0xff]  ;;  %v1250_v21 = vld [vmem:[%s2748_s2 + $0x278] sm:$0xff] }
  0x28   : > { %1812 = vmatpush3.bf16.msra.mxu0 %v1811_v48  ;;  %v1253_v48 = vld [vmem:[%s2748_s2 + $0x290] sm:$0xff]  ;;  %v1266_v23 = vld [vmem:[%s2748_s2 + $0x2f8] sm:$0xff]  ;;  %v1268_v26 = vld [vmem:[%s2748_s2 + $0x300] sm:$0xff] }
  0x29   : > { %1836 = vmatpush3.bf16.msra.mxu1 %v1835_v49  ;;  %1837 = vmatprep.subr.bf16.mxu0 %v2089_v3  ;;  %v1254_v49 = vld [vmem:[%s2748_s2 + $0x298] sm:$0xff]  ;;  %v1265_v22 = vld [vmem:[%s2748_s2 + $0x2f0] sm:$0xff]  ;;  %v1269_v27 = vld [vmem:[%s2748_s2 + $0x308] sm:$0xff] }
  0x2a   : > { %1861 = vmatprep.subr.bf16.mxu1 %v2089_v3  ;;  %v1913_v51 = vpack.c.bf16 %v1254_v49, %v1253_v48  ;;  %v1284_v28 = vld [vmem:[%s2748_s2 + $0x380] sm:$0xff]  ;;  %v1285_v29 = vld [vmem:[%s2748_s2 + $0x388] sm:$0xff]  ;;  %v1934_v32 = vpack.c.bf16 %v1269_v27, %v1268_v26  ;;  %v1270_v34 = vld [vmem:[%s2748_s2 + $0x310] sm:$0xff] }
  0x2b   : > { %1507 = vmatmul.mubr.f32.vlgmr.msra.gmra.mrb[0].mxu0 %v246_v54  ;;  %v1255_v54 = vld [vmem:[%s2748_s2 + $0x2a0] sm:$0xff]  ;;  %v1958_v33 = vpack.c.bf16 %v1285_v29, %v1284_v28  ;;  %v1271_v35 = vld [vmem:[%s2748_s2 + $0x318] sm:$0xff]  ;;  %v1273_v41 = vld [vmem:[%s2748_s2 + $0x328] sm:$0xff] }
  0x2c   : > { %1542 = vmatmul.mubr.f32.vlgmr.msra.gmra.mrb[0].mxu1 %v2309_v56  ;;  %1839 = vmatpush3.bf16.msra.mxu0 %v1838_v55  ;;  %v1256_v55 = vld [vmem:[%s2748_s2 + $0x2a8] sm:$0xff]  ;;  %v1892_v56 = vpack.c.bf16 %v1240_v53, %v1239_v52  ;;  %v1937_v38 = vpack.c.bf16 %v1271_v35, %v1270_v34  ;;  %v1272_v40 = vld [vmem:[%s2748_s2 + $0x320] sm:$0xff]  ;;  %v1274_v46 = vld [vmem:[%s2748_s2 + $0x330] sm:$0xff] }
  0x2d   : > { %1863 = vmatpush3.bf16.msra.mxu1 %v1862_v57  ;;  %1840 = vmatprep.subr.bf16.mxu0 %v2089_v3  ;;  %v1916_v57 = vpack.c.bf16 %v1256_v55, %v1255_v54  ;;  %v1275_v47 = vld [vmem:[%s2748_s2 + $0x338] sm:$0xff]  ;;  %v1290_v48 = vld [vmem:[%s2748_s2 + $0x3b0] sm:$0xff]  ;;  %v1276_v52 = vld [vmem:[%s2748_s2 + $0x340] sm:$0xff] }
  0x2e   : > { %1864 = vmatprep.subr.bf16.mxu1 %v2089_v3  ;;  %1576 = vmatprep.mubr.msk.f32.mxu0 %vm2090_vm0, %v2091_v11  ;;  %v1291_v49 = vld [vmem:[%s2748_s2 + $0x3b8] sm:$0xff]  ;;  %v1277_v53 = vld [vmem:[%s2748_s2 + $0x348] sm:$0xff]  ;;  %v1292_v54 = vld [vmem:[%s2748_s2 + $0x3c0] sm:$0xff] }
  0x2f   : > { %1611 = vmatprep.mubr.msk.f32.mxu1 %vm2090_vm0, %v2091_v11  ;;  %v1293_v55 = vld [vmem:[%s2748_s2 + $0x3c8] sm:$0xff]  ;;  %v1307_v26 = vld [vmem:[%s2748_s2 + $0x438] sm:$0xff] }
  0x30   : > { %1842 = vmatpush3.bf16.msra.mxu0 %v1841_v62  ;;  %v1895_v62 = vpack.c.bf16 %v1242_v59, %v1241_v58  ;;  %v1278_v58 = vld [vmem:[%s2748_s2 + $0x350] sm:$0xff]  ;;  %v1279_v59 = vld [vmem:[%s2748_s2 + $0x358] sm:$0xff]  ;;  %v1309_v28 = vld [vmem:[%s2748_s2 + $0x448] sm:$0xff] }
  0x31   : > { %1866 = vmatpush3.bf16.msra.mxu1 %v1865_v63  ;;  %1843 = vmatprep.subr.bf16.mxu0 %v2089_v3  ;;  %v1919_v63 = vpack.c.bf16 %v1258_v61, %v1257_v60  ;;  %v1294_v60 = vld [vmem:[%s2748_s2 + $0x3d0] sm:$0xff]  ;;  %v1295_v61 = vld [vmem:[%s2748_s2 + $0x3d8] sm:$0xff]  ;;  %v1313_v34 = vld [vmem:[%s2748_s2 + $0x468] sm:$0xff] }
  0x32   : > { %1867 = vmatprep.subr.bf16.mxu1 %v2089_v3 }
  0x34   : > { %1845 = vmatpush3.bf16.msra.mxu0 %v1844_v5  ;;  %v1898_v5 = vpack.c.bf16 %v1244_v1, %v1243_v0  ;;  %v1280_v0 = vld [vmem:[%s2748_s2 + $0x360] sm:$0xff]  ;;  %v1281_v1 = vld [vmem:[%s2748_s2 + $0x368] sm:$0xff] }
  0x35   : > { %1869 = vmatpush3.bf16.msra.mxu1 %v1868_v6  ;;  %1846 = vmatprep.subr.bf16.mxu0 %v2089_v3  ;;  %v1922_v6 = vpack.c.bf16 %v1260_v4, %v1259_v2  ;;  %v1296_v2 = vld [vmem:[%s2748_s2 + $0x3e0] sm:$0xff]  ;;  %v1297_v4 = vld [vmem:[%s2748_s2 + $0x3e8] sm:$0xff] }
  0x36   : > { %1870 = vmatprep.subr.bf16.mxu1 %v2089_v3 }
  0x38   : > { %1848 = vmatpush3.bf16.msra.mxu0 %v1847_v12  ;;  %v1901_v12 = vpack.c.bf16 %v1246_v8, %v1245_v7  ;;  %v1282_v7 = vld [vmem:[%s2748_s2 + $0x370] sm:$0xff]  ;;  %v1283_v8 = vld [vmem:[%s2748_s2 + $0x378] sm:$0xff] }
  0x39   : > { %1872 = vmatpush3.bf16.msra.mxu1 %v1871_v13  ;;  %1849 = vmatprep.subr.bf16.mxu0 %v2089_v3  ;;  %v1925_v13 = vpack.c.bf16 %v1262_v10, %v1261_v9  ;;  %v1298_v9 = vld [vmem:[%s2748_s2 + $0x3f0] sm:$0xff]  ;;  %v1299_v10 = vld [vmem:[%s2748_s2 + $0x3f8] sm:$0xff] }
  0x3a   : > { %1873 = vmatprep.subr.bf16.mxu1 %v2089_v3 }
  0x3c   : > { %1851 = vmatpush3.bf16.msra.mxu0 %v1850_v18  ;;  %v1904_v18 = vpack.c.bf16 %v1248_v15, %v1247_v14  ;;  %v1300_v14 = vld [vmem:[%s2748_s2 + $0x400] sm:$0xff]  ;;  %v1301_v15 = vld [vmem:[%s2748_s2 + $0x408] sm:$0xff] }
  0x3d   : > { %1875 = vmatpush3.bf16.msra.mxu1 %v1874_v19  ;;  %1852 = vmatprep.subr.bf16.mxu0 %v2089_v3  ;;  %v1928_v19 = vpack.c.bf16 %v1264_v17, %v1263_v16  ;;  %v791_v16 = vld [vmem:[%s2250_s22] sm:$0xff]  ;;  %v1982_v17 = vpack.c.bf16 %v1301_v15, %v1300_v14 }
  0x3e   : > { %1876 = vmatprep.subr.bf16.mxu1 %v2089_v3 }
  0x40   : > { %1854 = vmatpush3.bf16.msra.mxu0 %v1853_v24  ;;  %v1907_v24 = vpack.c.bf16 %v1250_v21, %v1249_v20  ;;  %v1303_v20 = vld [vmem:[%s2748_s2 + $0x418] sm:$0xff] }
  0x41   : > { %1878 = vmatpush3.bf16.msra.mxu1 %v1877_v25  ;;  %1855 = vmatprep.subr.bf16.mxu0 %v2089_v3  ;;  %v1931_v25 = vpack.c.bf16 %v1266_v23, %v1265_v22  ;;  %v1304_v22 = vld [vmem:[%s2748_s2 + $0x420] sm:$0xff]  ;;  %v1305_v23 = vld [vmem:[%s2748_s2 + $0x428] sm:$0xff] }
  0x42   : > { %1879 = vmatprep.subr.bf16.mxu1 %v2089_v3 }
  0x44   : > { %1857 = vmatpush3.bf16.msra.mxu0 %v1856_v30  ;;  %v713_v30 = vrot.slane %v2436_v44, 1 }
  0x45   : > { %1881 = vmatpush3.bf16.msra.mxu1 %v1880_v31  ;;  %1858 = vmatprep.subr.bf16.mxu0 %v2089_v3  ;;  %v518_v31 = vld [vmem:[%s517_s13] sm:$0xff] }
  0x46   : > { %1882 = vmatprep.subr.bf16.mxu1 %v2089_v3 }
  0x48   : > { %1860 = vmatpush3.bf16.msra.mxu0 %v1859_v36  ;;  %v1286_v36 = vld [vmem:[%s2748_s2 + $0x390] sm:$0xff] }
  0x49   : > { %1884 = vmatpush3.bf16.msra.mxu1 %v1883_v37  ;;  %1885 = vmatprep.subr.bf16.mxu0 %v2089_v3  ;;  %v1287_v37 = vld [vmem:[%s2748_s2 + $0x398] sm:$0xff] }
  0x4a   : > { %1909 = vmatprep.subr.bf16.mxu1 %v2089_v3  ;;  %v1961_v39 = vpack.c.bf16 %v1287_v37, %v1286_v36  ;;  %v1314_v36 = vld [vmem:[%s2748_s2 + $0x470] sm:$0xff]  ;;  %v1315_v37 = vld [vmem:[%s2748_s2 + $0x478] sm:$0xff] }
  0x4b   : > { %1577 = vmatmul.mubr.f32.vlgmr.msra.gmra.mrb[2].mxu0 %v438_v42  ;;  %v1288_v42 = vld [vmem:[%s2748_s2 + $0x3a0] sm:$0xff] }
  0x4c   : > { %1887 = vmatpush3.bf16.msra.mxu0 %v1886_v43  ;;  %1612 = vmatmul.mubr.f32.vlgmr.msra.gmra.mrb[2].mxu1 %v2436_v44  ;;  %v1289_v43 = vld [vmem:[%s2748_s2 + $0x3a8] sm:$0xff]  ;;  %v1940_v44 = vpack.c.bf16 %v1273_v41, %v1272_v40 }
  0x4d   : > { %1911 = vmatpush3.bf16.msra.mxu1 %v1910_v45  ;;  %1888 = vmatprep.subr.bf16.mxu0 %v2089_v3  ;;  %v1964_v45 = vpack.c.bf16 %v1289_v43, %v1288_v42 }
  0x4e   : > { %1912 = vmatprep.subr.bf16.mxu1 %v2089_v3  ;;  %1646 = vmatprep.mubr.msk.f32.mxu0 %vm2090_vm0, %v2091_v11 }
  0x4f   : > { %1681 = vmatprep.mubr.msk.f32.mxu1 %vm2090_vm0, %v2091_v11 }
  0x50   : > { %1890 = vmatpush3.bf16.msra.mxu0 %v1889_v50  ;;  %v1943_v50 = vpack.c.bf16 %v1275_v47, %v1274_v46 }
  0x51   : > { %1914 = vmatpush3.bf16.msra.mxu1 %v1913_v51  ;;  %1891 = vmatprep.subr.bf16.mxu0 %v2089_v3  ;;  %v1967_v51 = vpack.c.bf16 %v1291_v49, %v1290_v48 }
  0x52   : > { %1915 = vmatprep.subr.bf16.mxu1 %v2089_v3 }
  0x54   : > { %1893 = vmatpush3.bf16.msra.mxu0 %v1892_v56  ;;  %v1946_v56 = vpack.c.bf16 %v1277_v53, %v1276_v52 }
  0x55   : > { %1917 = vmatpush3.bf16.msra.mxu1 %v1916_v57  ;;  %1894 = vmatprep.subr.bf16.mxu0 %v2089_v3  ;;  %v1970_v57 = vpack.c.bf16 %v1293_v55, %v1292_v54 }
  0x56   : > { %1918 = vmatprep.subr.bf16.mxu1 %v2089_v3 }
  0x58   : > { %1896 = vmatpush3.bf16.msra.mxu0 %v1895_v62  ;;  %v1949_v62 = vpack.c.bf16 %v1279_v59, %v1278_v58 }
  0x59   : > { %1920 = vmatpush3.bf16.msra.mxu1 %v1919_v63  ;;  %1897 = vmatprep.subr.bf16.mxu0 %v2089_v3  ;;  %v1973_v63 = vpack.c.bf16 %v1295_v61, %v1294_v60 }
  0x5a   : > { %1921 = vmatprep.subr.bf16.mxu1 %v2089_v3 }
  0x5c   : > { %1899 = vmatpush3.bf16.msra.mxu0 %v1898_v5  ;;  %v1952_v5 = vpack.c.bf16 %v1281_v1, %v1280_v0 }
  0x5d   : > { %1923 = vmatpush3.bf16.msra.mxu1 %v1922_v6  ;;  %1900 = vmatprep.subr.bf16.mxu0 %v2089_v3  ;;  %v1976_v6 = vpack.c.bf16 %v1297_v4, %v1296_v2 }
  0x5e   : > { %1924 = vmatprep.subr.bf16.mxu1 %v2089_v3 }
  0x60   : > { %1902 = vmatpush3.bf16.msra.mxu0 %v1901_v12  ;;  %v1955_v12 = vpack.c.bf16 %v1283_v8, %v1282_v7 }
  0x61   : > { %1926 = vmatpush3.bf16.msra.mxu1 %v1925_v13  ;;  %1903 = vmatprep.subr.bf16.mxu0 %v2089_v3  ;;  %v1979_v13 = vpack.c.bf16 %v1299_v10, %v1298_v9 }
  0x62   : > { %1927 = vmatprep.subr.bf16.mxu1 %v2089_v3 }
  0x64   : > { %1905 = vmatpush3.bf16.msra.mxu0 %v1904_v18  ;;  %v793_v18 = vld [vmem:[%s2253_s23] sm:$0xff] }
  0x65   : > { %1929 = vmatpush3.bf16.msra.mxu1 %v1928_v19  ;;  %1906 = vmatprep.subr.bf16.mxu0 %v2089_v3  ;;  %v1302_v19 = vld [vmem:[%s2748_s2 + $0x410] sm:$0xff] }
  0x66   : > { %1930 = vmatprep.subr.bf16.mxu1 %v2089_v3  ;;  %v1985_v21 = vpack.c.bf16 %v1303_v20, %v1302_v19 }
  0x68   : > { %1908 = vmatpush3.bf16.msra.mxu0 %v1907_v24  ;;  %v1988_v24 = vpack.c.bf16 %v1305_v23, %v1304_v22 }
  0x69   : > { %1932 = vmatpush3.bf16.msra.mxu1 %v1931_v25  ;;  %1933 = vmatprep.subr.bf16.mxu0 %v2089_v3  ;;  %v1306_v25 = vld [vmem:[%s2748_s2 + $0x430] sm:$0xff] }
  0x6a   : > { %1957 = vmatprep.subr.bf16.mxu1 %v2089_v3  ;;  %v1991_v27 = vpack.c.bf16 %v1307_v26, %v1306_v25 }
  0x6b   : > { %1647 = vmatmul.mubr.f32.vlgmr.msra.gmra.mrb[4].mxu0 %v518_v31  ;;  %v1311_v31 = vld [vmem:[%s2748_s2 + $0x458] sm:$0xff] }
  0x6c   : > { %1935 = vmatpush3.bf16.msra.mxu0 %v1934_v32  ;;  %1682 = vmatmul.mubr.f32.vlgmr.msra.gmra.mrb[4].mxu1 %v713_v30  ;;  %v1310_v30 = vld [vmem:[%s2748_s2 + $0x450] sm:$0xff] }
  0x6d   : > { %1959 = vmatpush3.bf16.msra.mxu1 %v1958_v33  ;;  %1936 = vmatprep.subr.bf16.mxu0 %v2089_v3  ;;  %v1997_v32 = vpack.c.bf16 %v1311_v31, %v1310_v30  ;;  %v1312_v33 = vld [vmem:[%s2748_s2 + $0x460] sm:$0xff] }
  0x6e   : > { %1960 = vmatprep.subr.bf16.mxu1 %v2089_v3  ;;  %1716 = vmatprep.mubr.msk.f32.mxu0 %vm2090_vm0, %v2091_v11  ;;  %v2000_v35 = vpack.c.bf16 %v1313_v34, %v1312_v33 }
  0x6f   : > { %1751 = vmatprep.mubr.msk.f32.mxu1 %vm2090_vm0, %v2091_v11 }
  0x70   : > { %1938 = vmatpush3.bf16.msra.mxu0 %v1937_v38  ;;  %v2003_v38 = vpack.c.bf16 %v1315_v37, %v1314_v36 }
  0x71   : > { %1962 = vmatpush3.bf16.msra.mxu1 %v1961_v39  ;;  %1939 = vmatprep.subr.bf16.mxu0 %v2089_v3  ;;  %v988_v39 = vrot.slane %v791_v16, 1 }
  0x72   : > { %1963 = vmatprep.subr.bf16.mxu1 %v2089_v3 }
  0x74   : > { %1941 = vmatpush3.bf16.msra.mxu0 %v1940_v44 }
  0x75   : > { %1965 = vmatpush3.bf16.msra.mxu1 %v1964_v45  ;;  %1942 = vmatprep.subr.bf16.mxu0 %v2089_v3 }
  0x76   : > { %1966 = vmatprep.subr.bf16.mxu1 %v2089_v3 }
  0x78   : > { %1944 = vmatpush3.bf16.msra.mxu0 %v1943_v50 }
  0x79   : > { %1968 = vmatpush3.bf16.msra.mxu1 %v1967_v51  ;;  %1945 = vmatprep.subr.bf16.mxu0 %v2089_v3 }
  0x7a   : > { %1969 = vmatprep.subr.bf16.mxu1 %v2089_v3 }
  0x7c   : > { %1947 = vmatpush3.bf16.msra.mxu0 %v1946_v56 }
  0x7d   : > { %1971 = vmatpush3.bf16.msra.mxu1 %v1970_v57  ;;  %1948 = vmatprep.subr.bf16.mxu0 %v2089_v3 }
  0x7e   : > { %1972 = vmatprep.subr.bf16.mxu1 %v2089_v3 }
  0x80   : > { %1950 = vmatpush3.bf16.msra.mxu0 %v1949_v62  ;;  %v1316_v62 = vld [vmem:[%s2749_s3] ss:$0 sm:$0xff] }
  0x81   : > { %1974 = vmatpush3.bf16.msra.mxu1 %v1973_v63  ;;  %1951 = vmatprep.subr.bf16.mxu0 %v2089_v3 }
  0x82   : > { %1975 = vmatprep.subr.bf16.mxu1 %v2089_v3 }
  0x84   : > { %1953 = vmatpush3.bf16.msra.mxu0 %v1952_v5 }
  0x85   : > { %1977 = vmatpush3.bf16.msra.mxu1 %v1976_v6  ;;  %1954 = vmatprep.subr.bf16.mxu0 %v2089_v3 }
  0x86   : > { %1978 = vmatprep.subr.bf16.mxu1 %v2089_v3 }
  0x88   : > { %1956 = vmatpush3.bf16.msra.mxu0 %v1955_v12 }
  0x89   : > { %1980 = vmatpush3.bf16.msra.mxu1 %v1979_v13  ;;  %1981 = vmatprep.subr.bf16.mxu0 %v2089_v3 }
  0x8b   : > { %1717 = vmatmul.mubr.f32.vlgmr.msra.gmra.mrb[6].mxu0 %v791_v16 }
  0x8c   : > { %1983 = vmatpush3.bf16.msra.mxu0 %v1982_v17  ;;  %1752 = vmatmul.mubr.f32.vlgmr.msra.gmra.mrb[6].mxu1 %v793_v18 }
  0x8d   : > { %1984 = vmatprep.subr.bf16.mxu0 %v2089_v3  ;;  %1786 = vmatprep.mubr.msk.f32.mxu0 %vm2090_vm0, %v2091_v11  ;;  %v1308_v11 = vld [vmem:[%s2748_s2 + $0x440] sm:$0xff] }
  0x8e   : > { %v1994_v29 = vpack.c.bf16 %v1309_v28, %v1308_v11 }
  0x90   : > { %1986 = vmatpush3.bf16.msra.mxu0 %v1985_v21 }
  0x91   : > { %1987 = vmatprep.subr.bf16.mxu0 %v2089_v3 }
  0x94   : > { %1989 = vmatpush3.bf16.msra.mxu0 %v1988_v24 }
  0x95   : > { %1990 = vmatprep.subr.bf16.mxu0 %v2089_v3 }
  0x98   : > { %1992 = vmatpush3.bf16.msra.mxu0 %v1991_v27 }
  0x99   : > { %1993 = vmatprep.subr.bf16.mxu0 %v2089_v3 }
  0x9c   : > { %1995 = vmatpush3.bf16.msra.mxu0 %v1994_v29 }
  0x9d   : > { %1996 = vmatprep.subr.bf16.mxu0 %v2089_v3 }
  0xa0   : > { %1998 = vmatpush3.bf16.msra.mxu0 %v1997_v32 }
  0xa1   : > { %1999 = vmatprep.subr.bf16.mxu0 %v2089_v3 }
  0xa4   : > { %2001 = vmatpush3.bf16.msra.mxu0 %v2000_v35 }
  0xa5   : > { %2002 = vmatprep.subr.bf16.mxu0 %v2089_v3 }
  0xa8   : > { %2004 = vmatpush3.bf16.msra.mxu0 %v2003_v38 }
  0xab   : > { %1787 = vmatmul.mubr.f32.vlgmr.msra.gmra.mrb[8].mxu0 %v988_v39 }
  0xfe   : > { %v346_v40 = vpop.f32.mrb[0].mxu0 }
  0xff   : > { %v1508_v41 = vpop.f32.mrb[1].mxu0  ;;  %v416_v42 = vpop.f32.mrb[0].mxu1 }
 0x100   : > { %v417_v43 = vadd.f32 %v416_v42, %v346_v40  ;;  %v1543_v44 = vpop.f32.mrb[1].mxu1 }
 0x11e   : > { %v506_v45 = vpop.f32.mrb[2].mxu0 }
 0x11f   : > { %v510_v46 = vadd.f32 %v506_v45, %v417_v43  ;;  %v1578_v47 = vpop.f32.mrb[3].mxu0  ;;  %v602_v48 = vpop.f32.mrb[2].mxu1 }
 0x120   : > { %v1613_v49 = vpop.f32.mrb[3].mxu1 }
 0x121   : > { %v606_v50 = vadd.f32 %v602_v48, %v510_v46 }
 0x13e   : > { %v690_v51 = vpop.f32.mrb[4].mxu0 }
 0x13f   : > { %v694_v52 = vadd.f32 %v690_v51, %v606_v50  ;;  %v1648_v3 = vpop.f32.mrb[5].mxu0  ;;  %v781_v53 = vpop.f32.mrb[4].mxu1 }
 0x140   : > { %v1683_v54 = vpop.f32.mrb[5].mxu1 }
 0x141   : > { %v785_v55 = vadd.f32 %v781_v53, %v694_v52 }
 0x15e   : > { %v877_v56 = vpop.f32.mrb[6].mxu0 }
 0x15f   : > { %v881_v57 = vadd.f32 %v877_v56, %v785_v55  ;;  %v1718_v58 = vpop.f32.mrb[7].mxu0  ;;  %v965_v59 = vpop.f32.mrb[6].mxu1 }
 0x160   : > { %v1753_v60 = vpop.f32.mrb[7].mxu1 }
 0x161   : > { %v969_v61 = vadd.f32 %v965_v59, %v881_v57 }
 0x17e   : > { %v1056_v63 = vpop.f32.mrb[8].mxu0 }
 0x17f   : > { %v1060_v0 = vadd.f32 %v1056_v63, %v969_v61  ;;  %v1788_v1 = vpop.f32.mrb[9].mxu0 }
 0x181   : > { %v1067_v2 = vadd.f32 %v1316_v62, %v1060_v0 }
 0x183   : > { %v1068_v4 = vmax.f32 %v1067_v2, 0.0 }
 0x185   : > { %1069 = vst [vmem:[%s237_s6] sm:$0x7f] %v1068_v4 }
 0x186 PF: > { %s14_s19 = sadd.s32 1, %s2087_s19   ;;  %s2751_s15 = smov %s2079_s17 }
 0x187   : > { %p11_p10 = scmp.ge.s32.totalorder %s14_s19, 16   ;;  %s2752_s16 = smov %s2083_s18 }
 0x188   : > { %s2753_s17 = smov %s2756_s20  ;;  %s2754_s18 = smov %s2760_s21 }
 0x189   :  { %13 = sbr.rel (!%p11_p10) target bundleno = 3 (0x3), region = 83 }

// kernel: _lambda_.8
= control target key start
LH: loop header
LB: loop body
LE: loop exit
PB: predicated region body
PF: predicated region fallthrough
CT: control target
= control target key end

     0   :  { %s7701_s12 = smov 0   ;;  %s7703_s13 = smov 0   ;;  %s8987_s0 = inlined_call_operand.vmem [shape: f32[2,18,18,128], index: 0, kind: input, shape index: {}]   ;;  %s8988_s1 = inlined_call_operand.vmem [shape: f32[9,128,128], index: 1, kind: input, shape index: {}]   ;;  %s8989_s2 = inlined_call_operand.vmem [shape: f32[1,128], index: 2, kind: input, shape index: {}]   ;;  %s8990_s3 = inlined_call_operand.vmem [shape: f32[2,16,16,128], index: 3, kind: output, shape index: {}]  }
   0x1   :  { %s7705_s14 = smov 0   ;;  %s7707_s15 = smov 0  }
   0x2   :  { %s7709_s16 = smov 0  }
   0x3 LB: > { %s22_s17 = sadd.s32 1, %s7671_s14  ;;  %s25_s18 = sadd.s32 1, %s7675_s15  ;;  %s7679_s16 = sphi %s7709_s16, %s13_s16   ;;  %s7675_s15 = sphi %s7707_s15, %s8995_s15   ;;  %s7671_s14 = sphi %s7705_s14, %s8994_s14   ;;  %s7667_s13 = sphi %s7703_s13, %s8993_s13   ;;  %s7663_s12 = sphi %s7701_s12, %s8992_s12  }
   0x4   : > { %p23_p0 = scmp.ge.s32.totalorder %s22_s17, 4  ;;  %p3948_p1 = scmp.ge.s32.totalorder %s7679_s16, 1 }
   0x5   : > { %p151_p2 = scmp.lt.s32.totalorder %s7679_s16, 9 }
   0x6   : > { %s8997_s17 = smov (%p23_p0, %s22_s17), 0  ;;  %s8999_s18 = smov (!%p23_p0, %s25_s18), %s7675_s15 }
   0x7   : > { %p152_p3 = pnand %p3948_p1, %p151_p2  ;;  %p27_p4 = scmp.ge.s32.totalorder %s8999_s18, 2 }
   0x8   : > { %v3955_v0 = vld [vmem:[%s8988_s1 + $0x80] sm:$0xff] (!%p152_p3)  ;;  %v3956_v1 = vld [vmem:[%s8988_s1 + $0x88] sm:$0xff] (!%p152_p3)  ;;  %v3957_v2 = vld [vmem:[%s8988_s1 + $0x90] sm:$0xff] (!%p152_p3)  ;;  %p180_p5 = scmp.lt.s32.totalorder (!%p152_p3), %s7667_s13, 1  ;;  %s7740_s25 = sshll.u32 (!%p152_p3), %s7663_s12, 2  ;;  %vm241_vm0 = vcmask (!%p152_p3), 1046528  }
   0x9   : > { %s9001_s18 = smov (%p27_p4, %s8999_s18), 0  ;;  %155 = sbr.rel (%p152_p3) target bundleno = 806 (0x326), region = 32 }
   0xa   : > { %v6384_v3 = vpack.c.bf16 (!%p152_p3), %v3956_v1, %v3955_v0  ;;  %v3958_v4 = vld [vmem:[%s8988_s1 + $0x98] sm:$0xff] (!%p152_p3)  ;;  %p198_p6 = scmp.lt.s32.totalorder (!%p152_p3), %s7740_s25, 17  ;;  %s501_s28 = sadd.s32 (!%p152_p3), 1, %s7740_s25  ;;  %v3959_v6 = vld [vmem:[%s8988_s1 + $0xa0] sm:$0xff] (!%p152_p3)  ;;  %v3960_v7 = vld [vmem:[%s8988_s1 + $0xa8] sm:$0xff] (!%p152_p3)  ;;  %vm416_vm1 = vcmask (!%p152_p3), 1045504  }
   0xb   : > { %v6388_v5 = vpack.c.bf16 (!%p152_p3), %v3958_v4, %v3957_v2  ;;  %p7757_p7 = scmp.lt.s32.totalorder (!%p152_p3), %s501_s28, 17  ;;  %v6392_v8 = vpack.c.bf16 (!%p152_p3), %v3960_v7, %v3959_v6  ;;  %v3961_v9 = vld [vmem:[%s8988_s1 + $0xb0] sm:$0xff] (!%p152_p3)  ;;  %v3962_v10 = vld [vmem:[%s8988_s1 + $0xb8] sm:$0xff] (!%p152_p3)  ;;  %v3963_v16 = vld [vmem:[%s8988_s1 + $0xc0] sm:$0xff] (!%p152_p3)  ;;  %s808_s21 = sadd.s32 (!%p152_p3), 2, %s7740_s25 }
   0xc   : > { %6385 = vmatprep.subr.bf16.mxu0 (!%p152_p3), %v6384_v3  ;;  %6673 = vmatprep.subr.bf16.mxu1 (!%p152_p3), %v6384_v3  ;;  %v6396_v13 = vpack.c.bf16 (!%p152_p3), %v3962_v10, %v3961_v9  ;;  %v3964_v17 = vld [vmem:[%s8988_s1 + $0xc8] sm:$0xff] (!%p152_p3)  ;;  %v3965_v22 = vld [vmem:[%s8988_s1 + $0xd0] sm:$0xff] (!%p152_p3)  ;;  %v3966_v23 = vld [vmem:[%s8988_s1 + $0xd8] sm:$0xff] (!%p152_p3)  ;;  %p809_p8 = scmp.lt.s32.totalorder (!%p152_p3), %s808_s21, 17  ;;  %s3531_s24 = sadd.s32 (!%p152_p3), 5, %s7740_s25 }
   0xd   : > { %6387 = vmatpush3.bf16.msra.mxu0 (!%p152_p3), %v6384_v3  ;;  %6675 = vmatpush3.bf16.msra.mxu1 (!%p152_p3), %v6384_v3  ;;  %v6400_v19 = vpack.c.bf16 (!%p152_p3), %v3964_v17, %v3963_v16  ;;  %v6404_v27 = vpack.c.bf16 (!%p152_p3), %v3966_v23, %v3965_v22  ;;  %v3967_v28 = vld [vmem:[%s8988_s1 + $0xe0] sm:$0xff] (!%p152_p3)  ;;  %v3968_v29 = vld [vmem:[%s8988_s1 + $0xe8] sm:$0xff] (!%p152_p3)  ;;  %v3969_v31 = vld [vmem:[%s8988_s1 + $0xf0] sm:$0xff] (!%p152_p3)  ;;  %p3532_p11 = scmp.lt.s32.totalorder (!%p152_p3), %s3531_s24, 17  ;;  %p188_p12 = scmp.lt.s32.totalorder (!%p152_p3), %s7740_s25, 15 }
   0xe   : > { %6389 = vmatprep.subr.bf16.mxu0 (!%p152_p3), %v6388_v5  ;;  %6677 = vmatprep.subr.bf16.mxu1 (!%p152_p3), %v6388_v5  ;;  %v6408_v30 = vpack.c.bf16 (!%p152_p3), %v3968_v29, %v3967_v28  ;;  %v3970_v32 = vld [vmem:[%s8988_s1 + $0xf8] sm:$0xff] (!%p152_p3)  ;;  %v205_v36 = vld [vmem:[%s8988_s1] sm:$0xff] (!%p152_p3)  ;;  %v206_v37 = vld [vmem:[%s8988_s1 + $0x8] sm:$0xff] (!%p152_p3) }
   0xf   : > { %v6412_v33 = vpack.c.bf16 (!%p152_p3), %v3970_v32, %v3969_v31  ;;  %v6416_v40 = vpack.c.bf16 (!%p152_p3), %v206_v37, %v205_v36  ;;  %v207_v41 = vld [vmem:[%s8988_s1 + $0x10] sm:$0xff] (!%p152_p3)  ;;  %v208_v42 = vld [vmem:[%s8988_s1 + $0x18] sm:$0xff] (!%p152_p3)  ;;  %v209_v48 = vld [vmem:[%s8988_s1 + $0x20] sm:$0xff] (!%p152_p3) }
  0x10   : > { %s9003_s13 = smov (!%p180_p5, %s7667_s13), 1  ;;  %s9005_s28 = smov (!%p7757_p7, %s501_s28), 17  ;;  %v6420_v46 = vpack.c.bf16 %v208_v42, %v207_v41  ;;  %v210_v49 = vld [vmem:[%s8988_s1 + $0x28] sm:$0xff]  ;;  %v211_v52 = vld [vmem:[%s8988_s1 + $0x30] sm:$0xff]  ;;  %v212_v53 = vld [vmem:[%s8988_s1 + $0x38] sm:$0xff] }
  0x11   : > { %s199_s6 = scalar_select %p198_p6, %s7740_s25, 17  ;;  %6391 = vmatpush3.bf16.msra.mxu0 %v6388_v5  ;;  %6679 = vmatpush3.bf16.msra.mxu1 %v6388_v5  ;;  %v6424_v51 = vpack.c.bf16 %v210_v49, %v209_v48  ;;  %v6428_v54 = vpack.c.bf16 %v212_v53, %v211_v52  ;;  %v213_v55 = vld [vmem:[%s8988_s1 + $0x40] sm:$0xff]  ;;  %v214_v56 = vld [vmem:[%s8988_s1 + $0x48] sm:$0xff]  ;;  %v215_v58 = vld [vmem:[%s8988_s1 + $0x50] sm:$0xff] }
  0x12   : > { %s7600_s7 = smul.u32 432, %s9003_s13  ;;  %6393 = vmatprep.subr.bf16.mxu0 %v6392_v8  ;;  %6681 = vmatprep.subr.bf16.mxu1 %v6392_v8  ;;  %v6432_v57 = vpack.c.bf16 %v214_v56, %v213_v55  ;;  %v216_v59 = vld [vmem:[%s8988_s1 + $0x58] sm:$0xff]  ;;  %v217_v61 = vld [vmem:[%s8988_s1 + $0x60] sm:$0xff]  ;;  %v218_v62 = vld [vmem:[%s8988_s1 + $0x68] sm:$0xff]  ;;  %s9007_s21 = smov (!%p809_p8, %s808_s21), 17 }
  0x13   : > { %s200_s9 = smul.u32 24, %s199_s6  ;;  %v6436_v60 = vpack.c.bf16 %v216_v59, %v215_v58  ;;  %v6440_v63 = vpack.c.bf16 %v218_v62, %v217_v61  ;;  %v219_v0 = vld [vmem:[%s8988_s1 + $0x70] sm:$0xff]  ;;  %v220_v1 = vld [vmem:[%s8988_s1 + $0x78] sm:$0xff]  ;;  %v3971_v3 = vld [vmem:[%s8988_s1 + $0x100] sm:$0xff]  ;;  %s1721_s6 = sadd.s32 3, %s7740_s25 }
  0x14   : > { %s7770_s22 = scalar_lea.vmem %s8987_s0, %s7600_s7  ;;  %s504_s30 = smul.u32 24, %s9005_s28  ;;  %v6444_v2 = vpack.c.bf16 %v220_v1, %v219_v0  ;;  %v3972_v4 = vld [vmem:[%s8988_s1 + $0x108] sm:$0xff]  ;;  %v3973_v6 = vld [vmem:[%s8988_s1 + $0x110] sm:$0xff]  ;;  %v3974_v7 = vld [vmem:[%s8988_s1 + $0x118] sm:$0xff] }
  0x15   : > { %s7773_s23 = scalar_lea.vmem %s7770_s22, %s200_s9  ;;  %6395 = vmatpush3.bf16.msra.mxu0 %v6392_v8  ;;  %6683 = vmatpush3.bf16.msra.mxu1 %v6392_v8  ;;  %v6448_v5 = vpack.c.bf16 %v3972_v4, %v3971_v3  ;;  %v3975_v16 = vld [vmem:[%s8988_s1 + $0x120] sm:$0xff]  ;;  %v3977_v23 = vld [vmem:[%s8988_s1 + $0x130] sm:$0xff]  ;;  %v3980_v28 = vld [vmem:[%s8988_s1 + $0x148] sm:$0xff]  ;;  %p1722_p9 = scmp.lt.s32.totalorder %s1721_s6, 17 }
  0x16   : > { %v7776_v11 = vld [vmem:[%s7773_s23] sm:$0xff]  ;;  %v7779_v12 = vld [vmem:[%s7773_s23 + $0x8] sm:$0xff]  ;;  %s7793_s4 = scalar_lea.vmem %s7770_s22, %s504_s30  ;;  %6397 = vmatprep.subr.bf16.mxu0 %v6396_v13  ;;  %6685 = vmatprep.subr.bf16.mxu1 %v6396_v13  ;;  %v7826_v34 = vld [vmem:[%s7773_s23 + $0x10] sm:$0x3]  ;;  %s9013_s24 = smov (!%p3532_p11, %s3531_s24), 17 }
  0x17   : > { %v242_v14 = vrot.slane %v7776_v11, 1  ;;  %v243_v15 = vrot.slane %v7779_v12, 1  ;;  %v7796_v20 = vld [vmem:[%s7793_s4] sm:$0xff]  ;;  %v7799_v21 = vld [vmem:[%s7793_s4 + $0x8] sm:$0xff]  ;;  %v7829_v35 = vld [vmem:[%s7793_s4 + $0x10] sm:$0x3] }
  0x18   : > { %v1165_v24 = vrot.slane %v7796_v20, 1  ;;  %v1166_v25 = vrot.slane %v7799_v21, 1  ;;  %v245_v38 = vrot.slane %v7826_v34, 1  ;;  %v1168_v39 = vrot.slane %v7829_v35, 1  ;;  %v7848_v45 = vld [vmem:[%s7793_s4 + $0x10] sm:$0x3] }
  0x19   : > { %v244_v18 = vsel %vm241_vm0, %v242_v14, %v243_v15  ;;  %6399 = vmatpush3.bf16.msra.mxu0 %v6396_v13  ;;  %6687 = vmatpush3.bf16.msra.mxu1 %v6396_v13  ;;  %v626_v47 = vrot.slane %v7848_v45, 1  ;;  %v417_v8 = vrot.slane %v7776_v11, 2  ;;  %v418_v9 = vrot.slane %v7779_v12, 2  ;;  %v3982_v31 = vld [vmem:[%s8988_s1 + $0x158] sm:$0xff]  ;;  %v3984_v36 = vld [vmem:[%s8988_s1 + $0x168] sm:$0xff]  ;;  %v3987_v41 = vld [vmem:[%s8988_s1 + $0x180] sm:$0xff] }
  0x1a   : > { %5156 = vmatprep.mubr.f32.mxu0 %v244_v18  ;;  %v7810_v26 = vsel %vm241_vm0, %v1165_v24, %v1166_v25  ;;  %6401 = vmatprep.subr.bf16.mxu0 %v6400_v19  ;;  %v246_v43 = vsel %vm241_vm0, %v243_v15, %v245_v38  ;;  %v1169_v44 = vsel %vm241_vm0, %v1166_v25, %v1168_v39  ;;  %v1338_v10 = vrot.slane %v7796_v20, 2  ;;  %v3978_v24 = vld [vmem:[%s8988_s1 + $0x138] sm:$0xff]  ;;  %v3985_v38 = vld [vmem:[%s8988_s1 + $0x170] sm:$0xff]  ;;  %v3988_v42 = vld [vmem:[%s8988_s1 + $0x188] sm:$0xff]  ;;  %s811_s4 = smul.u32 24, %s9007_s21  ;;  %s9009_s6 = smov (!%p1722_p9, %s1721_s6), 17 }
  0x1b   : > { %6689 = vmatprep.subr.bf16.mxu1 %v6400_v19  ;;  %5471 = vmatprep.mubr.f32.mxu1 %v7810_v26  ;;  %v7858_v50 = vsel %vm241_vm0, %v1166_v25, %v626_v47  ;;  %v7908_v13 = vrot.slane %v7799_v21, 2  ;;  %v6452_v14 = vpack.c.bf16 %v3974_v7, %v3973_v6  ;;  %v727_v15 = vrot.slane %v7848_v45, 2  ;;  %v3986_v39 = vld [vmem:[%s8988_s1 + $0x178] sm:$0xff]  ;;  %v3991_v49 = vld [vmem:[%s8988_s1 + $0x1a0] sm:$0xff]  ;;  %v3993_v53 = vld [vmem:[%s8988_s1 + $0x1b0] sm:$0xff]  ;;  %s1724_s27 = smul.u32 24, %s9009_s6 }
  0x1c   : > { %v419_v17 = vsel %vm416_vm1, %v417_v8, %v418_v9  ;;  %v6460_v25 = vpack.c.bf16 %v3978_v24, %v3977_v23  ;;  %v6480_v45 = vpack.c.bf16 %v3988_v42, %v3987_v41  ;;  %v3990_v47 = vld [vmem:[%s8988_s1 + $0x198] sm:$0xff]  ;;  %s7982_s20 = scalar_lea.vmem %s7770_s22, %s811_s4  ;;  %v3995_v56 = vld [vmem:[%s8988_s1 + $0x1c0] sm:$0xff]  ;;  %v3997_v58 = vld [vmem:[%s8988_s1 + $0x1d0] sm:$0xff]  ;;  %s3534_s11 = smul.u32 24, %s9013_s24 }
  0x1d   : > { %6403 = vmatpush3.bf16.msra.mxu0 %v6400_v19  ;;  %6691 = vmatpush3.bf16.msra.mxu1 %v6400_v19  ;;  %v7924_v18 = vsel %vm416_vm1, %v1338_v10, %v7908_v13  ;;  %v7928_v19 = vsel %vm416_vm1, %v7908_v13, %v727_v15  ;;  %v3998_v59 = vld [vmem:[%s8988_s1 + $0x1d8] sm:$0xff]  ;;  %v3999_v61 = vld [vmem:[%s8988_s1 + $0x1e0] sm:$0xff]  ;;  %v4000_v62 = vld [vmem:[%s8988_s1 + $0x1e8] sm:$0xff]  ;;  %s8170_s28 = scalar_lea.vmem %s7770_s22, %s1724_s27  ;;  %s3952_s21 = sshll.u32 %s9003_s13, 5 }
  0x1e   : > { %6405 = vmatprep.subr.bf16.mxu0 %v6404_v27  ;;  %6693 = vmatprep.subr.bf16.mxu1 %v6404_v27  ;;  %v4001_v0 = vld [vmem:[%s8988_s1 + $0x1f0] sm:$0xff]  ;;  %v4002_v1 = vld [vmem:[%s8988_s1 + $0x1f8] sm:$0xff]  ;;  %v4003_v3 = vld [vmem:[%s8988_s1 + $0x200] sm:$0xff]  ;;  %s8767_s24 = scalar_lea.vmem %s7770_s22, %s3534_s11 }
  0x1f   : > { %v4004_v4 = vld [vmem:[%s8988_s1 + $0x208] sm:$0xff]  ;;  %v4005_v7 = vld [vmem:[%s8988_s1 + $0x210] sm:$0xff]  ;;  %v4006_v8 = vld [vmem:[%s8988_s1 + $0x218] sm:$0xff] }
  0x20   : > { %v8032_v6 = vld [vmem:[%s7982_s20 + $0x8] sm:$0xff]  ;;  %v4011_v23 = vld [vmem:[%s8988_s1 + $0x240] sm:$0xff]  ;;  %v4021_v42 = vld [vmem:[%s8988_s1 + $0x290] sm:$0xff] }
  0x21   : > { %6407 = vmatpush3.bf16.msra.mxu0 %v6404_v27  ;;  %6695 = vmatpush3.bf16.msra.mxu1 %v6404_v27  ;;  %v3979_v27 = vld [vmem:[%s8988_s1 + $0x140] sm:$0xff]  ;;  %v8042_v10 = vrot.slane %v8032_v6, 1  ;;  %v4008_v15 = vld [vmem:[%s8988_s1 + $0x228] sm:$0xff] }
  0x22   : > { %6409 = vmatprep.subr.bf16.mxu0 %v6408_v30  ;;  %6697 = vmatprep.subr.bf16.mxu1 %v6408_v30  ;;  %v6464_v29 = vpack.c.bf16 %v3980_v28, %v3979_v27  ;;  %v4012_v24 = vld [vmem:[%s8988_s1 + $0x248] sm:$0xff]  ;;  %v4014_v27 = vld [vmem:[%s8988_s1 + $0x258] sm:$0xff] }
  0x25   : > { %6411 = vmatpush3.bf16.msra.mxu0 %v6408_v30  ;;  %6699 = vmatpush3.bf16.msra.mxu1 %v6408_v30  ;;  %v3981_v30 = vld [vmem:[%s8988_s1 + $0x150] sm:$0xff] }
  0x26   : > { %6413 = vmatprep.subr.bf16.mxu0 %v6412_v33  ;;  %6701 = vmatprep.subr.bf16.mxu1 %v6412_v33  ;;  %v6468_v32 = vpack.c.bf16 %v3982_v31, %v3981_v30  ;;  %v4016_v30 = vld [vmem:[%s8988_s1 + $0x268] sm:$0xff] }
  0x29   : > { %6415 = vmatpush3.bf16.msra.mxu0 %v6412_v33  ;;  %6703 = vmatpush3.bf16.msra.mxu1 %v6412_v33  ;;  %v3983_v33 = vld [vmem:[%s8988_s1 + $0x160] sm:$0xff] }
  0x2a   : > { %6417 = vmatprep.subr.bf16.mxu0 %v6416_v40  ;;  %6705 = vmatprep.subr.bf16.mxu1 %v6416_v40  ;;  %v6472_v37 = vpack.c.bf16 %v3984_v36, %v3983_v33  ;;  %v4018_v33 = vld [vmem:[%s8988_s1 + $0x278] sm:$0xff] }
  0x2c   : > { %5157 = vmatmul.mubr.f32.vlgmr.msra.gmra.mrb[0].mxu0 %v246_v43  ;;  %5472 = vmatmul.mubr.f32.vlgmr.msra.gmra.mrb[0].mxu1 %v1169_v44  ;;  %v420_v43 = vrot.slane %v7826_v34, 2  ;;  %v1341_v44 = vrot.slane %v7829_v35, 2 }
  0x2d   : > { %6419 = vmatpush3.bf16.msra.mxu0 %v6416_v40  ;;  %6707 = vmatpush3.bf16.msra.mxu1 %v6416_v40  ;;  %v6476_v40 = vpack.c.bf16 %v3986_v39, %v3985_v38  ;;  %v4019_v38 = vld [vmem:[%s8988_s1 + $0x280] sm:$0xff]  ;;  %v4020_v39 = vld [vmem:[%s8988_s1 + $0x288] sm:$0xff] }
  0x2e   : > { %6421 = vmatprep.subr.bf16.mxu0 %v6420_v46  ;;  %6709 = vmatprep.subr.bf16.mxu1 %v6420_v46  ;;  %v421_v34 = vsel %vm416_vm1, %v418_v9, %v420_v43  ;;  %v1342_v35 = vsel %vm416_vm1, %v7908_v13, %v1341_v44  ;;  %v6516_v13 = vpack.c.bf16 %v4006_v8, %v4005_v7  ;;  %v4022_v43 = vld [vmem:[%s8988_s1 + $0x298] sm:$0xff]  ;;  %v4039_v8 = vld [vmem:[%s8988_s1 + $0x320] sm:$0xff] }
  0x2f   : > { %5191 = vmatprep.mubr.f32.mxu0 %v7776_v11  ;;  %5506 = vmatprep.mubr.f32.mxu1 %v7796_v20  ;;  %v3976_v11 = vld [vmem:[%s8988_s1 + $0x128] sm:$0xff]  ;;  %v6544_v41 = vpack.c.bf16 %v4020_v39, %v4019_v38  ;;  %v4054_v38 = vld [vmem:[%s8988_s1 + $0x398] sm:$0xff] }
  0x30   : > { %v6456_v22 = vpack.c.bf16 %v3976_v11, %v3975_v16 }
  0x31   : > { %6423 = vmatpush3.bf16.msra.mxu0 %v6420_v46  ;;  %6711 = vmatpush3.bf16.msra.mxu1 %v6420_v46  ;;  %v3989_v46 = vld [vmem:[%s8988_s1 + $0x190] sm:$0xff] }
  0x32   : > { %6425 = vmatprep.subr.bf16.mxu0 %v6424_v51  ;;  %6713 = vmatprep.subr.bf16.mxu1 %v6424_v51  ;;  %v6484_v48 = vpack.c.bf16 %v3990_v47, %v3989_v46  ;;  %v6548_v47 = vpack.c.bf16 %v4022_v43, %v4021_v42  ;;  %v4055_v42 = vld [vmem:[%s8988_s1 + $0x3a0] sm:$0xff]  ;;  %v4056_v43 = vld [vmem:[%s8988_s1 + $0x3a8] sm:$0xff] }
  0x35   : > { %6427 = vmatpush3.bf16.msra.mxu0 %v6424_v51  ;;  %6715 = vmatpush3.bf16.msra.mxu1 %v6424_v51  ;;  %v3992_v51 = vld [vmem:[%s8988_s1 + $0x1a8] sm:$0xff] }
  0x36   : > { %6429 = vmatprep.subr.bf16.mxu0 %v6428_v54  ;;  %6717 = vmatprep.subr.bf16.mxu1 %v6428_v54  ;;  %v6488_v52 = vpack.c.bf16 %v3992_v51, %v3991_v49  ;;  %v4025_v51 = vld [vmem:[%s8988_s1 + $0x2b0] sm:$0xff] }
  0x39   : > { %6431 = vmatpush3.bf16.msra.mxu0 %v6428_v54  ;;  %6719 = vmatpush3.bf16.msra.mxu1 %v6428_v54  ;;  %v3994_v54 = vld [vmem:[%s8988_s1 + $0x1b8] sm:$0xff] }
  0x3a   : > { %6433 = vmatprep.subr.bf16.mxu0 %v6432_v57  ;;  %6721 = vmatprep.subr.bf16.mxu1 %v6432_v57  ;;  %v6492_v55 = vpack.c.bf16 %v3994_v54, %v3993_v53  ;;  %v4027_v53 = vld [vmem:[%s8988_s1 + $0x2c0] sm:$0xff]  ;;  %v4028_v54 = vld [vmem:[%s8988_s1 + $0x2c8] sm:$0xff] }
  0x3d   : > { %6435 = vmatpush3.bf16.msra.mxu0 %v6432_v57  ;;  %6723 = vmatpush3.bf16.msra.mxu1 %v6432_v57  ;;  %v3996_v57 = vld [vmem:[%s8988_s1 + $0x1c8] sm:$0xff] }
  0x3e   : > { %6437 = vmatprep.subr.bf16.mxu0 %v6436_v60  ;;  %6725 = vmatprep.subr.bf16.mxu1 %v6436_v60 }
  0x41   : > { %6439 = vmatpush3.bf16.msra.mxu0 %v6436_v60  ;;  %6727 = vmatpush3.bf16.msra.mxu1 %v6436_v60  ;;  %v6500_v60 = vpack.c.bf16 %v3998_v59, %v3997_v58  ;;  %v4032_v58 = vld [vmem:[%s8988_s1 + $0x2e8] sm:$0xff] }
  0x42   : > { %6441 = vmatprep.subr.bf16.mxu0 %v6440_v63  ;;  %6729 = vmatprep.subr.bf16.mxu1 %v6440_v63 }
  0x45   : > { %6443 = vmatpush3.bf16.msra.mxu0 %v6440_v63  ;;  %6731 = vmatpush3.bf16.msra.mxu1 %v6440_v63  ;;  %v6504_v63 = vpack.c.bf16 %v4000_v62, %v3999_v61  ;;  %v4034_v61 = vld [vmem:[%s8988_s1 + $0x2f8] sm:$0xff] }
  0x46   : > { %6445 = vmatprep.subr.bf16.mxu0 %v6444_v2  ;;  %6733 = vmatprep.subr.bf16.mxu1 %v6444_v2 }
  0x49   : > { %6447 = vmatpush3.bf16.msra.mxu0 %v6444_v2  ;;  %6735 = vmatpush3.bf16.msra.mxu1 %v6444_v2  ;;  %v6508_v2 = vpack.c.bf16 %v4002_v1, %v4001_v0  ;;  %v4036_v0 = vld [vmem:[%s8988_s1 + $0x308] sm:$0xff] }
  0x4a   : > { %6449 = vmatprep.subr.bf16.mxu0 %v6448_v5  ;;  %6737 = vmatprep.subr.bf16.mxu1 %v6448_v5 }
  0x4c   : > { %5192 = vmatmul.mubr.f32.vlgmr.msra.gmra.mrb[0].mxu0 %v7779_v12  ;;  %5507 = vmatmul.mubr.f32.vlgmr.msra.gmra.mrb[0].mxu1 %v7799_v21  ;;  %v7991_v12 = vld [vmem:[%s7982_s20] sm:$0xff] }
  0x4d   : > { %6451 = vmatpush3.bf16.msra.mxu0 %v6448_v5  ;;  %6739 = vmatpush3.bf16.msra.mxu1 %v6448_v5  ;;  %v6512_v5 = vpack.c.bf16 %v4004_v4, %v4003_v3  ;;  %v1537_v9 = vrot.slane %v7991_v12, 1  ;;  %v1637_v44 = vrot.slane %v7991_v12, 2  ;;  %v4037_v3 = vld [vmem:[%s8988_s1 + $0x310] sm:$0xff]  ;;  %v4038_v4 = vld [vmem:[%s8988_s1 + $0x318] sm:$0xff] }
  0x4e   : > { %6453 = vmatprep.subr.bf16.mxu0 %v6452_v14  ;;  %6741 = vmatprep.subr.bf16.mxu1 %v6452_v14  ;;  %v6580_v7 = vpack.c.bf16 %v4038_v4, %v4037_v3  ;;  %v8302_v4 = vld [vmem:[%s7982_s20] sm:$0xff] }
  0x4f   : > { %5226 = vmatprep.mubr.f32.mxu0 %v419_v17  ;;  %5541 = vmatprep.mubr.f32.mxu1 %v7924_v18  ;;  %v8054_v16 = vsel %vm241_vm0, %v1537_v9, %v8042_v10  ;;  %v4009_v17 = vld [vmem:[%s8988_s1 + $0x230] sm:$0xff]  ;;  %v4040_v9 = vld [vmem:[%s8988_s1 + $0x328] sm:$0xff] }
  0x51   : > { %6455 = vmatpush3.bf16.msra.mxu0 %v6452_v14  ;;  %6743 = vmatpush3.bf16.msra.mxu1 %v6452_v14  ;;  %v4007_v14 = vld [vmem:[%s8988_s1 + $0x220] sm:$0xff] }
  0x52   : > { %6457 = vmatprep.subr.bf16.mxu0 %v6456_v22  ;;  %6745 = vmatprep.subr.bf16.mxu1 %v6456_v22  ;;  %v6520_v11 = vpack.c.bf16 %v4008_v15, %v4007_v14  ;;  %v6584_v14 = vpack.c.bf16 %v4040_v9, %v4039_v8  ;;  %v4041_v15 = vld [vmem:[%s8988_s1 + $0x330] sm:$0xff] }
  0x53   : > { %v8312_v9 = vld [vmem:[%s7982_s20 + $0x10] sm:$0x3] }
  0x55   : > { %6459 = vmatpush3.bf16.msra.mxu0 %v6456_v22  ;;  %6747 = vmatpush3.bf16.msra.mxu1 %v6456_v22  ;;  %v4010_v22 = vld [vmem:[%s8988_s1 + $0x238] sm:$0xff] }
  0x56   : > { %6461 = vmatprep.subr.bf16.mxu0 %v6460_v25  ;;  %6749 = vmatprep.subr.bf16.mxu1 %v6460_v25 }
  0x59   : > { %6463 = vmatpush3.bf16.msra.mxu0 %v6460_v25  ;;  %6751 = vmatpush3.bf16.msra.mxu1 %v6460_v25  ;;  %v4013_v25 = vld [vmem:[%s8988_s1 + $0x250] sm:$0xff] }
  0x5a   : > { %6465 = vmatprep.subr.bf16.mxu0 %v6464_v29  ;;  %6753 = vmatprep.subr.bf16.mxu1 %v6464_v29  ;;  %v6532_v28 = vpack.c.bf16 %v4014_v27, %v4013_v25  ;;  %v4048_v25 = vld [vmem:[%s8988_s1 + $0x368] sm:$0xff] }
  0x5d   : > { %6467 = vmatpush3.bf16.msra.mxu0 %v6464_v29  ;;  %6755 = vmatpush3.bf16.msra.mxu1 %v6464_v29  ;;  %v4015_v29 = vld [vmem:[%s8988_s1 + $0x260] sm:$0xff] }
  0x5e   : > { %6469 = vmatprep.subr.bf16.mxu0 %v6468_v32  ;;  %6757 = vmatprep.subr.bf16.mxu1 %v6468_v32  ;;  %v6536_v31 = vpack.c.bf16 %v4016_v30, %v4015_v29  ;;  %v4050_v29 = vld [vmem:[%s8988_s1 + $0x378] sm:$0xff] }
  0x61   : > { %6471 = vmatpush3.bf16.msra.mxu0 %v6468_v32  ;;  %6759 = vmatpush3.bf16.msra.mxu1 %v6468_v32  ;;  %v4017_v32 = vld [vmem:[%s8988_s1 + $0x270] sm:$0xff] }
  0x62   : > { %6473 = vmatprep.subr.bf16.mxu0 %v6472_v37  ;;  %6761 = vmatprep.subr.bf16.mxu1 %v6472_v37  ;;  %v6540_v36 = vpack.c.bf16 %v4018_v33, %v4017_v32  ;;  %v4052_v32 = vld [vmem:[%s8988_s1 + $0x388] sm:$0xff] }
  0x65   : > { %6475 = vmatpush3.bf16.msra.mxu0 %v6472_v37  ;;  %6763 = vmatpush3.bf16.msra.mxu1 %v6472_v37  ;;  %v8089_v37 = vld [vmem:[%s7982_s20 + $0x10] sm:$0x3] }
  0x66   : > { %6477 = vmatprep.subr.bf16.mxu0 %v6476_v40  ;;  %6765 = vmatprep.subr.bf16.mxu1 %v6476_v40  ;;  %v1640_v1 = vrot.slane %v8089_v37, 2 }
  0x69   : > { %6479 = vmatpush3.bf16.msra.mxu0 %v6476_v40  ;;  %6767 = vmatpush3.bf16.msra.mxu1 %v6476_v40  ;;  %v1540_v40 = vrot.slane %v8089_v37, 1  ;;  %v4053_v37 = vld [vmem:[%s8988_s1 + $0x390] sm:$0xff] }
  0x6a   : > { %6481 = vmatprep.subr.bf16.mxu0 %v6480_v45  ;;  %6769 = vmatprep.subr.bf16.mxu1 %v6480_v45 }
  0x6b   : > { %v1541_v46 = vsel %vm241_vm0, %v8042_v10, %v1540_v40 }
  0x6c   : > { %5227 = vmatmul.mubr.f32.vlgmr.msra.gmra.mrb[0].mxu0 %v421_v34  ;;  %5542 = vmatmul.mubr.f32.vlgmr.msra.gmra.mrb[0].mxu1 %v1342_v35  ;;  %v4023_v34 = vld [vmem:[%s8988_s1 + $0x2a0] sm:$0xff]  ;;  %v4024_v35 = vld [vmem:[%s8988_s1 + $0x2a8] sm:$0xff] }
  0x6d   : > { %6483 = vmatpush3.bf16.msra.mxu0 %v6480_v45  ;;  %6771 = vmatpush3.bf16.msra.mxu1 %v6480_v45  ;;  %v8106_v45 = vrot.slane %v8032_v6, 2  ;;  %v6552_v49 = vpack.c.bf16 %v4024_v35, %v4023_v34  ;;  %v4058_v34 = vld [vmem:[%s8988_s1 + $0x3b8] sm:$0xff]  ;;  %v4059_v35 = vld [vmem:[%s8988_s1 + $0x3c0] sm:$0xff] }
  0x6e   : > { %6485 = vmatprep.subr.bf16.mxu0 %v6484_v48  ;;  %6773 = vmatprep.subr.bf16.mxu1 %v6484_v48 }
  0x6f   : > { %5261 = vmatprep.mubr.f32.mxu0 %v7796_v20  ;;  %5576 = vmatprep.mubr.f32.mxu1 %v7991_v12  ;;  %v6496_v20 = vpack.c.bf16 %v3996_v57, %v3995_v56  ;;  %v4030_v56 = vld [vmem:[%s8988_s1 + $0x2d8] sm:$0xff] }
  0x71   : > { %6487 = vmatpush3.bf16.msra.mxu0 %v6484_v48  ;;  %6775 = vmatpush3.bf16.msra.mxu1 %v6484_v48  ;;  %v8119_v48 = vsel %vm416_vm1, %v1637_v44, %v8106_v45 }
  0x72   : > { %6489 = vmatprep.subr.bf16.mxu0 %v6488_v52  ;;  %6777 = vmatprep.subr.bf16.mxu1 %v6488_v52 }
  0x75   : > { %6491 = vmatpush3.bf16.msra.mxu0 %v6488_v52  ;;  %6779 = vmatpush3.bf16.msra.mxu1 %v6488_v52  ;;  %v4026_v52 = vld [vmem:[%s8988_s1 + $0x2b8] sm:$0xff] }
  0x76   : > { %6493 = vmatprep.subr.bf16.mxu0 %v6492_v55  ;;  %6781 = vmatprep.subr.bf16.mxu1 %v6492_v55 }
  0x79   : > { %6495 = vmatpush3.bf16.msra.mxu0 %v6492_v55  ;;  %6783 = vmatpush3.bf16.msra.mxu1 %v6492_v55  ;;  %v4029_v55 = vld [vmem:[%s8988_s1 + $0x2d0] sm:$0xff] }
  0x7a   : > { %6497 = vmatprep.subr.bf16.mxu0 %v6496_v20  ;;  %6785 = vmatprep.subr.bf16.mxu1 %v6496_v20  ;;  %v6564_v57 = vpack.c.bf16 %v4030_v56, %v4029_v55  ;;  %v4065_v55 = vld [vmem:[%s8988_s1 + $0x3f0] sm:$0xff]  ;;  %v4066_v56 = vld [vmem:[%s8988_s1 + $0x3f8] sm:$0xff] }
  0x7d   : > { %6499 = vmatpush3.bf16.msra.mxu0 %v6496_v20  ;;  %6787 = vmatpush3.bf16.msra.mxu1 %v6496_v20  ;;  %v4031_v20 = vld [vmem:[%s8988_s1 + $0x2e0] sm:$0xff] }
  0x7e   : > { %6501 = vmatprep.subr.bf16.mxu0 %v6500_v60  ;;  %6789 = vmatprep.subr.bf16.mxu1 %v6500_v60  ;;  %v6568_v59 = vpack.c.bf16 %v4032_v58, %v4031_v20  ;;  %v8278_v20 = vld [vmem:[%s7982_s20 + $0x10] sm:$0x3] }
  0x7f   : > { %v8281_v58 = vld [vmem:[%s8170_s28 + $0x10] sm:$0x3] }
  0x81   : > { %6503 = vmatpush3.bf16.msra.mxu0 %v6500_v60  ;;  %6791 = vmatpush3.bf16.msra.mxu1 %v6500_v60  ;;  %v4033_v60 = vld [vmem:[%s8988_s1 + $0x2f0] sm:$0xff] }
  0x82   : > { %6505 = vmatprep.subr.bf16.mxu0 %v6504_v63  ;;  %6793 = vmatprep.subr.bf16.mxu1 %v6504_v63  ;;  %v6572_v62 = vpack.c.bf16 %v4034_v61, %v4033_v60  ;;  %v4068_v60 = vld [vmem:[%s8988_s1 + $0x408] sm:$0xff]  ;;  %v933_v61 = vrot.slane %v8278_v20, 1 }
  0x85   : > { %6507 = vmatpush3.bf16.msra.mxu0 %v6504_v63  ;;  %6795 = vmatpush3.bf16.msra.mxu1 %v6504_v63  ;;  %v4035_v63 = vld [vmem:[%s8988_s1 + $0x300] sm:$0xff] }
  0x86   : > { %6509 = vmatprep.subr.bf16.mxu0 %v6508_v2  ;;  %6797 = vmatprep.subr.bf16.mxu1 %v6508_v2 }
  0x89   : > { %6511 = vmatpush3.bf16.msra.mxu0 %v6508_v2  ;;  %6799 = vmatpush3.bf16.msra.mxu1 %v6508_v2  ;;  %v6576_v2 = vpack.c.bf16 %v4036_v0, %v4035_v63  ;;  %v4069_v0 = vld [vmem:[%s8988_s1 + $0x410] sm:$0xff] }
  0x8a   : > { %6513 = vmatprep.subr.bf16.mxu0 %v6512_v5  ;;  %6801 = vmatprep.subr.bf16.mxu1 %v6512_v5 }
  0x8c   : > { %5262 = vmatmul.mubr.f32.vlgmr.msra.gmra.mrb[0].mxu0 %v7799_v21  ;;  %5577 = vmatmul.mubr.f32.vlgmr.msra.gmra.mrb[0].mxu1 %v8032_v6  ;;  %v6524_v21 = vpack.c.bf16 %v4010_v22, %v4009_v17  ;;  %v4043_v17 = vld [vmem:[%s8988_s1 + $0x340] sm:$0xff]  ;;  %v4044_v22 = vld [vmem:[%s8988_s1 + $0x348] sm:$0xff] }
  0x8d   : > { %6515 = vmatpush3.bf16.msra.mxu0 %v6512_v5  ;;  %6803 = vmatpush3.bf16.msra.mxu1 %v6512_v5  ;;  %v1641_v5 = vsel %vm416_vm1, %v8106_v45, %v1640_v1  ;;  %v4070_v1 = vld [vmem:[%s8988_s1 + $0x418] sm:$0xff] }
  0x8e   : > { %6517 = vmatprep.subr.bf16.mxu0 %v6516_v13  ;;  %6805 = vmatprep.subr.bf16.mxu1 %v6516_v13 }
  0x8f   : > { %5296 = vmatprep.mubr.f32.mxu0 %v7810_v26  ;;  %5611 = vmatprep.mubr.f32.mxu1 %v8054_v16  ;;  %v6528_v26 = vpack.c.bf16 %v4012_v24, %v4011_v23  ;;  %v4046_v23 = vld [vmem:[%s8988_s1 + $0x358] sm:$0xff] }
  0x91   : > { %6519 = vmatpush3.bf16.msra.mxu0 %v6516_v13  ;;  %6807 = vmatpush3.bf16.msra.mxu1 %v6516_v13  ;;  %v8180_v13 = vld [vmem:[%s8170_s28] sm:$0xff] }
  0x92   : > { %6521 = vmatprep.subr.bf16.mxu0 %v6520_v11  ;;  %6809 = vmatprep.subr.bf16.mxu1 %v6520_v11  ;;  %v1841_v39 = vrot.slane %v8180_v13, 1 }
  0x95   : > { %6523 = vmatpush3.bf16.msra.mxu0 %v6520_v11  ;;  %6811 = vmatpush3.bf16.msra.mxu1 %v6520_v11  ;;  %v4042_v11 = vld [vmem:[%s8988_s1 + $0x338] sm:$0xff] }
  0x96   : > { %6525 = vmatprep.subr.bf16.mxu0 %v6524_v21  ;;  %6813 = vmatprep.subr.bf16.mxu1 %v6524_v21 }
  0x99   : > { %6527 = vmatpush3.bf16.msra.mxu0 %v6524_v21  ;;  %6815 = vmatpush3.bf16.msra.mxu1 %v6524_v21  ;;  %v4045_v21 = vld [vmem:[%s8988_s1 + $0x350] sm:$0xff] }
  0x9a   : > { %6529 = vmatprep.subr.bf16.mxu0 %v6528_v26  ;;  %6817 = vmatprep.subr.bf16.mxu1 %v6528_v26  ;;  %v6596_v24 = vpack.c.bf16 %v4046_v23, %v4045_v21 }
  0x9d   : > { %6531 = vmatpush3.bf16.msra.mxu0 %v6528_v26  ;;  %6819 = vmatpush3.bf16.msra.mxu1 %v6528_v26  ;;  %v4047_v26 = vld [vmem:[%s8988_s1 + $0x360] sm:$0xff] }
  0x9e   : > { %6533 = vmatprep.subr.bf16.mxu0 %v6532_v28  ;;  %6821 = vmatprep.subr.bf16.mxu1 %v6532_v28  ;;  %v6600_v27 = vpack.c.bf16 %v4048_v25, %v4047_v26  ;;  %v4074_v26 = vld [vmem:[%s8988_s1 + $0x438] sm:$0xff] }
  0xa1   : > { %6535 = vmatpush3.bf16.msra.mxu0 %v6532_v28  ;;  %6823 = vmatpush3.bf16.msra.mxu1 %v6532_v28  ;;  %v4049_v28 = vld [vmem:[%s8988_s1 + $0x370] sm:$0xff] }
  0xa2   : > { %6537 = vmatprep.subr.bf16.mxu0 %v6536_v31  ;;  %6825 = vmatprep.subr.bf16.mxu1 %v6536_v31  ;;  %v6604_v30 = vpack.c.bf16 %v4050_v29, %v4049_v28  ;;  %v4076_v28 = vld [vmem:[%s8988_s1 + $0x448] sm:$0xff]  ;;  %v4077_v29 = vld [vmem:[%s8988_s1 + $0x450] sm:$0xff] }
  0xa5   : > { %6539 = vmatpush3.bf16.msra.mxu0 %v6536_v31  ;;  %6827 = vmatpush3.bf16.msra.mxu1 %v6536_v31  ;;  %v4051_v31 = vld [vmem:[%s8988_s1 + $0x380] sm:$0xff] }
  0xa6   : > { %6541 = vmatprep.subr.bf16.mxu0 %v6540_v36  ;;  %6829 = vmatprep.subr.bf16.mxu1 %v6540_v36  ;;  %v6608_v33 = vpack.c.bf16 %v4052_v32, %v4051_v31  ;;  %v4079_v32 = vld [vmem:[%s8988_s1 + $0x460] sm:$0xff] }
  0xa9   : > { %6543 = vmatpush3.bf16.msra.mxu0 %v6540_v36  ;;  %6831 = vmatpush3.bf16.msra.mxu1 %v6540_v36  ;;  %v8221_v36 = vld [vmem:[%s8170_s28 + $0x8] sm:$0xff] }
  0xaa   : > { %6545 = vmatprep.subr.bf16.mxu0 %v6544_v41  ;;  %6833 = vmatprep.subr.bf16.mxu1 %v6544_v41  ;;  %v8231_v40 = vrot.slane %v8221_v36, 1  ;;  %v8299_v3 = vrot.slane %v8221_v36, 2 }
  0xac   : > { %5297 = vmatmul.mubr.f32.vlgmr.msra.gmra.mrb[0].mxu0 %v7858_v50  ;;  %5612 = vmatmul.mubr.f32.vlgmr.msra.gmra.mrb[0].mxu1 %v1541_v46  ;;  %v6556_v50 = vpack.c.bf16 %v4026_v52, %v4025_v51  ;;  %v8243_v44 = vsel %vm241_vm0, %v1841_v39, %v8231_v40  ;;  %v6616_v46 = vpack.c.bf16 %v4056_v43, %v4055_v42  ;;  %v4061_v51 = vld [vmem:[%s8988_s1 + $0x3d0] sm:$0xff]  ;;  %v4062_v52 = vld [vmem:[%s8988_s1 + $0x3d8] sm:$0xff]  ;;  %v4214_v42 = vld [vmem:[%s8988_s1 + $0x80] sm:$0xff] }
  0xad   : > { %6547 = vmatpush3.bf16.msra.mxu0 %v6544_v41  ;;  %6835 = vmatpush3.bf16.msra.mxu1 %v6544_v41  ;;  %v6612_v41 = vpack.c.bf16 %v4054_v38, %v4053_v37  ;;  %v4081_v38 = vld [vmem:[%s8988_s1 + $0x470] sm:$0xff]  ;;  %v4082_v39 = vld [vmem:[%s8988_s1 + $0x478] sm:$0xff]  ;;  %v4215_v43 = vld [vmem:[%s8988_s1 + $0x88] sm:$0xff] }
  0xae   : > { %6549 = vmatprep.subr.bf16.mxu0 %v6548_v47  ;;  %6837 = vmatprep.subr.bf16.mxu1 %v6548_v47 }
  0xaf   : > { %5331 = vmatprep.mubr.f32.mxu0 %v7924_v18  ;;  %5646 = vmatprep.mubr.f32.mxu1 %v8119_v48  ;;  %v6560_v18 = vpack.c.bf16 %v4028_v54, %v4027_v53  ;;  %v4063_v53 = vld [vmem:[%s8988_s1 + $0x3e0] sm:$0xff]  ;;  %v4064_v54 = vld [vmem:[%s8988_s1 + $0x3e8] sm:$0xff] }
  0xb1   : > { %6551 = vmatpush3.bf16.msra.mxu0 %v6548_v47  ;;  %6839 = vmatpush3.bf16.msra.mxu1 %v6548_v47  ;;  %v4057_v47 = vld [vmem:[%s8988_s1 + $0x3b0] sm:$0xff] }
  0xb2   : > { %6553 = vmatprep.subr.bf16.mxu0 %v6552_v49  ;;  %6841 = vmatprep.subr.bf16.mxu1 %v6552_v49 }
  0xb5   : > { %6555 = vmatpush3.bf16.msra.mxu0 %v6552_v49  ;;  %6843 = vmatpush3.bf16.msra.mxu1 %v6552_v49  ;;  %v4060_v49 = vld [vmem:[%s8988_s1 + $0x3c8] sm:$0xff] }
  0xb6   : > { %6557 = vmatprep.subr.bf16.mxu0 %v6556_v50  ;;  %6845 = vmatprep.subr.bf16.mxu1 %v6556_v50 }
  0xb9   : > { %6559 = vmatpush3.bf16.msra.mxu0 %v6556_v50  ;;  %6847 = vmatpush3.bf16.msra.mxu1 %v6556_v50  ;;  %v6628_v50 = vpack.c.bf16 %v4062_v52, %v4061_v51 }
  0xba   : > { %6561 = vmatprep.subr.bf16.mxu0 %v6560_v18  ;;  %6849 = vmatprep.subr.bf16.mxu1 %v6560_v18 }
  0xbd   : > { %6563 = vmatpush3.bf16.msra.mxu0 %v6560_v18  ;;  %6851 = vmatpush3.bf16.msra.mxu1 %v6560_v18  ;;  %v6632_v18 = vpack.c.bf16 %v4064_v54, %v4063_v53  ;;  %v4218_v53 = vld [vmem:[%s8988_s1 + $0xa0] sm:$0xff]  ;;  %v4219_v54 = vld [vmem:[%s8988_s1 + $0xa8] sm:$0xff] }
  0xbe   : > { %6565 = vmatprep.subr.bf16.mxu0 %v6564_v57  ;;  %6853 = vmatprep.subr.bf16.mxu1 %v6564_v57 }
  0xc1   : > { %6567 = vmatpush3.bf16.msra.mxu0 %v6564_v57  ;;  %6855 = vmatpush3.bf16.msra.mxu1 %v6564_v57  ;;  %v6636_v57 = vpack.c.bf16 %v4066_v56, %v4065_v55  ;;  %v4220_v55 = vld [vmem:[%s8988_s1 + $0xb0] sm:$0xff]  ;;  %v4221_v56 = vld [vmem:[%s8988_s1 + $0xb8] sm:$0xff] }
  0xc2   : > { %6569 = vmatprep.subr.bf16.mxu0 %v6568_v59  ;;  %6857 = vmatprep.subr.bf16.mxu1 %v6568_v59 }
  0xc5   : > { %6571 = vmatpush3.bf16.msra.mxu0 %v6568_v59  ;;  %6859 = vmatpush3.bf16.msra.mxu1 %v6568_v59  ;;  %v4067_v59 = vld [vmem:[%s8988_s1 + $0x400] sm:$0xff] }
  0xc6   : > { %6573 = vmatprep.subr.bf16.mxu0 %v6572_v62  ;;  %6861 = vmatprep.subr.bf16.mxu1 %v6572_v62  ;;  %v6640_v63 = vpack.c.bf16 %v4068_v60, %v4067_v59  ;;  %v4225_v60 = vld [vmem:[%s8988_s1 + $0xd8] sm:$0xff] }
  0xc9   : > { %6575 = vmatpush3.bf16.msra.mxu0 %v6572_v62  ;;  %6863 = vmatpush3.bf16.msra.mxu1 %v6572_v62  ;;  %v1844_v62 = vrot.slane %v8281_v58, 1 }
  0xca   : > { %6577 = vmatprep.subr.bf16.mxu0 %v6576_v2  ;;  %6865 = vmatprep.subr.bf16.mxu1 %v6576_v2 }
  0xcb   : > { %v1845_v8 = vsel %vm241_vm0, %v8231_v40, %v1844_v62  ;;  %v4226_v62 = vld [vmem:[%s8988_s1 + $0xe0] sm:$0xff] }
  0xcc   : > { %5332 = vmatmul.mubr.f32.vlgmr.msra.gmra.mrb[0].mxu0 %v7928_v19  ;;  %5647 = vmatmul.mubr.f32.vlgmr.msra.gmra.mrb[0].mxu1 %v1641_v5  ;;  %v6588_v19 = vpack.c.bf16 %v4042_v11, %v4041_v15  ;;  %v8305_v5 = vld [vmem:[%s7982_s20 + $0x8] sm:$0xff]  ;;  %v6644_v11 = vpack.c.bf16 %v4070_v1, %v4069_v0  ;;  %v4228_v1 = vld [vmem:[%s8988_s1 + $0xf0] sm:$0xff]  ;;  %s2626_s20 = sadd.s32 4, %s7740_s25  ;;  %s9015_s25 = smov (!%p188_p12, %s7740_s25), 15 }
  0xcd   : > { %6579 = vmatpush3.bf16.msra.mxu0 %v6576_v2  ;;  %6867 = vmatpush3.bf16.msra.mxu1 %v6576_v2  ;;  %v1941_v2 = vrot.slane %v8180_v13, 2  ;;  %v2244_v15 = vrot.slane %v8305_v5, 2  ;;  %p2627_p10 = scmp.lt.s32.totalorder %s2626_s20, 17 }
  0xce   : > { %6581 = vmatprep.subr.bf16.mxu0 %v6580_v7  ;;  %6869 = vmatprep.subr.bf16.mxu1 %v6580_v7 }
  0xcf   : > { %5366 = vmatprep.mubr.f32.mxu0 %v7991_v12  ;;  %5681 = vmatprep.mubr.f32.mxu1 %v8180_v13  ;;  %v6592_v12 = vpack.c.bf16 %v4044_v22, %v4043_v17  ;;  %v4071_v17 = vld [vmem:[%s8988_s1 + $0x420] sm:$0xff]  ;;  %s9011_s20 = smov (!%p2627_p10, %s2626_s20), 17 }
  0xd0   : > { %s2629_s27 = smul.u32 24, %s9011_s20 }
  0xd1   : > { %6583 = vmatpush3.bf16.msra.mxu0 %v6580_v7  ;;  %6871 = vmatpush3.bf16.msra.mxu1 %v6580_v7  ;;  %v934_v7 = vsel %vm241_vm0, %v8042_v10, %v933_v61  ;;  %v4072_v10 = vld [vmem:[%s8988_s1 + $0x428] sm:$0xff] }
  0xd2   : > { %6585 = vmatprep.subr.bf16.mxu0 %v6584_v14  ;;  %6873 = vmatprep.subr.bf16.mxu1 %v6584_v14  ;;  %v6648_v23 = vpack.c.bf16 %v4072_v10, %v4071_v17  ;;  %v2037_v10 = vld [vmem:[%s8988_s1 + $0x10] sm:$0xff]  ;;  %s8554_s6 = scalar_lea.vmem %s7770_s22, %s2629_s27 }
  0xd5   : > { %6587 = vmatpush3.bf16.msra.mxu0 %v6584_v14  ;;  %6875 = vmatpush3.bf16.msra.mxu1 %v6584_v14  ;;  %v2243_v14 = vrot.slane %v8302_v4, 2 }
  0xd6   : > { %6589 = vmatprep.subr.bf16.mxu0 %v6588_v19  ;;  %6877 = vmatprep.subr.bf16.mxu1 %v6588_v19 }
  0xd7   : > { %v8324_v22 = vsel %vm416_vm1, %v2243_v14, %v2244_v15  ;;  %v2035_v14 = vld [vmem:[%s8988_s1] sm:$0xff] }
  0xd9   : > { %6591 = vmatpush3.bf16.msra.mxu0 %v6588_v19  ;;  %6879 = vmatpush3.bf16.msra.mxu1 %v6588_v19  ;;  %v2246_v19 = vrot.slane %v8312_v9, 2 }
  0xda   : > { %6593 = vmatprep.subr.bf16.mxu0 %v6592_v12  ;;  %6881 = vmatprep.subr.bf16.mxu1 %v6592_v12 }
  0xdb   : > { %v8331_v21 = vsel %vm416_vm1, %v2244_v15, %v2246_v19  ;;  %v2036_v15 = vld [vmem:[%s8988_s1 + $0x8] sm:$0xff] }
  0xdc   : > { %v6992_v17 = vpack.c.bf16 %v2036_v15, %v2035_v14  ;;  %v8564_v14 = vld [vmem:[%s8170_s28] sm:$0xff] }
  0xdd   : > { %6595 = vmatpush3.bf16.msra.mxu0 %v6592_v12  ;;  %6883 = vmatpush3.bf16.msra.mxu1 %v6592_v12  ;;  %v8328_v12 = vsel %vm416_vm1, %v1941_v2, %v8299_v3  ;;  %v4229_v2 = vld [vmem:[%s8988_s1 + $0xf8] sm:$0xff] }
  0xde   : > { %6597 = vmatprep.subr.bf16.mxu0 %v6596_v24  ;;  %6885 = vmatprep.subr.bf16.mxu1 %v6596_v24 }
  0xe1   : > { %6599 = vmatpush3.bf16.msra.mxu0 %v6596_v24  ;;  %6887 = vmatpush3.bf16.msra.mxu1 %v6596_v24  ;;  %v4073_v24 = vld [vmem:[%s8988_s1 + $0x430] sm:$0xff] }
  0xe2   : > { %6601 = vmatprep.subr.bf16.mxu0 %v6600_v27  ;;  %6889 = vmatprep.subr.bf16.mxu1 %v6600_v27  ;;  %v6652_v25 = vpack.c.bf16 %v4074_v26, %v4073_v24 }
  0xe5   : > { %6603 = vmatpush3.bf16.msra.mxu0 %v6600_v27  ;;  %6891 = vmatpush3.bf16.msra.mxu1 %v6600_v27  ;;  %v4075_v27 = vld [vmem:[%s8988_s1 + $0x440] sm:$0xff] }
  0xe6   : > { %6605 = vmatprep.subr.bf16.mxu0 %v6604_v30  ;;  %6893 = vmatprep.subr.bf16.mxu1 %v6604_v30 }
  0xe9   : > { %6607 = vmatpush3.bf16.msra.mxu0 %v6604_v30  ;;  %6895 = vmatpush3.bf16.msra.mxu1 %v6604_v30  ;;  %v4078_v30 = vld [vmem:[%s8988_s1 + $0x458] sm:$0xff] }
  0xea   : > { %6609 = vmatprep.subr.bf16.mxu0 %v6608_v33  ;;  %6897 = vmatprep.subr.bf16.mxu1 %v6608_v33  ;;  %v6660_v31 = vpack.c.bf16 %v4078_v30, %v4077_v29  ;;  %v2043_v30 = vld [vmem:[%s8988_s1 + $0x40] sm:$0xff] }
  0xec   : > { %5367 = vmatmul.mubr.f32.vlgmr.msra.gmra.mrb[0].mxu0 %v8032_v6  ;;  %5682 = vmatmul.mubr.f32.vlgmr.msra.gmra.mrb[0].mxu1 %v8221_v36  ;;  %v6620_v6 = vpack.c.bf16 %v4058_v34, %v4057_v47  ;;  %v1944_v47 = vrot.slane %v8281_v58, 2  ;;  %v6960_v34 = vpack.c.bf16 %v4215_v43, %v4214_v42  ;;  %v4223_v58 = vld [vmem:[%s8988_s1 + $0xc8] sm:$0xff]  ;;  %v2050_v42 = vld [vmem:[%s8988_s1 + $0x78] sm:$0xff] }
  0xed   : > { %6611 = vmatpush3.bf16.msra.mxu0 %v6608_v33  ;;  %6899 = vmatpush3.bf16.msra.mxu1 %v6608_v33  ;;  %v4080_v33 = vld [vmem:[%s8988_s1 + $0x468] sm:$0xff] }
  0xee   : > { %6613 = vmatprep.subr.bf16.mxu0 %v6612_v41  ;;  %6901 = vmatprep.subr.bf16.mxu1 %v6612_v41  ;;  %v6664_v37 = vpack.c.bf16 %v4080_v33, %v4079_v32  ;;  %v1945_v52 = vsel %vm416_vm1, %v8299_v3, %v1944_v47  ;;  %v2046_v32 = vld [vmem:[%s8988_s1 + $0x58] sm:$0xff]  ;;  %v4231_v47 = vld [vmem:[%s8988_s1 + $0x108] sm:$0xff] }
  0xef   : > { %5401 = vmatprep.mubr.f32.mxu0 %v8054_v16  ;;  %5716 = vmatprep.mubr.f32.mxu1 %v8243_v44  ;;  %v6624_v16 = vpack.c.bf16 %v4060_v49, %v4059_v35  ;;  %v4217_v35 = vld [vmem:[%s8988_s1 + $0x98] sm:$0xff]  ;;  %v2070_v49 = vrot.slane %v8302_v4, 1 }
  0xf1   : > { %6615 = vmatpush3.bf16.msra.mxu0 %v6612_v41  ;;  %6903 = vmatpush3.bf16.msra.mxu1 %v6612_v41  ;;  %v6668_v41 = vpack.c.bf16 %v4082_v39, %v4081_v38  ;;  %v2048_v38 = vld [vmem:[%s8988_s1 + $0x68] sm:$0xff] }
  0xf2   : > { %6617 = vmatprep.subr.bf16.mxu0 %v6616_v46  ;;  %6905 = vmatprep.subr.bf16.mxu1 %v6616_v46 }
  0xf5   : > { %6619 = vmatpush3.bf16.msra.mxu0 %v6616_v46  ;;  %6907 = vmatpush3.bf16.msra.mxu1 %v6616_v46  ;;  %v1034_v46 = vrot.slane %v8278_v20, 2  ;;  %v4222_v20 = vld [vmem:[%s8988_s1 + $0xc0] sm:$0xff] }
  0xf6   : > { %6621 = vmatprep.subr.bf16.mxu0 %v6620_v6  ;;  %6909 = vmatprep.subr.bf16.mxu1 %v6620_v6  ;;  %v6976_v59 = vpack.c.bf16 %v4223_v58, %v4222_v20  ;;  %v4244_v20 = vld [vmem:[%s8988_s1 + $0x170] sm:$0xff]  ;;  %v4245_v58 = vld [vmem:[%s8988_s1 + $0x178] sm:$0xff] }
  0xf7   : > { %v1035_v51 = vsel %vm416_vm1, %v8106_v45, %v1034_v46  ;;  %v4230_v46 = vld [vmem:[%s8988_s1 + $0x100] sm:$0xff] }
  0xf9   : > { %6623 = vmatpush3.bf16.msra.mxu0 %v6620_v6  ;;  %6911 = vmatpush3.bf16.msra.mxu1 %v6620_v6  ;;  %v4216_v6 = vld [vmem:[%s8988_s1 + $0x90] sm:$0xff] }
  0xfa   : > { %6625 = vmatprep.subr.bf16.mxu0 %v6624_v16  ;;  %6913 = vmatprep.subr.bf16.mxu1 %v6624_v16 }
  0xfd   : > { %6627 = vmatpush3.bf16.msra.mxu0 %v6624_v16  ;;  %6915 = vmatpush3.bf16.msra.mxu1 %v6624_v16  ;;  %v2071_v16 = vrot.slane %v8305_v5, 1 }
  0xfe   : > { %6629 = vmatprep.subr.bf16.mxu0 %v6628_v50  ;;  %6917 = vmatprep.subr.bf16.mxu1 %v6628_v50 }
  0xff   : > { %v2072_v45 = vsel %vm241_vm0, %v2070_v49, %v2071_v16 }
 0x101   : > { %6631 = vmatpush3.bf16.msra.mxu0 %v6628_v50  ;;  %6919 = vmatpush3.bf16.msra.mxu1 %v6628_v50  ;;  %v6964_v50 = vpack.c.bf16 %v4217_v35, %v4216_v6  ;;  %v4232_v6 = vld [vmem:[%s8988_s1 + $0x110] sm:$0xff]  ;;  %v4233_v35 = vld [vmem:[%s8988_s1 + $0x118] sm:$0xff] }
 0x102   : > { %6633 = vmatprep.subr.bf16.mxu0 %v6632_v18  ;;  %6921 = vmatprep.subr.bf16.mxu1 %v6632_v18  ;;  %v7028_v49 = vpack.c.bf16 %v4233_v35, %v4232_v6 }
 0x105   : > { %6635 = vmatpush3.bf16.msra.mxu0 %v6632_v18  ;;  %6923 = vmatpush3.bf16.msra.mxu1 %v6632_v18  ;;  %v6968_v18 = vpack.c.bf16 %v4219_v54, %v4218_v53  ;;  %v4237_v53 = vld [vmem:[%s8988_s1 + $0x138] sm:$0xff]  ;;  %v4239_v54 = vld [vmem:[%s8988_s1 + $0x148] sm:$0xff] }
 0x106   : > { %6637 = vmatprep.subr.bf16.mxu0 %v6636_v57  ;;  %6925 = vmatprep.subr.bf16.mxu1 %v6636_v57 }
 0x109   : > { %6639 = vmatpush3.bf16.msra.mxu0 %v6636_v57  ;;  %6927 = vmatpush3.bf16.msra.mxu1 %v6636_v57  ;;  %v6972_v57 = vpack.c.bf16 %v4221_v56, %v4220_v55  ;;  %v4242_v55 = vld [vmem:[%s8988_s1 + $0x160] sm:$0xff]  ;;  %v4243_v56 = vld [vmem:[%s8988_s1 + $0x168] sm:$0xff] }
 0x10a   : > { %6641 = vmatprep.subr.bf16.mxu0 %v6640_v63  ;;  %6929 = vmatprep.subr.bf16.mxu1 %v6640_v63 }
 0x10c   : > { %5402 = vmatmul.mubr.f32.vlgmr.msra.gmra.mrb[0].mxu0 %v934_v7  ;;  %5717 = vmatmul.mubr.f32.vlgmr.msra.gmra.mrb[0].mxu1 %v1845_v8  ;;  %v6988_v7 = vpack.c.bf16 %v4229_v2, %v4228_v1  ;;  %v8426_v8 = vld [vmem:[%s8170_s28 + $0x10] sm:$0x3] }
 0x10d   : > { %6643 = vmatpush3.bf16.msra.mxu0 %v6640_v63  ;;  %6931 = vmatpush3.bf16.msra.mxu1 %v6640_v63  ;;  %v4227_v63 = vld [vmem:[%s8988_s1 + $0xe8] sm:$0xff]  ;;  %v2978_v19 = vrot.slane %v8426_v8, 1 }
 0x10e   : > { %6645 = vmatprep.subr.bf16.mxu0 %v6644_v11  ;;  %6933 = vmatprep.subr.bf16.mxu1 %v6644_v11  ;;  %v6984_v0 = vpack.c.bf16 %v4227_v63, %v4226_v62  ;;  %v4248_v63 = vld [vmem:[%s8988_s1 + $0x190] sm:$0xff] }
 0x10f   : > { %5436 = vmatprep.mubr.f32.mxu0 %v8119_v48  ;;  %5751 = vmatprep.mubr.f32.mxu1 %v8328_v12  ;;  %v6656_v48 = vpack.c.bf16 %v4076_v28, %v4075_v27  ;;  %v2040_v27 = vld [vmem:[%s8988_s1 + $0x28] sm:$0xff] }
 0x111   : > { %6647 = vmatpush3.bf16.msra.mxu0 %v6644_v11  ;;  %6935 = vmatpush3.bf16.msra.mxu1 %v6644_v11  ;;  %v2073_v11 = vrot.slane %v8312_v9, 1  ;;  %v2979_v9 = vsel %vm241_vm0, %v8231_v40, %v2978_v19  ;;  %v2041_v40 = vld [vmem:[%s8988_s1 + $0x30] sm:$0xff]  ;;  %v4253_v19 = vld [vmem:[%s8988_s1 + $0x1b8] sm:$0xff] }
 0x112   : > { %6649 = vmatprep.subr.bf16.mxu0 %v6648_v23  ;;  %6937 = vmatprep.subr.bf16.mxu1 %v6648_v23 }
 0x113   : > { %v2074_v24 = vsel %vm241_vm0, %v2071_v16, %v2073_v11  ;;  %v4234_v16 = vld [vmem:[%s8988_s1 + $0x120] sm:$0xff]  ;;  %v4252_v11 = vld [vmem:[%s8988_s1 + $0x1b0] sm:$0xff] }
 0x115   : > { %6651 = vmatpush3.bf16.msra.mxu0 %v6648_v23  ;;  %6939 = vmatpush3.bf16.msra.mxu1 %v6648_v23  ;;  %v2038_v23 = vld [vmem:[%s8988_s1 + $0x18] sm:$0xff] }
 0x116   : > { %6653 = vmatprep.subr.bf16.mxu0 %v6652_v25  ;;  %6941 = vmatprep.subr.bf16.mxu1 %v6652_v25  ;;  %v6996_v26 = vpack.c.bf16 %v2038_v23, %v2037_v10  ;;  %v4255_v10 = vld [vmem:[%s8988_s1 + $0x1c8] sm:$0xff] }
 0x119   : > { %6655 = vmatpush3.bf16.msra.mxu0 %v6652_v25  ;;  %6943 = vmatpush3.bf16.msra.mxu1 %v6652_v25  ;;  %v2039_v25 = vld [vmem:[%s8988_s1 + $0x20] sm:$0xff] }
 0x11a   : > { %6657 = vmatprep.subr.bf16.mxu0 %v6656_v48  ;;  %6945 = vmatprep.subr.bf16.mxu1 %v6656_v48  ;;  %v7000_v28 = vpack.c.bf16 %v2040_v27, %v2039_v25  ;;  %v4258_v25 = vld [vmem:[%s8988_s1 + $0x1e0] sm:$0xff]  ;;  %v4259_v27 = vld [vmem:[%s8988_s1 + $0x1e8] sm:$0xff] }
 0x11d   : > { %6659 = vmatpush3.bf16.msra.mxu0 %v6656_v48  ;;  %6947 = vmatpush3.bf16.msra.mxu1 %v6656_v48  ;;  %v2042_v48 = vld [vmem:[%s8988_s1 + $0x38] sm:$0xff] }
 0x11e   : > { %6661 = vmatprep.subr.bf16.mxu0 %v6660_v31  ;;  %6949 = vmatprep.subr.bf16.mxu1 %v6660_v31  ;;  %v7004_v29 = vpack.c.bf16 %v2042_v48, %v2041_v40  ;;  %v4260_v40 = vld [vmem:[%s8988_s1 + $0x1f0] sm:$0xff]  ;;  %v4261_v48 = vld [vmem:[%s8988_s1 + $0x1f8] sm:$0xff] }
 0x121   : > { %6663 = vmatpush3.bf16.msra.mxu0 %v6660_v31  ;;  %6951 = vmatpush3.bf16.msra.mxu1 %v6660_v31  ;;  %v2044_v31 = vld [vmem:[%s8988_s1 + $0x48] sm:$0xff] }
 0x122   : > { %6665 = vmatprep.subr.bf16.mxu0 %v6664_v37  ;;  %6953 = vmatprep.subr.bf16.mxu1 %v6664_v37 }
 0x125   : > { %6667 = vmatpush3.bf16.msra.mxu0 %v6664_v37  ;;  %6955 = vmatpush3.bf16.msra.mxu1 %v6664_v37  ;;  %v2047_v37 = vld [vmem:[%s8988_s1 + $0x60] sm:$0xff] }
 0x126   : > { %6669 = vmatprep.subr.bf16.mxu0 %v6668_v41  ;;  %6957 = vmatprep.subr.bf16.mxu1 %v6668_v41  ;;  %v7016_v39 = vpack.c.bf16 %v2048_v38, %v2047_v37  ;;  %v4265_v37 = vld [vmem:[%s8988_s1 + $0x218] sm:$0xff]  ;;  %v2442_v38 = vrot.slane %v8564_v14, 1 }
 0x129   : > { %6671 = vmatpush3.bf16.msra.mxu0 %v6668_v41  ;;  %6959 = vmatpush3.bf16.msra.mxu1 %v6668_v41  ;;  %v2049_v41 = vld [vmem:[%s8988_s1 + $0x70] sm:$0xff] }
 0x12a   : > { %6961 = vmatprep.subr.bf16.mxu0 %v6960_v34  ;;  %7249 = vmatprep.subr.bf16.mxu1 %v6960_v34  ;;  %v7020_v43 = vpack.c.bf16 %v2050_v42, %v2049_v41 }
 0x12c   : > { %5437 = vmatmul.mubr.f32.vlgmr.msra.gmra.mrb[0].mxu0 %v1035_v51  ;;  %5752 = vmatmul.mubr.f32.vlgmr.msra.gmra.mrb[0].mxu1 %v1945_v52  ;;  %v4235_v51 = vld [vmem:[%s8988_s1 + $0x128] sm:$0xff] }
 0x12d   : > { %6963 = vmatpush3.bf16.msra.mxu0 %v6960_v34  ;;  %7251 = vmatpush3.bf16.msra.mxu1 %v6960_v34  ;;  %v7024_v34 = vpack.c.bf16 %v4231_v47, %v4230_v46  ;;  %v7032_v52 = vpack.c.bf16 %v4235_v51, %v4234_v16  ;;  %v4266_v46 = vld [vmem:[%s8988_s1 + $0x220] sm:$0xff]  ;;  %v4267_v47 = vld [vmem:[%s8988_s1 + $0x228] sm:$0xff]  ;;  %v4269_v16 = vld [vmem:[%s8988_s1 + $0x238] sm:$0xff] }
 0x12e   : > { %6965 = vmatprep.subr.bf16.mxu0 %v6964_v50  ;;  %7253 = vmatprep.subr.bf16.mxu1 %v6964_v50  ;;  %v7096_v35 = vpack.c.bf16 %v4267_v47, %v4266_v46  ;;  %v4296_v47 = vld [vmem:[%s8988_s1 + $0x310] sm:$0xff] }
 0x12f   : > { %5786 = vmatprep.mubr.f32.mxu0 %v2072_v45  ;;  %6101 = vmatprep.mubr.f32.mxu1 %v8243_v44  ;;  %v4224_v44 = vld [vmem:[%s8988_s1 + $0xd0] sm:$0xff]  ;;  %v4241_v45 = vld [vmem:[%s8988_s1 + $0x158] sm:$0xff] }
 0x130   : > { %v6980_v61 = vpack.c.bf16 %v4225_v60, %v4224_v44  ;;  %v4246_v44 = vld [vmem:[%s8988_s1 + $0x180] sm:$0xff]  ;;  %v4247_v60 = vld [vmem:[%s8988_s1 + $0x188] sm:$0xff] }
 0x131   : > { %6967 = vmatpush3.bf16.msra.mxu0 %v6964_v50  ;;  %7255 = vmatpush3.bf16.msra.mxu1 %v6964_v50  ;;  %v4236_v50 = vld [vmem:[%s8988_s1 + $0x130] sm:$0xff]  ;;  %v7056_v62 = vpack.c.bf16 %v4247_v60, %v4246_v44 }
 0x132   : > { %6969 = vmatprep.subr.bf16.mxu0 %v6968_v18  ;;  %7257 = vmatprep.subr.bf16.mxu1 %v6968_v18 }
 0x135   : > { %6971 = vmatpush3.bf16.msra.mxu0 %v6968_v18  ;;  %7259 = vmatpush3.bf16.msra.mxu1 %v6968_v18 }
 0x136   : > { %6973 = vmatprep.subr.bf16.mxu0 %v6972_v57  ;;  %7261 = vmatprep.subr.bf16.mxu1 %v6972_v57 }
 0x139   : > { %6975 = vmatpush3.bf16.msra.mxu0 %v6972_v57  ;;  %7263 = vmatpush3.bf16.msra.mxu1 %v6972_v57  ;;  %v7048_v57 = vpack.c.bf16 %v4243_v56, %v4242_v55  ;;  %v4277_v55 = vld [vmem:[%s8988_s1 + $0x278] sm:$0xff] }
 0x13a   : > { %6977 = vmatprep.subr.bf16.mxu0 %v6976_v59  ;;  %7265 = vmatprep.subr.bf16.mxu1 %v6976_v59 }
 0x13d   : > { %6979 = vmatpush3.bf16.msra.mxu0 %v6976_v59  ;;  %7267 = vmatpush3.bf16.msra.mxu1 %v6976_v59  ;;  %v7052_v59 = vpack.c.bf16 %v4245_v58, %v4244_v20  ;;  %v8675_v20 = vld [vmem:[%s8554_s6 + $0x10] sm:$0x3]  ;;  %v4278_v58 = vld [vmem:[%s8988_s1 + $0x280] sm:$0xff] }
 0x13e   : > { %6981 = vmatprep.subr.bf16.mxu0 %v6980_v61  ;;  %7269 = vmatprep.subr.bf16.mxu1 %v6980_v61  ;;  %v3350_v60 = vrot.slane %v8675_v20, 1 }
 0x141   : > { %6983 = vmatpush3.bf16.msra.mxu0 %v6980_v61  ;;  %7271 = vmatpush3.bf16.msra.mxu1 %v6980_v61  ;;  %v3151_v61 = vrot.slane %v8426_v8, 2  ;;  %v4251_v8 = vld [vmem:[%s8988_s1 + $0x1a8] sm:$0xff] }
 0x142   : > { %6985 = vmatprep.subr.bf16.mxu0 %v6984_v0  ;;  %7273 = vmatprep.subr.bf16.mxu1 %v6984_v0 }
 0x143   : > { %v3152_v1 = vsel %vm416_vm1, %v8299_v3, %v3151_v61  ;;  %v8567_v3 = vld [vmem:[%s8554_s6] sm:$0xff] }
 0x145   : > { %6987 = vmatpush3.bf16.msra.mxu0 %v6984_v0  ;;  %7275 = vmatpush3.bf16.msra.mxu1 %v6984_v0  ;;  %v4249_v0 = vld [vmem:[%s8988_s1 + $0x198] sm:$0xff] }
 0x146   : > { %6989 = vmatprep.subr.bf16.mxu0 %v6988_v7  ;;  %7277 = vmatprep.subr.bf16.mxu1 %v6988_v7  ;;  %v7060_v2 = vpack.c.bf16 %v4249_v0, %v4248_v63  ;;  %v4281_v63 = vld [vmem:[%s8988_s1 + $0x298] sm:$0xff]  ;;  %v2542_v0 = vrot.slane %v8564_v14, 2 }
 0x149   : > { %6991 = vmatpush3.bf16.msra.mxu0 %v6988_v7  ;;  %7279 = vmatpush3.bf16.msra.mxu1 %v6988_v7  ;;  %v4250_v7 = vld [vmem:[%s8988_s1 + $0x1a0] sm:$0xff] }
 0x14a   : > { %6993 = vmatprep.subr.bf16.mxu0 %v6992_v17  ;;  %7281 = vmatprep.subr.bf16.mxu1 %v6992_v17  ;;  %v7064_v15 = vpack.c.bf16 %v4251_v8, %v4250_v7 }
 0x14c   : > { %5787 = vmatmul.mubr.f32.vlgmr.msra.gmra.mrb[2].mxu0 %v2074_v24  ;;  %6102 = vmatmul.mubr.f32.vlgmr.msra.gmra.mrb[2].mxu1 %v2979_v9  ;;  %v4256_v24 = vld [vmem:[%s8988_s1 + $0x1d0] sm:$0xff]  ;;  %v4257_v9 = vld [vmem:[%s8988_s1 + $0x1d8] sm:$0xff] }
 0x14d   : > { %6995 = vmatpush3.bf16.msra.mxu0 %v6992_v17  ;;  %7283 = vmatpush3.bf16.msra.mxu1 %v6992_v17  ;;  %v4254_v17 = vld [vmem:[%s8988_s1 + $0x1c0] sm:$0xff] }
 0x14e   : > { %6997 = vmatprep.subr.bf16.mxu0 %v6996_v26  ;;  %7285 = vmatprep.subr.bf16.mxu1 %v6996_v26  ;;  %v7072_v23 = vpack.c.bf16 %v4255_v10, %v4254_v17 }
 0x14f   : > { %5821 = vmatprep.mubr.f32.mxu0 %v8302_v4  ;;  %6136 = vmatprep.mubr.f32.mxu1 %v8180_v13  ;;  %v7008_v4 = vpack.c.bf16 %v2044_v31, %v2043_v30  ;;  %v2045_v13 = vld [vmem:[%s8988_s1 + $0x50] sm:$0xff]  ;;  %v4262_v30 = vld [vmem:[%s8988_s1 + $0x200] sm:$0xff]  ;;  %v4263_v31 = vld [vmem:[%s8988_s1 + $0x208] sm:$0xff] }
 0x150   : > { %v7012_v33 = vpack.c.bf16 %v2046_v32, %v2045_v13  ;;  %v8608_v13 = vld [vmem:[%s8170_s28 + $0x8] sm:$0xff] }
 0x151   : > { %6999 = vmatpush3.bf16.msra.mxu0 %v6996_v26  ;;  %7287 = vmatpush3.bf16.msra.mxu1 %v6996_v26  ;;  %v7076_v26 = vpack.c.bf16 %v4257_v9, %v4256_v24  ;;  %v8611_v32 = vld [vmem:[%s8554_s6 + $0x8] sm:$0xff]  ;;  %v2443_v41 = vrot.slane %v8608_v13, 1  ;;  %v4285_v24 = vld [vmem:[%s8988_s1 + $0x2b8] sm:$0xff] }
 0x152   : > { %7001 = vmatprep.subr.bf16.mxu0 %v7000_v28  ;;  %7289 = vmatprep.subr.bf16.mxu1 %v7000_v28  ;;  %v8623_v42 = vrot.slane %v8611_v32, 1  ;;  %v8695_v7 = vrot.slane %v8611_v32, 2 }
 0x155   : > { %7003 = vmatpush3.bf16.msra.mxu0 %v7000_v28  ;;  %7291 = vmatpush3.bf16.msra.mxu1 %v7000_v28  ;;  %v7080_v28 = vpack.c.bf16 %v4259_v27, %v4258_v25  ;;  %v4287_v25 = vld [vmem:[%s8988_s1 + $0x2c8] sm:$0xff] }
 0x156   : > { %7005 = vmatprep.subr.bf16.mxu0 %v7004_v29  ;;  %7293 = vmatprep.subr.bf16.mxu1 %v7004_v29 }
 0x159   : > { %7007 = vmatpush3.bf16.msra.mxu0 %v7004_v29  ;;  %7295 = vmatpush3.bf16.msra.mxu1 %v7004_v29  ;;  %v7084_v29 = vpack.c.bf16 %v4261_v48, %v4260_v40  ;;  %v4289_v40 = vld [vmem:[%s8988_s1 + $0x2d8] sm:$0xff] }
 0x15a   : > { %7009 = vmatprep.subr.bf16.mxu0 %v7008_v4  ;;  %7297 = vmatprep.subr.bf16.mxu1 %v7008_v4 }
 0x15d   : > { %7011 = vmatpush3.bf16.msra.mxu0 %v7008_v4  ;;  %7299 = vmatpush3.bf16.msra.mxu1 %v7008_v4  ;;  %v7088_v4 = vpack.c.bf16 %v4263_v31, %v4262_v30  ;;  %v4291_v30 = vld [vmem:[%s8988_s1 + $0x2e8] sm:$0xff] }
 0x15e   : > { %7013 = vmatprep.subr.bf16.mxu0 %v7012_v33  ;;  %7301 = vmatprep.subr.bf16.mxu1 %v7012_v33 }
 0x161   : > { %7015 = vmatpush3.bf16.msra.mxu0 %v7012_v33  ;;  %7303 = vmatpush3.bf16.msra.mxu1 %v7012_v33  ;;  %v4264_v33 = vld [vmem:[%s8988_s1 + $0x210] sm:$0xff] }
 0x162   : > { %7017 = vmatprep.subr.bf16.mxu0 %v7016_v39  ;;  %7305 = vmatprep.subr.bf16.mxu1 %v7016_v39 }
 0x165   : > { %7019 = vmatpush3.bf16.msra.mxu0 %v7016_v39  ;;  %7307 = vmatpush3.bf16.msra.mxu1 %v7016_v39  ;;  %v3347_v39 = vrot.slane %v8567_v3, 1 }
 0x166   : > { %7021 = vmatprep.subr.bf16.mxu0 %v7020_v43  ;;  %7309 = vmatprep.subr.bf16.mxu1 %v7020_v43 }
 0x167   : > { %v8638_v6 = vsel %vm241_vm0, %v3347_v39, %v8623_v42  ;;  %v4295_v39 = vld [vmem:[%s8988_s1 + $0x308] sm:$0xff] }
 0x169   : > { %7023 = vmatpush3.bf16.msra.mxu0 %v7020_v43  ;;  %7311 = vmatpush3.bf16.msra.mxu1 %v7020_v43  ;;  %v7092_v43 = vpack.c.bf16 %v4265_v37, %v4264_v33  ;;  %v4293_v33 = vld [vmem:[%s8988_s1 + $0x2f8] sm:$0xff] }
 0x16a   : > { %7025 = vmatprep.subr.bf16.mxu0 %v7024_v34  ;;  %7313 = vmatprep.subr.bf16.mxu1 %v7024_v34 }
 0x16c   : > { %5822 = vmatmul.mubr.f32.vlgmr.msra.gmra.mrb[2].mxu0 %v8305_v5  ;;  %6137 = vmatmul.mubr.f32.vlgmr.msra.gmra.mrb[2].mxu1 %v8221_v36  ;;  %v7036_v36 = vpack.c.bf16 %v4237_v53, %v4236_v50  ;;  %v4238_v5 = vld [vmem:[%s8988_s1 + $0x140] sm:$0xff]  ;;  %v4271_v50 = vld [vmem:[%s8988_s1 + $0x248] sm:$0xff] }
 0x16d   : > { %7027 = vmatpush3.bf16.msra.mxu0 %v7024_v34  ;;  %7315 = vmatpush3.bf16.msra.mxu1 %v7024_v34  ;;  %v2444_v34 = vsel %vm241_vm0, %v2442_v38, %v2443_v41  ;;  %v4294_v38 = vld [vmem:[%s8988_s1 + $0x300] sm:$0xff] }
 0x16e   : > { %7029 = vmatprep.subr.bf16.mxu0 %v7028_v49  ;;  %7317 = vmatprep.subr.bf16.mxu1 %v7028_v49  ;;  %v7152_v46 = vpack.c.bf16 %v4295_v39, %v4294_v38  ;;  %v4321_v39 = vld [vmem:[%s8988_s1 + $0x3d8] sm:$0xff] }
 0x16f   : > { %5856 = vmatprep.mubr.f32.mxu0 %v8324_v22  ;;  %6171 = vmatprep.mubr.f32.mxu1 %v8328_v12  ;;  %v7040_v22 = vpack.c.bf16 %v4239_v54, %v4238_v5  ;;  %v4240_v12 = vld [vmem:[%s8988_s1 + $0x150] sm:$0xff]  ;;  %v4273_v5 = vld [vmem:[%s8988_s1 + $0x258] sm:$0xff] }
 0x170   : > { %v7044_v18 = vpack.c.bf16 %v4241_v45, %v4240_v12  ;;  %v4275_v12 = vld [vmem:[%s8988_s1 + $0x268] sm:$0xff] }
 0x171   : > { %7031 = vmatpush3.bf16.msra.mxu0 %v7028_v49  ;;  %7319 = vmatpush3.bf16.msra.mxu1 %v7028_v49  ;;  %v4268_v49 = vld [vmem:[%s8988_s1 + $0x230] sm:$0xff] }
 0x172   : > { %7033 = vmatprep.subr.bf16.mxu0 %v7032_v52  ;;  %7321 = vmatprep.subr.bf16.mxu1 %v7032_v52  ;;  %v7100_v51 = vpack.c.bf16 %v4269_v16, %v4268_v49 }
 0x175   : > { %7035 = vmatpush3.bf16.msra.mxu0 %v7032_v52  ;;  %7323 = vmatpush3.bf16.msra.mxu1 %v7032_v52  ;;  %v4270_v52 = vld [vmem:[%s8988_s1 + $0x240] sm:$0xff] }
 0x176   : > { %7037 = vmatprep.subr.bf16.mxu0 %v7036_v36  ;;  %7325 = vmatprep.subr.bf16.mxu1 %v7036_v36  ;;  %v7104_v53 = vpack.c.bf16 %v4271_v50, %v4270_v52  ;;  %v8776_v52 = vld [vmem:[%s8767_s24] sm:$0xff] }
 0x179   : > { %7039 = vmatpush3.bf16.msra.mxu0 %v7036_v36  ;;  %7327 = vmatpush3.bf16.msra.mxu1 %v7036_v36  ;;  %v4272_v36 = vld [vmem:[%s8988_s1 + $0x250] sm:$0xff] }
 0x17a   : > { %7041 = vmatprep.subr.bf16.mxu0 %v7040_v22  ;;  %7329 = vmatprep.subr.bf16.mxu1 %v7040_v22  ;;  %v7108_v54 = vpack.c.bf16 %v4273_v5, %v4272_v36  ;;  %v4301_v36 = vld [vmem:[%s8988_s1 + $0x338] sm:$0xff] }
 0x17d   : > { %7043 = vmatpush3.bf16.msra.mxu0 %v7040_v22  ;;  %7331 = vmatpush3.bf16.msra.mxu1 %v7040_v22  ;;  %v4274_v22 = vld [vmem:[%s8988_s1 + $0x260] sm:$0xff] }
 0x17e   : > { %7045 = vmatprep.subr.bf16.mxu0 %v7044_v18  ;;  %7333 = vmatprep.subr.bf16.mxu1 %v7044_v18  ;;  %v7112_v45 = vpack.c.bf16 %v4275_v12, %v4274_v22  ;;  %v4303_v22 = vld [vmem:[%s8988_s1 + $0x348] sm:$0xff]  ;;  %v4304_v12 = vld [vmem:[%s8988_s1 + $0x350] sm:$0xff] }
 0x181   : > { %7047 = vmatpush3.bf16.msra.mxu0 %v7044_v18  ;;  %7335 = vmatpush3.bf16.msra.mxu1 %v7044_v18  ;;  %v4276_v18 = vld [vmem:[%s8988_s1 + $0x270] sm:$0xff] }
 0x182   : > { %7049 = vmatprep.subr.bf16.mxu0 %v7048_v57  ;;  %7337 = vmatprep.subr.bf16.mxu1 %v7048_v57  ;;  %v7116_v56 = vpack.c.bf16 %v4277_v55, %v4276_v18  ;;  %v4306_v55 = vld [vmem:[%s8988_s1 + $0x360] sm:$0xff] }
 0x185   : > { %7051 = vmatpush3.bf16.msra.mxu0 %v7048_v57  ;;  %7339 = vmatpush3.bf16.msra.mxu1 %v7048_v57  ;;  %v8672_v57 = vld [vmem:[%s8170_s28 + $0x10] sm:$0x3]  ;;  %s3951_s28 = sshll.u32 %s9015_s25, 1 }
 0x186   : > { %7053 = vmatprep.subr.bf16.mxu0 %v7052_v59  ;;  %7341 = vmatprep.subr.bf16.mxu1 %v7052_v59  ;;  %v2445_v44 = vrot.slane %v8672_v57, 1  ;;  %s192_s26 = sadd.s32 %s3952_s21, %s3951_s28 }
 0x187   : > { %s3953_s13 = sshll.u32 %s192_s26, 3 }
 0x188   : > { %v2446_v8 = vsel %vm241_vm0, %v2443_v41, %v2445_v44  ;;  %v2545_v41 = vrot.slane %v8672_v57, 2  ;;  %v8810_v57 = vld [vmem:[%s8989_s2] ss:$0 sm:$0xff]  ;;  %v4308_v44 = vld [vmem:[%s8988_s1 + $0x370] sm:$0xff]  ;;  %s8823_s10 = scalar_lea.vmem %s8990_s3, %s3953_s13 }
 0x189   : > { %7055 = vmatpush3.bf16.msra.mxu0 %v7052_v59  ;;  %7343 = vmatpush3.bf16.msra.mxu1 %v7052_v59  ;;  %v4279_v59 = vld [vmem:[%s8988_s1 + $0x288] sm:$0xff] }
 0x18a   : > { %7057 = vmatprep.subr.bf16.mxu0 %v7056_v62  ;;  %7345 = vmatprep.subr.bf16.mxu1 %v7056_v62  ;;  %v7120_v61 = vpack.c.bf16 %v4279_v59, %v4278_v58 }
 0x18c   : > { %5857 = vmatmul.mubr.f32.vlgmr.msra.gmra.mrb[2].mxu0 %v8331_v21  ;;  %6172 = vmatmul.mubr.f32.vlgmr.msra.gmra.mrb[2].mxu1 %v3152_v1  ;;  %v7068_v21 = vpack.c.bf16 %v4253_v19, %v4252_v11  ;;  %v3447_v1 = vrot.slane %v8567_v3, 2  ;;  %v4283_v19 = vld [vmem:[%s8988_s1 + $0x2a8] sm:$0xff] }
 0x18d   : > { %7059 = vmatpush3.bf16.msra.mxu0 %v7056_v62  ;;  %7347 = vmatpush3.bf16.msra.mxu1 %v7056_v62  ;;  %v4280_v62 = vld [vmem:[%s8988_s1 + $0x290] sm:$0xff] }
 0x18e   : > { %7061 = vmatprep.subr.bf16.mxu0 %v7060_v2  ;;  %7349 = vmatprep.subr.bf16.mxu1 %v7060_v2  ;;  %v7124_v11 = vpack.c.bf16 %v4281_v63, %v4280_v62  ;;  %v8713_v17 = vsel %vm416_vm1, %v3447_v1, %v8695_v7 }
 0x18f   : > { %5891 = vmatprep.mubr.f32.mxu0 %v8564_v14  ;;  %6206 = vmatprep.mubr.f32.mxu1 %v8567_v3  ;;  %v4282_v14 = vld [vmem:[%s8988_s1 + $0x2a0] sm:$0xff] }
 0x190   : > { %v7128_v10 = vpack.c.bf16 %v4283_v19, %v4282_v14 }
 0x191   : > { %7063 = vmatpush3.bf16.msra.mxu0 %v7060_v2  ;;  %7351 = vmatpush3.bf16.msra.mxu1 %v7060_v2  ;;  %v2543_v2 = vrot.slane %v8608_v13, 2 }
 0x192   : > { %7065 = vmatprep.subr.bf16.mxu0 %v7064_v15  ;;  %7353 = vmatprep.subr.bf16.mxu1 %v7064_v15 }
 0x195   : > { %7067 = vmatpush3.bf16.msra.mxu0 %v7064_v15  ;;  %7355 = vmatpush3.bf16.msra.mxu1 %v7064_v15  ;;  %v3351_v15 = vsel %vm241_vm0, %v8623_v42, %v3350_v60  ;;  %v4309_v60 = vld [vmem:[%s8988_s1 + $0x378] sm:$0xff] }
 0x196   : > { %7069 = vmatprep.subr.bf16.mxu0 %v7068_v21  ;;  %7357 = vmatprep.subr.bf16.mxu1 %v7068_v21 }
 0x199   : > { %7071 = vmatpush3.bf16.msra.mxu0 %v7068_v21  ;;  %7359 = vmatpush3.bf16.msra.mxu1 %v7068_v21  ;;  %v2544_v21 = vsel %vm416_vm1, %v2542_v0, %v2543_v2 }
 0x19a   : > { %7073 = vmatprep.subr.bf16.mxu0 %v7072_v23  ;;  %7361 = vmatprep.subr.bf16.mxu1 %v7072_v23 }
 0x19d   : > { %7075 = vmatpush3.bf16.msra.mxu0 %v7072_v23  ;;  %7363 = vmatpush3.bf16.msra.mxu1 %v7072_v23  ;;  %v4284_v23 = vld [vmem:[%s8988_s1 + $0x2b0] sm:$0xff] }
 0x19e   : > { %7077 = vmatprep.subr.bf16.mxu0 %v7076_v26  ;;  %7365 = vmatprep.subr.bf16.mxu1 %v7076_v26  ;;  %v7132_v9 = vpack.c.bf16 %v4285_v24, %v4284_v23  ;;  %v8838_v24 = vld [vmem:[%s8767_s24 + $0x8] sm:$0xff] }
 0x1a1   : > { %7079 = vmatpush3.bf16.msra.mxu0 %v7076_v26  ;;  %7367 = vmatpush3.bf16.msra.mxu1 %v7076_v26  ;;  %v4286_v26 = vld [vmem:[%s8988_s1 + $0x2c0] sm:$0xff] }
 0x1a2   : > { %7081 = vmatprep.subr.bf16.mxu0 %v7080_v28  ;;  %7369 = vmatprep.subr.bf16.mxu1 %v7080_v28  ;;  %v7136_v27 = vpack.c.bf16 %v4287_v25, %v4286_v26  ;;  %v4313_v26 = vld [vmem:[%s8988_s1 + $0x398] sm:$0xff]  ;;  %v3651_v25 = vrot.slane %v8776_v52, 1 }
 0x1a5   : > { %7083 = vmatpush3.bf16.msra.mxu0 %v7080_v28  ;;  %7371 = vmatpush3.bf16.msra.mxu1 %v7080_v28  ;;  %v4288_v28 = vld [vmem:[%s8988_s1 + $0x2d0] sm:$0xff] }
 0x1a6   : > { %7085 = vmatprep.subr.bf16.mxu0 %v7084_v29  ;;  %7373 = vmatprep.subr.bf16.mxu1 %v7084_v29  ;;  %v7140_v48 = vpack.c.bf16 %v4289_v40, %v4288_v28  ;;  %v4314_v40 = vld [vmem:[%s8988_s1 + $0x3a0] sm:$0xff] }
 0x1a9   : > { %7087 = vmatpush3.bf16.msra.mxu0 %v7084_v29  ;;  %7375 = vmatpush3.bf16.msra.mxu1 %v7084_v29  ;;  %v4290_v29 = vld [vmem:[%s8988_s1 + $0x2e0] sm:$0xff] }
 0x1aa   : > { %7089 = vmatprep.subr.bf16.mxu0 %v7088_v4  ;;  %7377 = vmatprep.subr.bf16.mxu1 %v7088_v4  ;;  %v7144_v31 = vpack.c.bf16 %v4291_v30, %v4290_v29 }
 0x1ac   : > { %5892 = vmatmul.mubr.f32.vlgmr.msra.gmra.mrb[2].mxu0 %v8608_v13  ;;  %6207 = vmatmul.mubr.f32.vlgmr.msra.gmra.mrb[2].mxu1 %v8611_v32  ;;  %v4299_v13 = vld [vmem:[%s8988_s1 + $0x328] sm:$0xff] }
 0x1ad   : > { %7091 = vmatpush3.bf16.msra.mxu0 %v7088_v4  ;;  %7379 = vmatpush3.bf16.msra.mxu1 %v7088_v4  ;;  %v4292_v4 = vld [vmem:[%s8988_s1 + $0x2f0] sm:$0xff] }
 0x1ae   : > { %7093 = vmatprep.subr.bf16.mxu0 %v7092_v43  ;;  %7381 = vmatprep.subr.bf16.mxu1 %v7092_v43  ;;  %v7148_v37 = vpack.c.bf16 %v4293_v33, %v4292_v4  ;;  %v4317_v4 = vld [vmem:[%s8988_s1 + $0x3b8] sm:$0xff]  ;;  %v4318_v33 = vld [vmem:[%s8988_s1 + $0x3c0] sm:$0xff] }
 0x1af   : > { %5926 = vmatprep.mubr.f32.mxu0 %v2444_v34  ;;  %6241 = vmatprep.mubr.f32.mxu1 %v8638_v6  ;;  %v4297_v34 = vld [vmem:[%s8988_s1 + $0x318] sm:$0xff] }
 0x1b0   : > { %v7156_v16 = vpack.c.bf16 %v4297_v34, %v4296_v47  ;;  %v4324_v34 = vld [vmem:[%s8988_s1 + $0x3f0] sm:$0xff] }
 0x1b1   : > { %7095 = vmatpush3.bf16.msra.mxu0 %v7092_v43  ;;  %7383 = vmatpush3.bf16.msra.mxu1 %v7092_v43  ;;  %v3450_v43 = vrot.slane %v8675_v20, 2 }
 0x1b2   : > { %7097 = vmatprep.subr.bf16.mxu0 %v7096_v35  ;;  %7385 = vmatprep.subr.bf16.mxu1 %v7096_v35 }
 0x1b3   : > { %v3451_v49 = vsel %vm416_vm1, %v8695_v7, %v3450_v43  ;;  %v4322_v43 = vld [vmem:[%s8988_s1 + $0x3e0] sm:$0xff] }
 0x1b5   : > { %7099 = vmatpush3.bf16.msra.mxu0 %v7096_v35  ;;  %7387 = vmatpush3.bf16.msra.mxu1 %v7096_v35  ;;  %v2546_v35 = vsel %vm416_vm1, %v2543_v2, %v2545_v41 }
 0x1b6   : > { %7101 = vmatprep.subr.bf16.mxu0 %v7100_v51  ;;  %7389 = vmatprep.subr.bf16.mxu1 %v7100_v51 }
 0x1b9   : > { %7103 = vmatpush3.bf16.msra.mxu0 %v7100_v51  ;;  %7391 = vmatpush3.bf16.msra.mxu1 %v7100_v51  ;;  %v4298_v51 = vld [vmem:[%s8988_s1 + $0x320] sm:$0xff] }
 0x1ba   : > { %7105 = vmatprep.subr.bf16.mxu0 %v7104_v53  ;;  %7393 = vmatprep.subr.bf16.mxu1 %v7104_v53  ;;  %v7160_v50 = vpack.c.bf16 %v4299_v13, %v4298_v51  ;;  %v8894_v51 = vld [vmem:[%s8554_s6 + $0x10] sm:$0x3]  ;;  %v4326_v13 = vld [vmem:[%s8988_s1 + $0x400] sm:$0xff] }
 0x1bd   : > { %7107 = vmatpush3.bf16.msra.mxu0 %v7104_v53  ;;  %7395 = vmatpush3.bf16.msra.mxu1 %v7104_v53  ;;  %v4300_v53 = vld [vmem:[%s8988_s1 + $0x330] sm:$0xff] }
 0x1be   : > { %7109 = vmatprep.subr.bf16.mxu0 %v7108_v54  ;;  %7397 = vmatprep.subr.bf16.mxu1 %v7108_v54  ;;  %v7164_v5 = vpack.c.bf16 %v4301_v36, %v4300_v53  ;;  %v2749_v36 = vrot.slane %v8894_v51, 1 }
 0x1c1   : > { %7111 = vmatpush3.bf16.msra.mxu0 %v7108_v54  ;;  %7399 = vmatpush3.bf16.msra.mxu1 %v7108_v54  ;;  %v4302_v54 = vld [vmem:[%s8988_s1 + $0x340] sm:$0xff] }
 0x1c2   : > { %7113 = vmatprep.subr.bf16.mxu0 %v7112_v45  ;;  %7401 = vmatprep.subr.bf16.mxu1 %v7112_v45 }
 0x1c5   : > { %7115 = vmatpush3.bf16.msra.mxu0 %v7112_v45  ;;  %7403 = vmatpush3.bf16.msra.mxu1 %v7112_v45  ;;  %v4305_v45 = vld [vmem:[%s8988_s1 + $0x358] sm:$0xff] }
 0x1c6   : > { %7117 = vmatprep.subr.bf16.mxu0 %v7116_v56  ;;  %7405 = vmatprep.subr.bf16.mxu1 %v7116_v56  ;;  %v7172_v18 = vpack.c.bf16 %v4305_v45, %v4304_v12  ;;  %v3752_v12 = vrot.slane %v8838_v24, 2  ;;  %v2750_v45 = vsel %vm241_vm0, %v8623_v42, %v2749_v36 }
 0x1c9   : > { %7119 = vmatpush3.bf16.msra.mxu0 %v7116_v56  ;;  %7407 = vmatpush3.bf16.msra.mxu1 %v7116_v56  ;;  %v4307_v56 = vld [vmem:[%s8988_s1 + $0x368] sm:$0xff] }
 0x1ca   : > { %7121 = vmatprep.subr.bf16.mxu0 %v7120_v61  ;;  %7409 = vmatprep.subr.bf16.mxu1 %v7120_v61  ;;  %v7176_v20 = vpack.c.bf16 %v4307_v56, %v4306_v55  ;;  %v4330_v56 = vld [vmem:[%s8988_s1 + $0x420] sm:$0xff] }
 0x1cc   : > { %5927 = vmatmul.mubr.f32.vlgmr.msra.gmra.mrb[2].mxu0 %v2446_v8  ;;  %6242 = vmatmul.mubr.f32.vlgmr.msra.gmra.mrb[2].mxu1 %v3351_v15 }
 0x1cd   : > { %7123 = vmatpush3.bf16.msra.mxu0 %v7120_v61  ;;  %7411 = vmatpush3.bf16.msra.mxu1 %v7120_v61 }
 0x1ce   : > { %7125 = vmatprep.subr.bf16.mxu0 %v7124_v11  ;;  %7413 = vmatprep.subr.bf16.mxu1 %v7124_v11 }
 0x1cf   : > { %5961 = vmatprep.mubr.f32.mxu0 %v2544_v21  ;;  %6276 = vmatprep.mubr.f32.mxu1 %v8713_v17  ;;  %v4310_v21 = vld [vmem:[%s8988_s1 + $0x380] sm:$0xff] }
 0x1d1   : > { %7127 = vmatpush3.bf16.msra.mxu0 %v7124_v11  ;;  %7415 = vmatpush3.bf16.msra.mxu1 %v7124_v11  ;;  %v7180_v11 = vpack.c.bf16 %v4309_v60, %v4308_v44  ;;  %v4334_v60 = vld [vmem:[%s8988_s1 + $0x440] sm:$0xff] }
 0x1d2   : > { %7129 = vmatprep.subr.bf16.mxu0 %v7128_v10  ;;  %7417 = vmatprep.subr.bf16.mxu1 %v7128_v10 }
 0x1d5   : > { %7131 = vmatpush3.bf16.msra.mxu0 %v7128_v10  ;;  %7419 = vmatpush3.bf16.msra.mxu1 %v7128_v10  ;;  %v4311_v10 = vld [vmem:[%s8988_s1 + $0x388] sm:$0xff] }
 0x1d6   : > { %7133 = vmatprep.subr.bf16.mxu0 %v7132_v9  ;;  %7421 = vmatprep.subr.bf16.mxu1 %v7132_v9  ;;  %v7184_v23 = vpack.c.bf16 %v4311_v10, %v4310_v21  ;;  %v2849_v21 = vrot.slane %v8894_v51, 2 }
 0x1d8   : > { %v2850_v10 = vsel %vm416_vm1, %v8695_v7, %v2849_v21 }
 0x1d9   : > { %7135 = vmatpush3.bf16.msra.mxu0 %v7132_v9  ;;  %7423 = vmatpush3.bf16.msra.mxu1 %v7132_v9  ;;  %v4312_v9 = vld [vmem:[%s8988_s1 + $0x390] sm:$0xff] }
 0x1da   : > { %7137 = vmatprep.subr.bf16.mxu0 %v7136_v27  ;;  %7425 = vmatprep.subr.bf16.mxu1 %v7136_v27  ;;  %v7188_v28 = vpack.c.bf16 %v4313_v26, %v4312_v9 }
 0x1dd   : > { %7139 = vmatpush3.bf16.msra.mxu0 %v7136_v27  ;;  %7427 = vmatpush3.bf16.msra.mxu1 %v7136_v27  ;;  %v3652_v27 = vrot.slane %v8838_v24, 1 }
 0x1de   : > { %7141 = vmatprep.subr.bf16.mxu0 %v7140_v48  ;;  %7429 = vmatprep.subr.bf16.mxu1 %v7140_v48 }
 0x1df   : > { %v3653_v29 = vsel %vm241_vm0, %v3651_v25, %v3652_v27 }
 0x1e1   : > { %7143 = vmatpush3.bf16.msra.mxu0 %v7140_v48  ;;  %7431 = vmatpush3.bf16.msra.mxu1 %v7140_v48  ;;  %v4315_v48 = vld [vmem:[%s8988_s1 + $0x3a8] sm:$0xff] }
 0x1e2   : > { %7145 = vmatprep.subr.bf16.mxu0 %v7144_v31  ;;  %7433 = vmatprep.subr.bf16.mxu1 %v7144_v31  ;;  %v7192_v30 = vpack.c.bf16 %v4315_v48, %v4314_v40 }
 0x1e5   : > { %7147 = vmatpush3.bf16.msra.mxu0 %v7144_v31  ;;  %7435 = vmatpush3.bf16.msra.mxu1 %v7144_v31  ;;  %v4316_v31 = vld [vmem:[%s8988_s1 + $0x3b0] sm:$0xff] }
 0x1e6   : > { %7149 = vmatprep.subr.bf16.mxu0 %v7148_v37  ;;  %7437 = vmatprep.subr.bf16.mxu1 %v7148_v37 }
 0x1e9   : > { %7151 = vmatpush3.bf16.msra.mxu0 %v7148_v37  ;;  %7439 = vmatpush3.bf16.msra.mxu1 %v7148_v37  ;;  %v4319_v37 = vld [vmem:[%s8988_s1 + $0x3c8] sm:$0xff] }
 0x1ea   : > { %7153 = vmatprep.subr.bf16.mxu0 %v7152_v46  ;;  %7441 = vmatprep.subr.bf16.mxu1 %v7152_v46  ;;  %v7200_v38 = vpack.c.bf16 %v4319_v37, %v4318_v33 }
 0x1ec   : > { %5962 = vmatmul.mubr.f32.vlgmr.msra.gmra.mrb[2].mxu0 %v2546_v35  ;;  %6277 = vmatmul.mubr.f32.vlgmr.msra.gmra.mrb[2].mxu1 %v3451_v49  ;;  %v4325_v35 = vld [vmem:[%s8988_s1 + $0x3f8] sm:$0xff]  ;;  %v8891_v49 = vld [vmem:[%s8767_s24 + $0x10] sm:$0x3] }
 0x1ed   : > { %7155 = vmatpush3.bf16.msra.mxu0 %v7152_v46  ;;  %7443 = vmatpush3.bf16.msra.mxu1 %v7152_v46  ;;  %v4323_v46 = vld [vmem:[%s8988_s1 + $0x3e8] sm:$0xff]  ;;  %v3654_v53 = vrot.slane %v8891_v49, 1 }
 0x1ee   : > { %7157 = vmatprep.subr.bf16.mxu0 %v7156_v16  ;;  %7445 = vmatprep.subr.bf16.mxu1 %v7156_v16  ;;  %v7208_v47 = vpack.c.bf16 %v4323_v46, %v4322_v43 }
 0x1ef   : > { %5996 = vmatprep.mubr.f32.mxu0 %v8567_v3  ;;  %6311 = vmatprep.mubr.f32.mxu1 %v8776_v52  ;;  %v7168_v3 = vpack.c.bf16 %v4303_v22, %v4302_v54  ;;  %v4328_v54 = vld [vmem:[%s8988_s1 + $0x410] sm:$0xff]  ;;  %v4329_v22 = vld [vmem:[%s8988_s1 + $0x418] sm:$0xff] }
 0x1f0   : > { %v7220_v55 = vpack.c.bf16 %v4329_v22, %v4328_v54 }
 0x1f1   : > { %7159 = vmatpush3.bf16.msra.mxu0 %v7156_v16  ;;  %7447 = vmatpush3.bf16.msra.mxu1 %v7156_v16  ;;  %v7212_v16 = vpack.c.bf16 %v4325_v35, %v4324_v34 }
 0x1f2   : > { %7161 = vmatprep.subr.bf16.mxu0 %v7160_v50  ;;  %7449 = vmatprep.subr.bf16.mxu1 %v7160_v50 }
 0x1f5   : > { %7163 = vmatpush3.bf16.msra.mxu0 %v7160_v50  ;;  %7451 = vmatpush3.bf16.msra.mxu1 %v7160_v50  ;;  %v4327_v50 = vld [vmem:[%s8988_s1 + $0x408] sm:$0xff] }
 0x1f6   : > { %7165 = vmatprep.subr.bf16.mxu0 %v7164_v5  ;;  %7453 = vmatprep.subr.bf16.mxu1 %v7164_v5 }
 0x1f9   : > { %7167 = vmatpush3.bf16.msra.mxu0 %v7164_v5  ;;  %7455 = vmatpush3.bf16.msra.mxu1 %v7164_v5  ;;  %v7216_v5 = vpack.c.bf16 %v4327_v50, %v4326_v13 }
 0x1fa   : > { %7169 = vmatprep.subr.bf16.mxu0 %v7168_v3  ;;  %7457 = vmatprep.subr.bf16.mxu1 %v7168_v3 }
 0x1fd   : > { %7171 = vmatpush3.bf16.msra.mxu0 %v7168_v3  ;;  %7459 = vmatpush3.bf16.msra.mxu1 %v7168_v3  ;;  %v3751_v3 = vrot.slane %v8776_v52, 2  ;;  %v4331_v52 = vld [vmem:[%s8988_s1 + $0x428] sm:$0xff] }
 0x1fe   : > { %7173 = vmatprep.subr.bf16.mxu0 %v7172_v18  ;;  %7461 = vmatprep.subr.bf16.mxu1 %v7172_v18 }
 0x1ff   : > { %v5438_v58 = vpop.f32.mrb[0].mxu0  ;;  %v5753_v59 = vpop.f32.mrb[0].mxu1  ;;  %v3753_v42 = vsel %vm416_vm1, %v3751_v3, %v3752_v12 }
 0x200   : > { %v1122_v61 = vadd.f32 %v5438_v58, %v8810_v57  ;;  %v2026_v62 = vadd.f32 %v5753_v59, %v8810_v57  ;;  %v1104_v63 = vpop.f32.mrb[1].mxu0  ;;  %v2014_v0 = vpop.f32.mrb[1].mxu1  ;;  %v4332_v58 = vld [vmem:[%s8988_s1 + $0x430] sm:$0xff]  ;;  %v4333_v59 = vld [vmem:[%s8988_s1 + $0x438] sm:$0xff] }
 0x201   : > { %v1121_v1 = vadd.f32 %v8810_v57, %v1104_v63  ;;  %v2025_v2 = vadd.f32 %v8810_v57, %v2014_v0  ;;  %7175 = vmatpush3.bf16.msra.mxu0 %v7172_v18  ;;  %7463 = vmatpush3.bf16.msra.mxu1 %v7172_v18  ;;  %v3655_v18 = vsel %vm241_vm0, %v3652_v27, %v3654_v53  ;;  %v4337_v63 = vld [vmem:[%s8988_s1 + $0x458] sm:$0xff] }
 0x202   : > { %v1124_v8 = vmax.f32 %v1122_v61, 0.0  ;;  %v2028_v15 = vmax.f32 %v2026_v62, 0.0  ;;  %7177 = vmatprep.subr.bf16.mxu0 %v7176_v20  ;;  %7465 = vmatprep.subr.bf16.mxu1 %v7176_v20  ;;  %v7228_v44 = vpack.c.bf16 %v4333_v59, %v4332_v58  ;;  %v4335_v61 = vld [vmem:[%s8988_s1 + $0x448] sm:$0xff] }
 0x203   : > { %v1123_v14 = vmax.f32 %v1121_v1, 0.0  ;;  %v2027_v19 = vmax.f32 %v2025_v2, 0.0  ;;  %v7232_v62 = vpack.c.bf16 %v4335_v61, %v4334_v60  ;;  %v4338_v1 = vld [vmem:[%s8988_s1 + $0x460] sm:$0xff]  ;;  %v4339_v2 = vld [vmem:[%s8988_s1 + $0x468] sm:$0xff] }
 0x204   : > { %1126 = vst [vmem:[%s8823_s10 + $0x8] sm:$0xff] %v1124_v8  ;;  %4213 = vst [vmem:[%s8823_s10 + $0x18] sm:$0xff] %v2028_v15  ;;  %v7240_v8 = vpack.c.bf16 %v4339_v2, %v4338_v1  ;;  %v4340_v15 = vld [vmem:[%s8988_s1 + $0x470] sm:$0xff] }
 0x205   : > { %1125 = vst [vmem:[%s8823_s10] sm:$0xff] %v1123_v14  ;;  %4212 = vst [vmem:[%s8823_s10 + $0x10] sm:$0xff] %v2027_v19  ;;  %7179 = vmatpush3.bf16.msra.mxu0 %v7176_v20  ;;  %7467 = vmatpush3.bf16.msra.mxu1 %v7176_v20  ;;  %v7224_v20 = vpack.c.bf16 %v4331_v52, %v4330_v56  ;;  %v3754_v19 = vrot.slane %v8891_v49, 2 }
 0x206   : > { %7181 = vmatprep.subr.bf16.mxu0 %v7180_v11  ;;  %7469 = vmatprep.subr.bf16.mxu1 %v7180_v11 }
 0x209   : > { %7183 = vmatpush3.bf16.msra.mxu0 %v7180_v11  ;;  %7471 = vmatpush3.bf16.msra.mxu1 %v7180_v11  ;;  %v4341_v11 = vld [vmem:[%s8988_s1 + $0x478] sm:$0xff] }
 0x20a   : > { %7185 = vmatprep.subr.bf16.mxu0 %v7184_v23  ;;  %7473 = vmatprep.subr.bf16.mxu1 %v7184_v23  ;;  %v7244_v14 = vpack.c.bf16 %v4341_v11, %v4340_v15 }
 0x20c   : > { %5997 = vmatmul.mubr.f32.vlgmr.msra.gmra.mrb[2].mxu0 %v8611_v32  ;;  %6312 = vmatmul.mubr.f32.vlgmr.msra.gmra.mrb[2].mxu1 %v8838_v24  ;;  %v7196_v32 = vpack.c.bf16 %v4317_v4, %v4316_v31 }
 0x20d   : > { %7187 = vmatpush3.bf16.msra.mxu0 %v7184_v23  ;;  %7475 = vmatpush3.bf16.msra.mxu1 %v7184_v23  ;;  %v3755_v23 = vsel %vm416_vm1, %v3752_v12, %v3754_v19 }
 0x20e   : > { %7189 = vmatprep.subr.bf16.mxu0 %v7188_v28  ;;  %7477 = vmatprep.subr.bf16.mxu1 %v7188_v28 }
 0x20f   : > { %6031 = vmatprep.mubr.f32.mxu0 %v8638_v6  ;;  %6346 = vmatprep.mubr.f32.mxu1 %v3653_v29  ;;  %v4320_v6 = vld [vmem:[%s8988_s1 + $0x3d0] sm:$0xff] }
 0x210   : > { %v7204_v41 = vpack.c.bf16 %v4321_v39, %v4320_v6 }
 0x211   : > { %7191 = vmatpush3.bf16.msra.mxu0 %v7188_v28  ;;  %7479 = vmatpush3.bf16.msra.mxu1 %v7188_v28 }
 0x212   : > { %7193 = vmatprep.subr.bf16.mxu0 %v7192_v30  ;;  %7481 = vmatprep.subr.bf16.mxu1 %v7192_v30 }
 0x215   : > { %7195 = vmatpush3.bf16.msra.mxu0 %v7192_v30  ;;  %7483 = vmatpush3.bf16.msra.mxu1 %v7192_v30 }
 0x216   : > { %7197 = vmatprep.subr.bf16.mxu0 %v7196_v32  ;;  %7485 = vmatprep.subr.bf16.mxu1 %v7196_v32 }
 0x219   : > { %7199 = vmatpush3.bf16.msra.mxu0 %v7196_v32  ;;  %7487 = vmatpush3.bf16.msra.mxu1 %v7196_v32 }
 0x21a   : > { %7201 = vmatprep.subr.bf16.mxu0 %v7200_v38  ;;  %7489 = vmatprep.subr.bf16.mxu1 %v7200_v38 }
 0x21d   : > { %7203 = vmatpush3.bf16.msra.mxu0 %v7200_v38  ;;  %7491 = vmatpush3.bf16.msra.mxu1 %v7200_v38 }
 0x21e   : > { %7205 = vmatprep.subr.bf16.mxu0 %v7204_v41  ;;  %7493 = vmatprep.subr.bf16.mxu1 %v7204_v41 }
 0x221   : > { %7207 = vmatpush3.bf16.msra.mxu0 %v7204_v41  ;;  %7495 = vmatpush3.bf16.msra.mxu1 %v7204_v41 }
 0x222   : > { %7209 = vmatprep.subr.bf16.mxu0 %v7208_v47  ;;  %7497 = vmatprep.subr.bf16.mxu1 %v7208_v47 }
 0x225   : > { %7211 = vmatpush3.bf16.msra.mxu0 %v7208_v47  ;;  %7499 = vmatpush3.bf16.msra.mxu1 %v7208_v47 }
 0x226   : > { %7213 = vmatprep.subr.bf16.mxu0 %v7212_v16  ;;  %7501 = vmatprep.subr.bf16.mxu1 %v7212_v16 }
 0x229   : > { %7215 = vmatpush3.bf16.msra.mxu0 %v7212_v16  ;;  %7503 = vmatpush3.bf16.msra.mxu1 %v7212_v16 }
 0x22a   : > { %7217 = vmatprep.subr.bf16.mxu0 %v7216_v5  ;;  %7505 = vmatprep.subr.bf16.mxu1 %v7216_v5 }
 0x22c   : > { %6032 = vmatmul.mubr.f32.vlgmr.msra.gmra.mrb[2].mxu0 %v2750_v45  ;;  %6347 = vmatmul.mubr.f32.vlgmr.msra.gmra.mrb[2].mxu1 %v3655_v18 }
 0x22d   : > { %7219 = vmatpush3.bf16.msra.mxu0 %v7216_v5  ;;  %7507 = vmatpush3.bf16.msra.mxu1 %v7216_v5 }
 0x22e   : > { %7221 = vmatprep.subr.bf16.mxu0 %v7220_v55  ;;  %7509 = vmatprep.subr.bf16.mxu1 %v7220_v55 }
 0x22f   : > { %6066 = vmatprep.mubr.f32.mxu0 %v8713_v17  ;;  %6381 = vmatprep.mubr.f32.mxu1 %v3753_v42  ;;  %v4336_v17 = vld [vmem:[%s8988_s1 + $0x450] sm:$0xff] }
 0x230   : > { %v7236_v0 = vpack.c.bf16 %v4337_v63, %v4336_v17 }
 0x231   : > { %7223 = vmatpush3.bf16.msra.mxu0 %v7220_v55  ;;  %7511 = vmatpush3.bf16.msra.mxu1 %v7220_v55 }
 0x232   : > { %7225 = vmatprep.subr.bf16.mxu0 %v7224_v20  ;;  %7513 = vmatprep.subr.bf16.mxu1 %v7224_v20 }
 0x235   : > { %7227 = vmatpush3.bf16.msra.mxu0 %v7224_v20  ;;  %7515 = vmatpush3.bf16.msra.mxu1 %v7224_v20 }
 0x236   : > { %7229 = vmatprep.subr.bf16.mxu0 %v7228_v44  ;;  %7517 = vmatprep.subr.bf16.mxu1 %v7228_v44 }
 0x239   : > { %7231 = vmatpush3.bf16.msra.mxu0 %v7228_v44  ;;  %7519 = vmatpush3.bf16.msra.mxu1 %v7228_v44 }
 0x23a   : > { %7233 = vmatprep.subr.bf16.mxu0 %v7232_v62  ;;  %7521 = vmatprep.subr.bf16.mxu1 %v7232_v62 }
 0x23d   : > { %7235 = vmatpush3.bf16.msra.mxu0 %v7232_v62  ;;  %7523 = vmatpush3.bf16.msra.mxu1 %v7232_v62 }
 0x23e   : > { %7237 = vmatprep.subr.bf16.mxu0 %v7236_v0  ;;  %7525 = vmatprep.subr.bf16.mxu1 %v7236_v0 }
 0x241   : > { %7239 = vmatpush3.bf16.msra.mxu0 %v7236_v0  ;;  %7527 = vmatpush3.bf16.msra.mxu1 %v7236_v0 }
 0x242   : > { %7241 = vmatprep.subr.bf16.mxu0 %v7240_v8  ;;  %7529 = vmatprep.subr.bf16.mxu1 %v7240_v8 }
 0x245   : > { %7243 = vmatpush3.bf16.msra.mxu0 %v7240_v8  ;;  %7531 = vmatpush3.bf16.msra.mxu1 %v7240_v8 }
 0x246   : > { %7245 = vmatprep.subr.bf16.mxu0 %v7244_v14  ;;  %7533 = vmatprep.subr.bf16.mxu1 %v7244_v14 }
 0x249   : > { %7247 = vmatpush3.bf16.msra.mxu0 %v7244_v14  ;;  %7535 = vmatpush3.bf16.msra.mxu1 %v7244_v14 }
 0x24c   : > { %6067 = vmatmul.mubr.f32.vlgmr.msra.gmra.mrb[2].mxu0 %v2850_v10  ;;  %6382 = vmatmul.mubr.f32.vlgmr.msra.gmra.mrb[2].mxu1 %v3755_v23 }
 0x31f   : > { %v6068_v9 = vpop.f32.mrb[2].mxu0  ;;  %v6383_v26 = vpop.f32.mrb[2].mxu1 }
 0x320   : > { %v2931_v25 = vadd.f32 %v6068_v9, %v8810_v57  ;;  %v3836_v27 = vadd.f32 %v6383_v26, %v8810_v57  ;;  %v2919_v28 = vpop.f32.mrb[3].mxu0  ;;  %v3824_v40 = vpop.f32.mrb[3].mxu1 }
 0x321   : > { %v2930_v7 = vadd.f32 %v8810_v57, %v2919_v28  ;;  %v3835_v24 = vadd.f32 %v8810_v57, %v3824_v40 }
 0x322   : > { %v2933_v48 = vmax.f32 %v2931_v25, 0.0  ;;  %v3838_v29 = vmax.f32 %v3836_v27, 0.0 }
 0x323   : > { %v2932_v30 = vmax.f32 %v2930_v7, 0.0  ;;  %v3837_v31 = vmax.f32 %v3835_v24, 0.0 }
 0x324   : > { %4343 = vst [vmem:[%s8823_s10 + $0x28] sm:$0xff] %v2933_v48  ;;  %4473 = vst [vmem:[%s8823_s10 + $0x38] sm:$0xff] %v3838_v29 }
 0x325   : > { %4342 = vst [vmem:[%s8823_s10 + $0x20] sm:$0xff] %v2932_v30  ;;  %4472 = vst [vmem:[%s8823_s10 + $0x30] sm:$0xff] %v3837_v31 }
 0x326 PF: > { %s13_s16 = sadd.s32 1, %s7679_s16   ;;  %s8992_s12 = smov %s7671_s14 }
 0x327   : > { %p10_p13 = scmp.ge.s32.totalorder %s13_s16, 10   ;;  %s8993_s13 = smov %s7675_s15 }
 0x328   : > { %s8994_s14 = smov %s8997_s17  ;;  %s8995_s15 = smov %s9001_s18 }
 0x329   :  { %12 = sbr.rel (!%p10_p13) target bundleno = 3 (0x3), region = 79 }

</bundles_post_ra>
